<compile_context>
chip_gen: v6e
topology: v6e:2x2x1
jax: 0.10.0
libtpu: 0.0.40
codegen_flags: <defaults>
</compile_context>

<pallas_src>
import functools

import jax
import jax.numpy as jnp
from jax.experimental import pallas as pl
from jax.experimental.pallas import tpu as pltpu


# ----------------------------- kernel helpers -----------------------------

def _layer_norm(x, w, b, eps=1e-5):
    mu = jnp.mean(x, axis=-1, keepdims=True)
    var = jnp.mean(jnp.square(x - mu), axis=-1, keepdims=True)
    return (x - mu) * jax.lax.rsqrt(var + eps) * w + b


# ------------------------------- the kernel -------------------------------

def decoder_layer_kernel(n_heads,
                         tgt_ref, mem_ref,
                         wq_s_ref, wk_s_ref, wv_s_ref, wo_s_ref,
                         wq_c_ref, wk_c_ref, wv_c_ref, wo_c_ref,
                         w1_ref, b1_ref, w2_ref, b2_ref,
                         ln1_w_ref, ln1_b_ref,
                         ln2_w_ref, ln2_b_ref,
                         ln3_w_ref, ln3_b_ref,
                         out_ref):
    bb, S, D = tgt_ref.shape          # batch-block, tgt seq, d_model
    M = mem_ref.shape[1]              # memory seq
    H = n_heads
    dh = D // H
    f32, bf16 = jnp.float32, jnp.bfloat16

    def mha(q_rows, kv_rows, L_kv, wq_ref, wk_ref, wv_ref, wo_ref):
        """q_rows (bb*S, D) bf16, kv_rows (bb*L_kv, D) bf16 -> (bb*S, D) f32."""
        # Full-width projections: (rows, D) x (D, D).  1/sqrt(dh) is folded
        # into Wq on the host.
        q = jnp.dot(q_rows, wq_ref[...], preferred_element_type=f32)
        k = jnp.dot(kv_rows, wk_ref[...], preferred_element_type=f32)
        v = jnp.dot(kv_rows, wv_ref[...], preferred_element_type=f32)

        # One bf16 cast per tensor; heads only appear below as lane slices.
        qb = q.astype(bf16).reshape(bb, S, D)
        kb = k.astype(bf16).reshape(bb, L_kv, D)
        vb = v.astype(bf16).reshape(bb, L_kv, D)

        # Score / context matmuls are inherently dh-wide; run them per head on
        # static lane slices (statically unrolled, H is small).  Same MXU work
        # as a (bb*H)-batched einsum but avoids 4-D transposes and any
        # activation/weight replication.
        ctx_heads = []
        for h in range(H):
            sl = slice(h * dh, (h + 1) * dh)
            qh, kh, vh = qb[:, :, sl], kb[:, :, sl], vb[:, :, sl]
            s = jnp.einsum('bqd,bkd->bqk', qh, kh,
                           preferred_element_type=f32)          # (bb, S, L_kv)
            # Softmax in f32; reciprocal goes to the EUP slot.
            s = s - jnp.max(s, axis=-1, keepdims=True)
            p = jnp.exp(s)
            p = p * pl.reciprocal(jnp.sum(p, axis=-1, keepdims=True),
                                  approx=True)
            ctx_heads.append(
                jnp.einsum('bqk,bkd->bqd', p.astype(bf16), vh,
                           preferred_element_type=f32).astype(bf16))

        # concat-over-heads + single (D, D) output projection (K = D).
        ctx = jnp.concatenate(ctx_heads, axis=-1)                # (bb, S, D)
        return jnp.dot(ctx.reshape(bb * S, D), wo_ref[...],
                       preferred_element_type=f32)               # (bb*S, D)

    x_in = tgt_ref[...].reshape(bb * S, D)        # bf16 rows (row-folded)
    mem_in = mem_ref[...].reshape(bb * M, D)      # bf16 rows

    # 1) self-attention + residual + norm1            (dropout1 == identity)
    sa = mha(x_in, x_in, S, wq_s_ref, wk_s_ref, wv_s_ref, wo_s_ref)
    xf = _layer_norm(x_in.astype(f32) + sa, ln1_w_ref[...], ln1_b_ref[...])

    # 2) cross-attention over memory + residual + norm2 (dropout2 == identity)
    ca = mha(xf.astype(bf16), mem_in, M,
             wq_c_ref, wk_c_ref, wv_c_ref, wo_c_ref)
    xf = _layer_norm(xf + ca, ln2_w_ref[...], ln2_b_ref[...])

    # 3) feed-forward (linear1 -> relu -> linear2) + residual + norm3
    h = jnp.dot(xf.astype(bf16), w1_ref[...],
                preferred_element_type=f32) + b1_ref[...]
    h = jnp.maximum(h, 0.0)
    ff = jnp.dot(h.astype(bf16), w2_ref[...],
                 preferred_element_type=f32) + b2_ref[...]
    xf = _layer_norm(xf + ff, ln3_w_ref[...], ln3_b_ref[...])

    out_ref[...] = xf.reshape(bb, S, D).astype(out_ref.dtype)


# ------------------------------ host wrapper -------------------------------

def transformer_decoder_layer(tgt, memory, params, n_heads, *, batch_block=None):
    B, S, D = tgt.shape
    _, M, _ = memory.shape
    H = n_heads
    assert D % H == 0
    dh = D // H
    FF = params["w1"].shape[1]

    if batch_block is None:
        # Two batch blocks by default so v7x's two TensorCores each get one
        # (batch axis is "parallel").  On single-core v5e / v6e the second grid
        # step only adds ~0.35us; pass batch_block=B to collapse the grid.
        batch_block = B if (B < 2 or B % 2) else B // 2
    bb = batch_block
    assert B % bb == 0, "batch must be divisible by batch_block"
    nb = B // bb

    bf16, f32 = jnp.bfloat16, jnp.float32
    scale = 1.0 / float(dh) ** 0.5

    weights = [
        (params["wq_s"] * scale).astype(bf16),    # scale folded into Wq
        params["wk_s"].astype(bf16),
        params["wv_s"].astype(bf16),
        params["wo_s"].astype(bf16),
        (params["wq_c"] * scale).astype(bf16),
        params["wk_c"].astype(bf16),
        params["wv_c"].astype(bf16),
        params["wo_c"].astype(bf16),
        params["w1"].astype(bf16),
        params["b1"].astype(f32),
        params["w2"].astype(bf16),
        params["b2"].astype(f32),
        params["ln1_w"].astype(f32), params["ln1_b"].astype(f32),
        params["ln2_w"].astype(f32), params["ln2_b"].astype(f32),
        params["ln3_w"].astype(f32), params["ln3_b"].astype(f32),
    ]

    # Activations enter the kernel in bf16 (halves activation DMA bytes);
    # residual / LayerNorm math inside the kernel stays f32.
    tgt_bf = tgt.astype(bf16)
    mem_bf = memory.astype(bf16)

    def act_spec(shape):
        return pl.BlockSpec(shape, lambda b: (b, 0, 0))

    def const_spec(shape):
        # All weights are 2-D; constant index map -> fetched once, resident.
        return pl.BlockSpec(shape, lambda b: (0, 0))

    flops = int(
        2 * B * S * D * D * 4            # self-attn q/k/v/o projections
        + 2 * B * S * D * D * 2          # cross-attn q/o projections
        + 2 * B * M * D * D * 2          # cross-attn k/v projections
        + 4 * B * S * S * D              # self-attn scores + context
        + 4 * B * S * M * D              # cross-attn scores + context
        + 4 * B * S * D * FF)            # FFN matmuls
    transcendentals = int(B * H * S * (S + M))
    bytes_accessed = int(
        tgt_bf.size * 2 + mem_bf.size * 2                       # bf16 acts in
        + B * S * D * 4                                         # f32 out
        + sum(int(w.size) * w.dtype.itemsize for w in weights)  # weights once
    )

    kernel = functools.partial(decoder_layer_kernel, n_heads)

    return pl.pallas_call(
        kernel,
        out_shape=jax.ShapeDtypeStruct((B, S, D), tgt.dtype),
        grid_spec=pltpu.PrefetchScalarGridSpec(
            num_scalar_prefetch=0,
            grid=(nb,),   # a block of `bb` batch elements per grid step
            in_specs=[act_spec((bb, S, D)), act_spec((bb, M, D))]
                     + [const_spec(w.shape) for w in weights],
            out_specs=pl.BlockSpec((bb, S, D), lambda b: (b, 0, 0)),
        ),
        compiler_params=pltpu.CompilerParams(
            dimension_semantics=("parallel",),        # batch blocks independent
            vmem_limit_bytes=48 * 1024 * 1024,        # safe on 64 MiB v7x too
        ),
        cost_estimate=pl.CostEstimate(
            flops=flops, transcendentals=transcendentals,
            bytes_accessed=bytes_accessed),
    )(tgt_bf, mem_bf, *weights)


# ------------------------- deterministic parameters ------------------------

def init_params(key, d_model, dim_ff):
    ks = jax.random.split(key, 10)

    def xavier(k, fan_in, fan_out, gain=1.0):
        limit = gain * (6.0 / (fan_in + fan_out)) ** 0.5
        return jax.random.uniform(k, (fan_in, fan_out), jnp.float32, -limit, limit)

    relu_gain = 2.0 ** 0.5  # torch.nn.init.calculate_gain('relu')
    return {
        # self-attention projections (no bias)
        "wq_s": xavier(ks[0], d_model, d_model),
        "wk_s": xavier(ks[1], d_model, d_model),
        "wv_s": xavier(ks[2], d_model, d_model),
        "wo_s": xavier(ks[3], d_model, d_model),
        # cross-attention projections (no bias)
        "wq_c": xavier(ks[4], d_model, d_model),
        "wk_c": xavier(ks[5], d_model, d_model),
        "wv_c": xavier(ks[6], d_model, d_model),
        "wo_c": xavier(ks[7], d_model, d_model),
        # feed-forward
        "w1": xavier(ks[8], d_model, dim_ff, gain=relu_gain),
        "b1": jnp.zeros((1, dim_ff), jnp.float32),
        "w2": xavier(ks[9], dim_ff, d_model),
        "b2": jnp.zeros((1, d_model), jnp.float32),
        # layer norms
        "ln1_w": jnp.ones((1, d_model), jnp.float32),
        "ln1_b": jnp.zeros((1, d_model), jnp.float32),
        "ln2_w": jnp.ones((1, d_model), jnp.float32),
        "ln2_b": jnp.zeros((1, d_model), jnp.float32),
        "ln3_w": jnp.ones((1, d_model), jnp.float32),
        "ln3_b": jnp.zeros((1, d_model), jnp.float32),
    }


# --------------------------- pure-JAX reference ----------------------------

def reference(tgt, memory, p, n_heads):
    def ln(x, w, b, eps=1e-5):
        mu = jnp.mean(x, axis=-1, keepdims=True)
        var = jnp.mean(jnp.square(x - mu), axis=-1, keepdims=True)
        return (x - mu) * jax.lax.rsqrt(var + eps) * w + b

    def mha(q_in, kv_in, wq, wk, wv, wo):
        B, S, D = q_in.shape
        Mk = kv_in.shape[1]
        dh = D // n_heads
        q = (q_in @ wq).reshape(B, S, n_heads, dh)
        k = (kv_in @ wk).reshape(B, Mk, n_heads, dh)
        v = (kv_in @ wv).reshape(B, Mk, n_heads, dh)
        s = jnp.einsum("bqhd,bkhd->bhqk", q, k) / (dh ** 0.5)
        a = jax.nn.softmax(s, axis=-1)
        ctx = jnp.einsum("bhqk,bkhd->bqhd", a, v).reshape(B, S, D)
        return ctx @ wo

    x = tgt
    x = ln(x + mha(x, x, p["wq_s"], p["wk_s"], p["wv_s"], p["wo_s"]),
           p["ln1_w"][0], p["ln1_b"][0])
    x = ln(x + mha(x, memory, p["wq_c"], p["wk_c"], p["wv_c"], p["wo_c"]),
           p["ln2_w"][0], p["ln2_b"][0])
    ff = jnp.maximum(x @ p["w1"] + p["b1"][0], 0.0) @ p["w2"] + p["b2"][0]
    x = ln(x + ff, p["ln3_w"][0], p["ln3_b"][0])
    return x


# ----------------------------------- main -----------------------------------

if __name__ == "__main__":
    # batch, tgt-seq, mem-seq, d_model, heads, ffn  (d_model multiple of 128 ->
    # lane-dense activation / output blocks)
    B, S, M, D, H, FF = 4, 16, 32, 128, 4, 256

    key = jax.random.PRNGKey(0)
    k_tgt, k_mem, k_par = jax.random.split(key, 3)
    tgt = jax.random.normal(k_tgt, (B, S, D), jnp.float32)
    memory = jax.random.normal(k_mem, (B, M, D), jnp.float32)
    params = init_params(k_par, D, FF)

    out = transformer_decoder_layer(tgt, memory, params, H)
    out = jax.block_until_ready(out)

    assert out.shape == (B, S, D) and out.dtype == jnp.float32
    ref = reference(tgt, memory, params, H)
    err = float(jnp.max(jnp.abs(out - ref)))
    # Tolerance accounts for bf16 activations at the boundary + bf16 MXU
    # matmuls vs. the pure-f32 reference.
    assert jnp.allclose(out, ref, rtol=5e-2, atol=5e-2), f"max abs diff {err}"

    print("KERNEL_OK")
</pallas_src>

<mosaic_0001>
module attributes {stable_mosaic.version = 11 : i64} {
  func.func @decoder_layer_kernel(%arg0: i32, %arg1: memref<2x16x128xbf16, #tpu.memory_space<vmem>>, %arg2: memref<2x32x128xbf16, #tpu.memory_space<vmem>>, %arg3: memref<128x128xbf16, #tpu.memory_space<vmem>>, %arg4: memref<128x128xbf16, #tpu.memory_space<vmem>>, %arg5: memref<128x128xbf16, #tpu.memory_space<vmem>>, %arg6: memref<128x128xbf16, #tpu.memory_space<vmem>>, %arg7: memref<128x128xbf16, #tpu.memory_space<vmem>>, %arg8: memref<128x128xbf16, #tpu.memory_space<vmem>>, %arg9: memref<128x128xbf16, #tpu.memory_space<vmem>>, %arg10: memref<128x128xbf16, #tpu.memory_space<vmem>>, %arg11: memref<128x256xbf16, #tpu.memory_space<vmem>>, %arg12: memref<1x256xf32, #tpu.memory_space<vmem>>, %arg13: memref<256x128xbf16, #tpu.memory_space<vmem>>, %arg14: memref<1x128xf32, #tpu.memory_space<vmem>>, %arg15: memref<1x128xf32, #tpu.memory_space<vmem>>, %arg16: memref<1x128xf32, #tpu.memory_space<vmem>>, %arg17: memref<1x128xf32, #tpu.memory_space<vmem>>, %arg18: memref<1x128xf32, #tpu.memory_space<vmem>>, %arg19: memref<1x128xf32, #tpu.memory_space<vmem>>, %arg20: memref<1x128xf32, #tpu.memory_space<vmem>>, %arg21: memref<2x16x128xf32, #tpu.memory_space<vmem>>) attributes {dimension_semantics = [#tpu.dimension_semantics<parallel>], iteration_bounds = array<i64: 2>, scalar_prefetch = 0 : i64, scratch_operands = 0 : i64, tpu.core_type = #tpu.core_type<tc>, window_params = [{transform_indices = @transform_0, window_bounds = array<i64: 2, 16, 128>}, {transform_indices = @transform_1, window_bounds = array<i64: 2, 32, 128>}, {pipeline_mode = #tpu.pipeline_mode<synchronous>, transform_indices = @transform_2, window_bounds = array<i64: 128, 128>}, {pipeline_mode = #tpu.pipeline_mode<synchronous>, transform_indices = @transform_3, window_bounds = array<i64: 128, 128>}, {pipeline_mode = #tpu.pipeline_mode<synchronous>, transform_indices = @transform_4, window_bounds = array<i64: 128, 128>}, {pipeline_mode = #tpu.pipeline_mode<synchronous>, transform_indices = @transform_5, window_bounds = array<i64: 128, 128>}, {pipeline_mode = #tpu.pipeline_mode<synchronous>, transform_indices = @transform_6, window_bounds = array<i64: 128, 128>}, {pipeline_mode = #tpu.pipeline_mode<synchronous>, transform_indices = @transform_7, window_bounds = array<i64: 128, 128>}, {pipeline_mode = #tpu.pipeline_mode<synchronous>, transform_indices = @transform_8, window_bounds = array<i64: 128, 128>}, {pipeline_mode = #tpu.pipeline_mode<synchronous>, transform_indices = @transform_9, window_bounds = array<i64: 128, 128>}, {pipeline_mode = #tpu.pipeline_mode<synchronous>, transform_indices = @transform_10, window_bounds = array<i64: 128, 256>}, {pipeline_mode = #tpu.pipeline_mode<synchronous>, transform_indices = @transform_11, window_bounds = array<i64: 1, 256>}, {pipeline_mode = #tpu.pipeline_mode<synchronous>, transform_indices = @transform_12, window_bounds = array<i64: 256, 128>}, {pipeline_mode = #tpu.pipeline_mode<synchronous>, transform_indices = @transform_13, window_bounds = array<i64: 1, 128>}, {pipeline_mode = #tpu.pipeline_mode<synchronous>, transform_indices = @transform_14, window_bounds = array<i64: 1, 128>}, {pipeline_mode = #tpu.pipeline_mode<synchronous>, transform_indices = @transform_15, window_bounds = array<i64: 1, 128>}, {pipeline_mode = #tpu.pipeline_mode<synchronous>, transform_indices = @transform_16, window_bounds = array<i64: 1, 128>}, {pipeline_mode = #tpu.pipeline_mode<synchronous>, transform_indices = @transform_17, window_bounds = array<i64: 1, 128>}, {pipeline_mode = #tpu.pipeline_mode<synchronous>, transform_indices = @transform_18, window_bounds = array<i64: 1, 128>}, {pipeline_mode = #tpu.pipeline_mode<synchronous>, transform_indices = @transform_19, window_bounds = array<i64: 1, 128>}, {transform_indices = @transform_20, window_bounds = array<i64: 2, 16, 128>}]} {
    %c0 = arith.constant 0 : index
    %c0_0 = arith.constant 0 : index
    %c0_1 = arith.constant 0 : index
    %0 = vector.load %arg1[%c0, %c0_0, %c0_1] : memref<2x16x128xbf16, #tpu.memory_space<vmem>>, vector<2x16x128xbf16>
    %1 = vector.shape_cast %0 : vector<2x16x128xbf16> to vector<32x128xbf16>
    %c0_2 = arith.constant 0 : index
    %c0_3 = arith.constant 0 : index
    %c0_4 = arith.constant 0 : index
    %2 = vector.load %arg2[%c0_2, %c0_3, %c0_4] : memref<2x32x128xbf16, #tpu.memory_space<vmem>>, vector<2x32x128xbf16>
    %3 = vector.shape_cast %2 : vector<2x32x128xbf16> to vector<64x128xbf16>
    %c0_5 = arith.constant 0 : index
    %c0_6 = arith.constant 0 : index
    %4 = vector.load %arg3[%c0_5, %c0_6] : memref<128x128xbf16, #tpu.memory_space<vmem>>, vector<128x128xbf16>
    %cst = arith.constant dense<0.000000e+00> : vector<32x128xf32>
    %5 = tpu.matmul %1, %4, %cst {dimension_numbers = #tpu.dot_dimension_numbers<[1], [0], [0], [1], [0, 0, 1, 1], [], []>} : vector<32x128xbf16>, vector<128x128xbf16>, vector<32x128xf32> -> vector<32x128xf32>
    %c0_7 = arith.constant 0 : index
    %c0_8 = arith.constant 0 : index
    %6 = vector.load %arg4[%c0_7, %c0_8] : memref<128x128xbf16, #tpu.memory_space<vmem>>, vector<128x128xbf16>
    %cst_9 = arith.constant dense<0.000000e+00> : vector<32x128xf32>
    %7 = tpu.matmul %1, %6, %cst_9 {dimension_numbers = #tpu.dot_dimension_numbers<[1], [0], [0], [1], [0, 0, 1, 1], [], []>} : vector<32x128xbf16>, vector<128x128xbf16>, vector<32x128xf32> -> vector<32x128xf32>
    %c0_10 = arith.constant 0 : index
    %c0_11 = arith.constant 0 : index
    %8 = vector.load %arg5[%c0_10, %c0_11] : memref<128x128xbf16, #tpu.memory_space<vmem>>, vector<128x128xbf16>
    %cst_12 = arith.constant dense<0.000000e+00> : vector<32x128xf32>
    %9 = tpu.matmul %1, %8, %cst_12 {dimension_numbers = #tpu.dot_dimension_numbers<[1], [0], [0], [1], [0, 0, 1, 1], [], []>} : vector<32x128xbf16>, vector<128x128xbf16>, vector<32x128xf32> -> vector<32x128xf32>
    %10 = arith.truncf %5 : vector<32x128xf32> to vector<32x128xbf16>
    %11 = vector.shape_cast %10 : vector<32x128xbf16> to vector<2x16x128xbf16>
    %12 = arith.truncf %7 : vector<32x128xf32> to vector<32x128xbf16>
    %13 = vector.shape_cast %12 : vector<32x128xbf16> to vector<2x16x128xbf16>
    %14 = arith.truncf %9 : vector<32x128xf32> to vector<32x128xbf16>
    %15 = vector.shape_cast %14 : vector<32x128xbf16> to vector<2x16x128xbf16>
    %16 = vector.extract_strided_slice %11 {offsets = [0, 0, 0], sizes = [2, 16, 32], strides = [1, 1, 1]} : vector<2x16x128xbf16> to vector<2x16x32xbf16>
    %17 = vector.extract_strided_slice %13 {offsets = [0, 0, 0], sizes = [2, 16, 32], strides = [1, 1, 1]} : vector<2x16x128xbf16> to vector<2x16x32xbf16>
    %18 = vector.extract_strided_slice %15 {offsets = [0, 0, 0], sizes = [2, 16, 32], strides = [1, 1, 1]} : vector<2x16x128xbf16> to vector<2x16x32xbf16>
    "tpu.trace_start"() <{level = 10 : i32, message = "bqd,bkd->bqk"}> : () -> ()
    %cst_13 = arith.constant dense<0.000000e+00> : vector<2x16x16xf32>
    %19 = tpu.matmul %16, %17, %cst_13 {dimension_numbers = #tpu.dot_dimension_numbers<[2], [2], [1], [1], [0, 0, 0, 1, 1, 1], [0], [0]>} : vector<2x16x32xbf16>, vector<2x16x32xbf16>, vector<2x16x16xf32> -> vector<2x16x16xf32>
    "tpu.trace_stop"() : () -> ()
    %cst_14 = arith.constant dense<0xFF800000> : vector<2x16xf32>
    %20 = vector.multi_reduction <maximumf>, %19, %cst_14 [2] : vector<2x16x16xf32> to vector<2x16xf32>
    %21 = vector.shape_cast %20 : vector<2x16xf32> to vector<2x16x1xf32>
    %22 = vector.broadcast %21 : vector<2x16x1xf32> to vector<2x16x16xf32>
    %23 = arith.subf %19, %22 : vector<2x16x16xf32>
    %24 = math.exp %23 : vector<2x16x16xf32>
    %cst_15 = arith.constant dense<0.000000e+00> : vector<2x16xf32>
    %25 = vector.multi_reduction <add>, %24, %cst_15 [2] : vector<2x16x16xf32> to vector<2x16xf32>
    %26 = vector.shape_cast %25 : vector<2x16xf32> to vector<2x16x1xf32>
    %27 = tpu.reciprocal %26 {approx = true} : vector<2x16x1xf32> -> vector<2x16x1xf32>
    %28 = vector.broadcast %27 : vector<2x16x1xf32> to vector<2x16x16xf32>
    %29 = arith.mulf %24, %28 : vector<2x16x16xf32>
    %30 = arith.truncf %29 : vector<2x16x16xf32> to vector<2x16x16xbf16>
    "tpu.trace_start"() <{level = 10 : i32, message = "bqk,bkd->bqd"}> : () -> ()
    %cst_16 = arith.constant dense<0.000000e+00> : vector<2x16x32xf32>
    %31 = tpu.matmul %30, %18, %cst_16 {dimension_numbers = #tpu.dot_dimension_numbers<[2], [1], [1], [2], [0, 0, 0, 1, 1, 2], [0], [0]>} : vector<2x16x16xbf16>, vector<2x16x32xbf16>, vector<2x16x32xf32> -> vector<2x16x32xf32>
    "tpu.trace_stop"() : () -> ()
    %32 = arith.truncf %31 : vector<2x16x32xf32> to vector<2x16x32xbf16>
    %33 = vector.extract_strided_slice %11 {offsets = [0, 0, 32], sizes = [2, 16, 32], strides = [1, 1, 1]} : vector<2x16x128xbf16> to vector<2x16x32xbf16>
    %34 = vector.extract_strided_slice %13 {offsets = [0, 0, 32], sizes = [2, 16, 32], strides = [1, 1, 1]} : vector<2x16x128xbf16> to vector<2x16x32xbf16>
    %35 = vector.extract_strided_slice %15 {offsets = [0, 0, 32], sizes = [2, 16, 32], strides = [1, 1, 1]} : vector<2x16x128xbf16> to vector<2x16x32xbf16>
    "tpu.trace_start"() <{level = 10 : i32, message = "bqd,bkd->bqk"}> : () -> ()
    %cst_17 = arith.constant dense<0.000000e+00> : vector<2x16x16xf32>
    %36 = tpu.matmul %33, %34, %cst_17 {dimension_numbers = #tpu.dot_dimension_numbers<[2], [2], [1], [1], [0, 0, 0, 1, 1, 1], [0], [0]>} : vector<2x16x32xbf16>, vector<2x16x32xbf16>, vector<2x16x16xf32> -> vector<2x16x16xf32>
    "tpu.trace_stop"() : () -> ()
    %cst_18 = arith.constant dense<0xFF800000> : vector<2x16xf32>
    %37 = vector.multi_reduction <maximumf>, %36, %cst_18 [2] : vector<2x16x16xf32> to vector<2x16xf32>
    %38 = vector.shape_cast %37 : vector<2x16xf32> to vector<2x16x1xf32>
    %39 = vector.broadcast %38 : vector<2x16x1xf32> to vector<2x16x16xf32>
    %40 = arith.subf %36, %39 : vector<2x16x16xf32>
    %41 = math.exp %40 : vector<2x16x16xf32>
    %cst_19 = arith.constant dense<0.000000e+00> : vector<2x16xf32>
    %42 = vector.multi_reduction <add>, %41, %cst_19 [2] : vector<2x16x16xf32> to vector<2x16xf32>
    %43 = vector.shape_cast %42 : vector<2x16xf32> to vector<2x16x1xf32>
    %44 = tpu.reciprocal %43 {approx = true} : vector<2x16x1xf32> -> vector<2x16x1xf32>
    %45 = vector.broadcast %44 : vector<2x16x1xf32> to vector<2x16x16xf32>
    %46 = arith.mulf %41, %45 : vector<2x16x16xf32>
    %47 = arith.truncf %46 : vector<2x16x16xf32> to vector<2x16x16xbf16>
    "tpu.trace_start"() <{level = 10 : i32, message = "bqk,bkd->bqd"}> : () -> ()
    %cst_20 = arith.constant dense<0.000000e+00> : vector<2x16x32xf32>
    %48 = tpu.matmul %47, %35, %cst_20 {dimension_numbers = #tpu.dot_dimension_numbers<[2], [1], [1], [2], [0, 0, 0, 1, 1, 2], [0], [0]>} : vector<2x16x16xbf16>, vector<2x16x32xbf16>, vector<2x16x32xf32> -> vector<2x16x32xf32>
    "tpu.trace_stop"() : () -> ()
    %49 = arith.truncf %48 : vector<2x16x32xf32> to vector<2x16x32xbf16>
    %50 = vector.extract_strided_slice %11 {offsets = [0, 0, 64], sizes = [2, 16, 32], strides = [1, 1, 1]} : vector<2x16x128xbf16> to vector<2x16x32xbf16>
    %51 = vector.extract_strided_slice %13 {offsets = [0, 0, 64], sizes = [2, 16, 32], strides = [1, 1, 1]} : vector<2x16x128xbf16> to vector<2x16x32xbf16>
    %52 = vector.extract_strided_slice %15 {offsets = [0, 0, 64], sizes = [2, 16, 32], strides = [1, 1, 1]} : vector<2x16x128xbf16> to vector<2x16x32xbf16>
    "tpu.trace_start"() <{level = 10 : i32, message = "bqd,bkd->bqk"}> : () -> ()
    %cst_21 = arith.constant dense<0.000000e+00> : vector<2x16x16xf32>
    %53 = tpu.matmul %50, %51, %cst_21 {dimension_numbers = #tpu.dot_dimension_numbers<[2], [2], [1], [1], [0, 0, 0, 1, 1, 1], [0], [0]>} : vector<2x16x32xbf16>, vector<2x16x32xbf16>, vector<2x16x16xf32> -> vector<2x16x16xf32>
    "tpu.trace_stop"() : () -> ()
    %cst_22 = arith.constant dense<0xFF800000> : vector<2x16xf32>
    %54 = vector.multi_reduction <maximumf>, %53, %cst_22 [2] : vector<2x16x16xf32> to vector<2x16xf32>
    %55 = vector.shape_cast %54 : vector<2x16xf32> to vector<2x16x1xf32>
    %56 = vector.broadcast %55 : vector<2x16x1xf32> to vector<2x16x16xf32>
    %57 = arith.subf %53, %56 : vector<2x16x16xf32>
    %58 = math.exp %57 : vector<2x16x16xf32>
    %cst_23 = arith.constant dense<0.000000e+00> : vector<2x16xf32>
    %59 = vector.multi_reduction <add>, %58, %cst_23 [2] : vector<2x16x16xf32> to vector<2x16xf32>
    %60 = vector.shape_cast %59 : vector<2x16xf32> to vector<2x16x1xf32>
    %61 = tpu.reciprocal %60 {approx = true} : vector<2x16x1xf32> -> vector<2x16x1xf32>
    %62 = vector.broadcast %61 : vector<2x16x1xf32> to vector<2x16x16xf32>
    %63 = arith.mulf %58, %62 : vector<2x16x16xf32>
    %64 = arith.truncf %63 : vector<2x16x16xf32> to vector<2x16x16xbf16>
    "tpu.trace_start"() <{level = 10 : i32, message = "bqk,bkd->bqd"}> : () -> ()
    %cst_24 = arith.constant dense<0.000000e+00> : vector<2x16x32xf32>
    %65 = tpu.matmul %64, %52, %cst_24 {dimension_numbers = #tpu.dot_dimension_numbers<[2], [1], [1], [2], [0, 0, 0, 1, 1, 2], [0], [0]>} : vector<2x16x16xbf16>, vector<2x16x32xbf16>, vector<2x16x32xf32> -> vector<2x16x32xf32>
    "tpu.trace_stop"() : () -> ()
    %66 = arith.truncf %65 : vector<2x16x32xf32> to vector<2x16x32xbf16>
    %67 = vector.extract_strided_slice %11 {offsets = [0, 0, 96], sizes = [2, 16, 32], strides = [1, 1, 1]} : vector<2x16x128xbf16> to vector<2x16x32xbf16>
    %68 = vector.extract_strided_slice %13 {offsets = [0, 0, 96], sizes = [2, 16, 32], strides = [1, 1, 1]} : vector<2x16x128xbf16> to vector<2x16x32xbf16>
    %69 = vector.extract_strided_slice %15 {offsets = [0, 0, 96], sizes = [2, 16, 32], strides = [1, 1, 1]} : vector<2x16x128xbf16> to vector<2x16x32xbf16>
    "tpu.trace_start"() <{level = 10 : i32, message = "bqd,bkd->bqk"}> : () -> ()
    %cst_25 = arith.constant dense<0.000000e+00> : vector<2x16x16xf32>
    %70 = tpu.matmul %67, %68, %cst_25 {dimension_numbers = #tpu.dot_dimension_numbers<[2], [2], [1], [1], [0, 0, 0, 1, 1, 1], [0], [0]>} : vector<2x16x32xbf16>, vector<2x16x32xbf16>, vector<2x16x16xf32> -> vector<2x16x16xf32>
    "tpu.trace_stop"() : () -> ()
    %cst_26 = arith.constant dense<0xFF800000> : vector<2x16xf32>
    %71 = vector.multi_reduction <maximumf>, %70, %cst_26 [2] : vector<2x16x16xf32> to vector<2x16xf32>
    %72 = vector.shape_cast %71 : vector<2x16xf32> to vector<2x16x1xf32>
    %73 = vector.broadcast %72 : vector<2x16x1xf32> to vector<2x16x16xf32>
    %74 = arith.subf %70, %73 : vector<2x16x16xf32>
    %75 = math.exp %74 : vector<2x16x16xf32>
    %cst_27 = arith.constant dense<0.000000e+00> : vector<2x16xf32>
    %76 = vector.multi_reduction <add>, %75, %cst_27 [2] : vector<2x16x16xf32> to vector<2x16xf32>
    %77 = vector.shape_cast %76 : vector<2x16xf32> to vector<2x16x1xf32>
    %78 = tpu.reciprocal %77 {approx = true} : vector<2x16x1xf32> -> vector<2x16x1xf32>
    %79 = vector.broadcast %78 : vector<2x16x1xf32> to vector<2x16x16xf32>
    %80 = arith.mulf %75, %79 : vector<2x16x16xf32>
    %81 = arith.truncf %80 : vector<2x16x16xf32> to vector<2x16x16xbf16>
    "tpu.trace_start"() <{level = 10 : i32, message = "bqk,bkd->bqd"}> : () -> ()
    %cst_28 = arith.constant dense<0.000000e+00> : vector<2x16x32xf32>
    %82 = tpu.matmul %81, %69, %cst_28 {dimension_numbers = #tpu.dot_dimension_numbers<[2], [1], [1], [2], [0, 0, 0, 1, 1, 2], [0], [0]>} : vector<2x16x16xbf16>, vector<2x16x32xbf16>, vector<2x16x32xf32> -> vector<2x16x32xf32>
    "tpu.trace_stop"() : () -> ()
    %83 = arith.truncf %82 : vector<2x16x32xf32> to vector<2x16x32xbf16>
    %84 = tpu.concatenate %32, %49, %66, %83 in 2 : vector<2x16x32xbf16>, vector<2x16x32xbf16>, vector<2x16x32xbf16>, vector<2x16x32xbf16> -> vector<2x16x128xbf16>
    %85 = vector.shape_cast %84 : vector<2x16x128xbf16> to vector<32x128xbf16>
    %c0_29 = arith.constant 0 : index
    %c0_30 = arith.constant 0 : index
    %86 = vector.load %arg6[%c0_29, %c0_30] : memref<128x128xbf16, #tpu.memory_space<vmem>>, vector<128x128xbf16>
    %cst_31 = arith.constant dense<0.000000e+00> : vector<32x128xf32>
    %87 = tpu.matmul %85, %86, %cst_31 {dimension_numbers = #tpu.dot_dimension_numbers<[1], [0], [0], [1], [0, 0, 1, 1], [], []>} : vector<32x128xbf16>, vector<128x128xbf16>, vector<32x128xf32> -> vector<32x128xf32>
    %88 = arith.extf %1 : vector<32x128xbf16> to vector<32x128xf32>
    %89 = arith.addf %88, %87 : vector<32x128xf32>
    %c0_32 = arith.constant 0 : index
    %c0_33 = arith.constant 0 : index
    %90 = vector.load %arg15[%c0_32, %c0_33] : memref<1x128xf32, #tpu.memory_space<vmem>>, vector<1x128xf32>
    %c0_34 = arith.constant 0 : index
    %c0_35 = arith.constant 0 : index
    %91 = vector.load %arg16[%c0_34, %c0_35] : memref<1x128xf32, #tpu.memory_space<vmem>>, vector<1x128xf32>
    %cst_36 = arith.constant dense<0.000000e+00> : vector<32xf32>
    %92 = vector.multi_reduction <add>, %89, %cst_36 [1] : vector<32x128xf32> to vector<32xf32>
    %93 = vector.shape_cast %92 : vector<32xf32> to vector<32x1xf32>
    %cst_37 = arith.constant 1.280000e+02 : f32
    %94 = vector.broadcast %cst_37 : f32 to vector<32x1xf32>
    %95 = arith.divf %93, %94 : vector<32x1xf32>
    %96 = vector.broadcast %95 : vector<32x1xf32> to vector<32x128xf32>
    %97 = arith.subf %89, %96 : vector<32x128xf32>
    %98 = arith.mulf %97, %97 : vector<32x128xf32>
    %cst_38 = arith.constant dense<0.000000e+00> : vector<32xf32>
    %99 = vector.multi_reduction <add>, %98, %cst_38 [1] : vector<32x128xf32> to vector<32xf32>
    %100 = vector.shape_cast %99 : vector<32xf32> to vector<32x1xf32>
    %cst_39 = arith.constant 1.280000e+02 : f32
    %101 = vector.broadcast %cst_39 : f32 to vector<32x1xf32>
    %102 = arith.divf %100, %101 : vector<32x1xf32>
    %103 = vector.broadcast %95 : vector<32x1xf32> to vector<32x128xf32>
    %104 = arith.subf %89, %103 : vector<32x128xf32>
    %cst_40 = arith.constant 9.99999974E-6 : f32
    %105 = vector.broadcast %cst_40 : f32 to vector<32x1xf32>
    %106 = arith.addf %102, %105 : vector<32x1xf32>
    %107 = math.rsqrt %106 : vector<32x1xf32>
    %108 = vector.broadcast %107 : vector<32x1xf32> to vector<32x128xf32>
    %109 = arith.mulf %104, %108 : vector<32x128xf32>
    %110 = vector.broadcast %90 : vector<1x128xf32> to vector<32x128xf32>
    %111 = arith.mulf %109, %110 : vector<32x128xf32>
    %112 = vector.broadcast %91 : vector<1x128xf32> to vector<32x128xf32>
    %113 = arith.addf %111, %112 : vector<32x128xf32>
    %114 = arith.truncf %113 : vector<32x128xf32> to vector<32x128xbf16>
    %c0_41 = arith.constant 0 : index
    %c0_42 = arith.constant 0 : index
    %115 = vector.load %arg7[%c0_41, %c0_42] : memref<128x128xbf16, #tpu.memory_space<vmem>>, vector<128x128xbf16>
    %cst_43 = arith.constant dense<0.000000e+00> : vector<32x128xf32>
    %116 = tpu.matmul %114, %115, %cst_43 {dimension_numbers = #tpu.dot_dimension_numbers<[1], [0], [0], [1], [0, 0, 1, 1], [], []>} : vector<32x128xbf16>, vector<128x128xbf16>, vector<32x128xf32> -> vector<32x128xf32>
    %c0_44 = arith.constant 0 : index
    %c0_45 = arith.constant 0 : index
    %117 = vector.load %arg8[%c0_44, %c0_45] : memref<128x128xbf16, #tpu.memory_space<vmem>>, vector<128x128xbf16>
    %cst_46 = arith.constant dense<0.000000e+00> : vector<64x128xf32>
    %118 = tpu.matmul %3, %117, %cst_46 {dimension_numbers = #tpu.dot_dimension_numbers<[1], [0], [0], [1], [0, 0, 1, 1], [], []>} : vector<64x128xbf16>, vector<128x128xbf16>, vector<64x128xf32> -> vector<64x128xf32>
    %c0_47 = arith.constant 0 : index
    %c0_48 = arith.constant 0 : index
    %119 = vector.load %arg9[%c0_47, %c0_48] : memref<128x128xbf16, #tpu.memory_space<vmem>>, vector<128x128xbf16>
    %cst_49 = arith.constant dense<0.000000e+00> : vector<64x128xf32>
    %120 = tpu.matmul %3, %119, %cst_49 {dimension_numbers = #tpu.dot_dimension_numbers<[1], [0], [0], [1], [0, 0, 1, 1], [], []>} : vector<64x128xbf16>, vector<128x128xbf16>, vector<64x128xf32> -> vector<64x128xf32>
    %121 = arith.truncf %116 : vector<32x128xf32> to vector<32x128xbf16>
    %122 = vector.shape_cast %121 : vector<32x128xbf16> to vector<2x16x128xbf16>
    %123 = arith.truncf %118 : vector<64x128xf32> to vector<64x128xbf16>
    %124 = vector.shape_cast %123 : vector<64x128xbf16> to vector<2x32x128xbf16>
    %125 = arith.truncf %120 : vector<64x128xf32> to vector<64x128xbf16>
    %126 = vector.shape_cast %125 : vector<64x128xbf16> to vector<2x32x128xbf16>
    %127 = vector.extract_strided_slice %122 {offsets = [0, 0, 0], sizes = [2, 16, 32], strides = [1, 1, 1]} : vector<2x16x128xbf16> to vector<2x16x32xbf16>
    %128 = vector.extract_strided_slice %124 {offsets = [0, 0, 0], sizes = [2, 32, 32], strides = [1, 1, 1]} : vector<2x32x128xbf16> to vector<2x32x32xbf16>
    %129 = vector.extract_strided_slice %126 {offsets = [0, 0, 0], sizes = [2, 32, 32], strides = [1, 1, 1]} : vector<2x32x128xbf16> to vector<2x32x32xbf16>
    "tpu.trace_start"() <{level = 10 : i32, message = "bqd,bkd->bqk"}> : () -> ()
    %cst_50 = arith.constant dense<0.000000e+00> : vector<2x16x32xf32>
    %130 = tpu.matmul %127, %128, %cst_50 {dimension_numbers = #tpu.dot_dimension_numbers<[2], [2], [1], [1], [0, 0, 0, 1, 1, 1], [0], [0]>} : vector<2x16x32xbf16>, vector<2x32x32xbf16>, vector<2x16x32xf32> -> vector<2x16x32xf32>
    "tpu.trace_stop"() : () -> ()
    %cst_51 = arith.constant dense<0xFF800000> : vector<2x16xf32>
    %131 = vector.multi_reduction <maximumf>, %130, %cst_51 [2] : vector<2x16x32xf32> to vector<2x16xf32>
    %132 = vector.shape_cast %131 : vector<2x16xf32> to vector<2x16x1xf32>
    %133 = vector.broadcast %132 : vector<2x16x1xf32> to vector<2x16x32xf32>
    %134 = arith.subf %130, %133 : vector<2x16x32xf32>
    %135 = math.exp %134 : vector<2x16x32xf32>
    %cst_52 = arith.constant dense<0.000000e+00> : vector<2x16xf32>
    %136 = vector.multi_reduction <add>, %135, %cst_52 [2] : vector<2x16x32xf32> to vector<2x16xf32>
    %137 = vector.shape_cast %136 : vector<2x16xf32> to vector<2x16x1xf32>
    %138 = tpu.reciprocal %137 {approx = true} : vector<2x16x1xf32> -> vector<2x16x1xf32>
    %139 = vector.broadcast %138 : vector<2x16x1xf32> to vector<2x16x32xf32>
    %140 = arith.mulf %135, %139 : vector<2x16x32xf32>
    %141 = arith.truncf %140 : vector<2x16x32xf32> to vector<2x16x32xbf16>
    "tpu.trace_start"() <{level = 10 : i32, message = "bqk,bkd->bqd"}> : () -> ()
    %cst_53 = arith.constant dense<0.000000e+00> : vector<2x16x32xf32>
    %142 = tpu.matmul %141, %129, %cst_53 {dimension_numbers = #tpu.dot_dimension_numbers<[2], [1], [1], [2], [0, 0, 0, 1, 1, 2], [0], [0]>} : vector<2x16x32xbf16>, vector<2x32x32xbf16>, vector<2x16x32xf32> -> vector<2x16x32xf32>
    "tpu.trace_stop"() : () -> ()
    %143 = arith.truncf %142 : vector<2x16x32xf32> to vector<2x16x32xbf16>
    %144 = vector.extract_strided_slice %122 {offsets = [0, 0, 32], sizes = [2, 16, 32], strides = [1, 1, 1]} : vector<2x16x128xbf16> to vector<2x16x32xbf16>
    %145 = vector.extract_strided_slice %124 {offsets = [0, 0, 32], sizes = [2, 32, 32], strides = [1, 1, 1]} : vector<2x32x128xbf16> to vector<2x32x32xbf16>
    %146 = vector.extract_strided_slice %126 {offsets = [0, 0, 32], sizes = [2, 32, 32], strides = [1, 1, 1]} : vector<2x32x128xbf16> to vector<2x32x32xbf16>
    "tpu.trace_start"() <{level = 10 : i32, message = "bqd,bkd->bqk"}> : () -> ()
    %cst_54 = arith.constant dense<0.000000e+00> : vector<2x16x32xf32>
    %147 = tpu.matmul %144, %145, %cst_54 {dimension_numbers = #tpu.dot_dimension_numbers<[2], [2], [1], [1], [0, 0, 0, 1, 1, 1], [0], [0]>} : vector<2x16x32xbf16>, vector<2x32x32xbf16>, vector<2x16x32xf32> -> vector<2x16x32xf32>
    "tpu.trace_stop"() : () -> ()
    %cst_55 = arith.constant dense<0xFF800000> : vector<2x16xf32>
    %148 = vector.multi_reduction <maximumf>, %147, %cst_55 [2] : vector<2x16x32xf32> to vector<2x16xf32>
    %149 = vector.shape_cast %148 : vector<2x16xf32> to vector<2x16x1xf32>
    %150 = vector.broadcast %149 : vector<2x16x1xf32> to vector<2x16x32xf32>
    %151 = arith.subf %147, %150 : vector<2x16x32xf32>
    %152 = math.exp %151 : vector<2x16x32xf32>
    %cst_56 = arith.constant dense<0.000000e+00> : vector<2x16xf32>
    %153 = vector.multi_reduction <add>, %152, %cst_56 [2] : vector<2x16x32xf32> to vector<2x16xf32>
    %154 = vector.shape_cast %153 : vector<2x16xf32> to vector<2x16x1xf32>
    %155 = tpu.reciprocal %154 {approx = true} : vector<2x16x1xf32> -> vector<2x16x1xf32>
    %156 = vector.broadcast %155 : vector<2x16x1xf32> to vector<2x16x32xf32>
    %157 = arith.mulf %152, %156 : vector<2x16x32xf32>
    %158 = arith.truncf %157 : vector<2x16x32xf32> to vector<2x16x32xbf16>
    "tpu.trace_start"() <{level = 10 : i32, message = "bqk,bkd->bqd"}> : () -> ()
    %cst_57 = arith.constant dense<0.000000e+00> : vector<2x16x32xf32>
    %159 = tpu.matmul %158, %146, %cst_57 {dimension_numbers = #tpu.dot_dimension_numbers<[2], [1], [1], [2], [0, 0, 0, 1, 1, 2], [0], [0]>} : vector<2x16x32xbf16>, vector<2x32x32xbf16>, vector<2x16x32xf32> -> vector<2x16x32xf32>
    "tpu.trace_stop"() : () -> ()
    %160 = arith.truncf %159 : vector<2x16x32xf32> to vector<2x16x32xbf16>
    %161 = vector.extract_strided_slice %122 {offsets = [0, 0, 64], sizes = [2, 16, 32], strides = [1, 1, 1]} : vector<2x16x128xbf16> to vector<2x16x32xbf16>
    %162 = vector.extract_strided_slice %124 {offsets = [0, 0, 64], sizes = [2, 32, 32], strides = [1, 1, 1]} : vector<2x32x128xbf16> to vector<2x32x32xbf16>
    %163 = vector.extract_strided_slice %126 {offsets = [0, 0, 64], sizes = [2, 32, 32], strides = [1, 1, 1]} : vector<2x32x128xbf16> to vector<2x32x32xbf16>
    "tpu.trace_start"() <{level = 10 : i32, message = "bqd,bkd->bqk"}> : () -> ()
    %cst_58 = arith.constant dense<0.000000e+00> : vector<2x16x32xf32>
    %164 = tpu.matmul %161, %162, %cst_58 {dimension_numbers = #tpu.dot_dimension_numbers<[2], [2], [1], [1], [0, 0, 0, 1, 1, 1], [0], [0]>} : vector<2x16x32xbf16>, vector<2x32x32xbf16>, vector<2x16x32xf32> -> vector<2x16x32xf32>
    "tpu.trace_stop"() : () -> ()
    %cst_59 = arith.constant dense<0xFF800000> : vector<2x16xf32>
    %165 = vector.multi_reduction <maximumf>, %164, %cst_59 [2] : vector<2x16x32xf32> to vector<2x16xf32>
    %166 = vector.shape_cast %165 : vector<2x16xf32> to vector<2x16x1xf32>
    %167 = vector.broadcast %166 : vector<2x16x1xf32> to vector<2x16x32xf32>
    %168 = arith.subf %164, %167 : vector<2x16x32xf32>
    %169 = math.exp %168 : vector<2x16x32xf32>
    %cst_60 = arith.constant dense<0.000000e+00> : vector<2x16xf32>
    %170 = vector.multi_reduction <add>, %169, %cst_60 [2] : vector<2x16x32xf32> to vector<2x16xf32>
    %171 = vector.shape_cast %170 : vector<2x16xf32> to vector<2x16x1xf32>
    %172 = tpu.reciprocal %171 {approx = true} : vector<2x16x1xf32> -> vector<2x16x1xf32>
    %173 = vector.broadcast %172 : vector<2x16x1xf32> to vector<2x16x32xf32>
    %174 = arith.mulf %169, %173 : vector<2x16x32xf32>
    %175 = arith.truncf %174 : vector<2x16x32xf32> to vector<2x16x32xbf16>
    "tpu.trace_start"() <{level = 10 : i32, message = "bqk,bkd->bqd"}> : () -> ()
    %cst_61 = arith.constant dense<0.000000e+00> : vector<2x16x32xf32>
    %176 = tpu.matmul %175, %163, %cst_61 {dimension_numbers = #tpu.dot_dimension_numbers<[2], [1], [1], [2], [0, 0, 0, 1, 1, 2], [0], [0]>} : vector<2x16x32xbf16>, vector<2x32x32xbf16>, vector<2x16x32xf32> -> vector<2x16x32xf32>
    "tpu.trace_stop"() : () -> ()
    %177 = arith.truncf %176 : vector<2x16x32xf32> to vector<2x16x32xbf16>
    %178 = vector.extract_strided_slice %122 {offsets = [0, 0, 96], sizes = [2, 16, 32], strides = [1, 1, 1]} : vector<2x16x128xbf16> to vector<2x16x32xbf16>
    %179 = vector.extract_strided_slice %124 {offsets = [0, 0, 96], sizes = [2, 32, 32], strides = [1, 1, 1]} : vector<2x32x128xbf16> to vector<2x32x32xbf16>
    %180 = vector.extract_strided_slice %126 {offsets = [0, 0, 96], sizes = [2, 32, 32], strides = [1, 1, 1]} : vector<2x32x128xbf16> to vector<2x32x32xbf16>
    "tpu.trace_start"() <{level = 10 : i32, message = "bqd,bkd->bqk"}> : () -> ()
    %cst_62 = arith.constant dense<0.000000e+00> : vector<2x16x32xf32>
    %181 = tpu.matmul %178, %179, %cst_62 {dimension_numbers = #tpu.dot_dimension_numbers<[2], [2], [1], [1], [0, 0, 0, 1, 1, 1], [0], [0]>} : vector<2x16x32xbf16>, vector<2x32x32xbf16>, vector<2x16x32xf32> -> vector<2x16x32xf32>
    "tpu.trace_stop"() : () -> ()
    %cst_63 = arith.constant dense<0xFF800000> : vector<2x16xf32>
    %182 = vector.multi_reduction <maximumf>, %181, %cst_63 [2] : vector<2x16x32xf32> to vector<2x16xf32>
    %183 = vector.shape_cast %182 : vector<2x16xf32> to vector<2x16x1xf32>
    %184 = vector.broadcast %183 : vector<2x16x1xf32> to vector<2x16x32xf32>
    %185 = arith.subf %181, %184 : vector<2x16x32xf32>
    %186 = math.exp %185 : vector<2x16x32xf32>
    %cst_64 = arith.constant dense<0.000000e+00> : vector<2x16xf32>
    %187 = vector.multi_reduction <add>, %186, %cst_64 [2] : vector<2x16x32xf32> to vector<2x16xf32>
    %188 = vector.shape_cast %187 : vector<2x16xf32> to vector<2x16x1xf32>
    %189 = tpu.reciprocal %188 {approx = true} : vector<2x16x1xf32> -> vector<2x16x1xf32>
    %190 = vector.broadcast %189 : vector<2x16x1xf32> to vector<2x16x32xf32>
    %191 = arith.mulf %186, %190 : vector<2x16x32xf32>
    %192 = arith.truncf %191 : vector<2x16x32xf32> to vector<2x16x32xbf16>
    "tpu.trace_start"() <{level = 10 : i32, message = "bqk,bkd->bqd"}> : () -> ()
    %cst_65 = arith.constant dense<0.000000e+00> : vector<2x16x32xf32>
    %193 = tpu.matmul %192, %180, %cst_65 {dimension_numbers = #tpu.dot_dimension_numbers<[2], [1], [1], [2], [0, 0, 0, 1, 1, 2], [0], [0]>} : vector<2x16x32xbf16>, vector<2x32x32xbf16>, vector<2x16x32xf32> -> vector<2x16x32xf32>
    "tpu.trace_stop"() : () -> ()
    %194 = arith.truncf %193 : vector<2x16x32xf32> to vector<2x16x32xbf16>
    %195 = tpu.concatenate %143, %160, %177, %194 in 2 : vector<2x16x32xbf16>, vector<2x16x32xbf16>, vector<2x16x32xbf16>, vector<2x16x32xbf16> -> vector<2x16x128xbf16>
    %196 = vector.shape_cast %195 : vector<2x16x128xbf16> to vector<32x128xbf16>
    %c0_66 = arith.constant 0 : index
    %c0_67 = arith.constant 0 : index
    %197 = vector.load %arg10[%c0_66, %c0_67] : memref<128x128xbf16, #tpu.memory_space<vmem>>, vector<128x128xbf16>
    %cst_68 = arith.constant dense<0.000000e+00> : vector<32x128xf32>
    %198 = tpu.matmul %196, %197, %cst_68 {dimension_numbers = #tpu.dot_dimension_numbers<[1], [0], [0], [1], [0, 0, 1, 1], [], []>} : vector<32x128xbf16>, vector<128x128xbf16>, vector<32x128xf32> -> vector<32x128xf32>
    %199 = arith.addf %113, %198 : vector<32x128xf32>
    %c0_69 = arith.constant 0 : index
    %c0_70 = arith.constant 0 : index
    %200 = vector.load %arg17[%c0_69, %c0_70] : memref<1x128xf32, #tpu.memory_space<vmem>>, vector<1x128xf32>
    %c0_71 = arith.constant 0 : index
    %c0_72 = arith.constant 0 : index
    %201 = vector.load %arg18[%c0_71, %c0_72] : memref<1x128xf32, #tpu.memory_space<vmem>>, vector<1x128xf32>
    %cst_73 = arith.constant dense<0.000000e+00> : vector<32xf32>
    %202 = vector.multi_reduction <add>, %199, %cst_73 [1] : vector<32x128xf32> to vector<32xf32>
    %203 = vector.shape_cast %202 : vector<32xf32> to vector<32x1xf32>
    %cst_74 = arith.constant 1.280000e+02 : f32
    %204 = vector.broadcast %cst_74 : f32 to vector<32x1xf32>
    %205 = arith.divf %203, %204 : vector<32x1xf32>
    %206 = vector.broadcast %205 : vector<32x1xf32> to vector<32x128xf32>
    %207 = arith.subf %199, %206 : vector<32x128xf32>
    %208 = arith.mulf %207, %207 : vector<32x128xf32>
    %cst_75 = arith.constant dense<0.000000e+00> : vector<32xf32>
    %209 = vector.multi_reduction <add>, %208, %cst_75 [1] : vector<32x128xf32> to vector<32xf32>
    %210 = vector.shape_cast %209 : vector<32xf32> to vector<32x1xf32>
    %cst_76 = arith.constant 1.280000e+02 : f32
    %211 = vector.broadcast %cst_76 : f32 to vector<32x1xf32>
    %212 = arith.divf %210, %211 : vector<32x1xf32>
    %213 = vector.broadcast %205 : vector<32x1xf32> to vector<32x128xf32>
    %214 = arith.subf %199, %213 : vector<32x128xf32>
    %cst_77 = arith.constant 9.99999974E-6 : f32
    %215 = vector.broadcast %cst_77 : f32 to vector<32x1xf32>
    %216 = arith.addf %212, %215 : vector<32x1xf32>
    %217 = math.rsqrt %216 : vector<32x1xf32>
    %218 = vector.broadcast %217 : vector<32x1xf32> to vector<32x128xf32>
    %219 = arith.mulf %214, %218 : vector<32x128xf32>
    %220 = vector.broadcast %200 : vector<1x128xf32> to vector<32x128xf32>
    %221 = arith.mulf %219, %220 : vector<32x128xf32>
    %222 = vector.broadcast %201 : vector<1x128xf32> to vector<32x128xf32>
    %223 = arith.addf %221, %222 : vector<32x128xf32>
    %224 = arith.truncf %223 : vector<32x128xf32> to vector<32x128xbf16>
    %c0_78 = arith.constant 0 : index
    %c0_79 = arith.constant 0 : index
    %225 = vector.load %arg11[%c0_78, %c0_79] : memref<128x256xbf16, #tpu.memory_space<vmem>>, vector<128x256xbf16>
    %cst_80 = arith.constant dense<0.000000e+00> : vector<32x256xf32>
    %226 = tpu.matmul %224, %225, %cst_80 {dimension_numbers = #tpu.dot_dimension_numbers<[1], [0], [0], [1], [0, 0, 1, 1], [], []>} : vector<32x128xbf16>, vector<128x256xbf16>, vector<32x256xf32> -> vector<32x256xf32>
    %c0_81 = arith.constant 0 : index
    %c0_82 = arith.constant 0 : index
    %227 = vector.load %arg12[%c0_81, %c0_82] : memref<1x256xf32, #tpu.memory_space<vmem>>, vector<1x256xf32>
    %228 = vector.broadcast %227 : vector<1x256xf32> to vector<32x256xf32>
    %229 = arith.addf %226, %228 : vector<32x256xf32>
    %cst_83 = arith.constant 0.000000e+00 : f32
    %230 = vector.broadcast %cst_83 : f32 to vector<32x256xf32>
    %231 = arith.maximumf %229, %230 : vector<32x256xf32>
    %232 = arith.truncf %231 : vector<32x256xf32> to vector<32x256xbf16>
    %c0_84 = arith.constant 0 : index
    %c0_85 = arith.constant 0 : index
    %233 = vector.load %arg13[%c0_84, %c0_85] : memref<256x128xbf16, #tpu.memory_space<vmem>>, vector<256x128xbf16>
    %cst_86 = arith.constant dense<0.000000e+00> : vector<32x128xf32>
    %234 = tpu.matmul %232, %233, %cst_86 {dimension_numbers = #tpu.dot_dimension_numbers<[1], [0], [0], [1], [0, 0, 1, 1], [], []>} : vector<32x256xbf16>, vector<256x128xbf16>, vector<32x128xf32> -> vector<32x128xf32>
    %c0_87 = arith.constant 0 : index
    %c0_88 = arith.constant 0 : index
    %235 = vector.load %arg14[%c0_87, %c0_88] : memref<1x128xf32, #tpu.memory_space<vmem>>, vector<1x128xf32>
    %236 = vector.broadcast %235 : vector<1x128xf32> to vector<32x128xf32>
    %237 = arith.addf %234, %236 : vector<32x128xf32>
    %238 = arith.addf %223, %237 : vector<32x128xf32>
    %c0_89 = arith.constant 0 : index
    %c0_90 = arith.constant 0 : index
    %239 = vector.load %arg19[%c0_89, %c0_90] : memref<1x128xf32, #tpu.memory_space<vmem>>, vector<1x128xf32>
    %c0_91 = arith.constant 0 : index
    %c0_92 = arith.constant 0 : index
    %240 = vector.load %arg20[%c0_91, %c0_92] : memref<1x128xf32, #tpu.memory_space<vmem>>, vector<1x128xf32>
    %cst_93 = arith.constant dense<0.000000e+00> : vector<32xf32>
    %241 = vector.multi_reduction <add>, %238, %cst_93 [1] : vector<32x128xf32> to vector<32xf32>
    %242 = vector.shape_cast %241 : vector<32xf32> to vector<32x1xf32>
    %cst_94 = arith.constant 1.280000e+02 : f32
    %243 = vector.broadcast %cst_94 : f32 to vector<32x1xf32>
    %244 = arith.divf %242, %243 : vector<32x1xf32>
    %245 = vector.broadcast %244 : vector<32x1xf32> to vector<32x128xf32>
    %246 = arith.subf %238, %245 : vector<32x128xf32>
    %247 = arith.mulf %246, %246 : vector<32x128xf32>
    %cst_95 = arith.constant dense<0.000000e+00> : vector<32xf32>
    %248 = vector.multi_reduction <add>, %247, %cst_95 [1] : vector<32x128xf32> to vector<32xf32>
    %249 = vector.shape_cast %248 : vector<32xf32> to vector<32x1xf32>
    %cst_96 = arith.constant 1.280000e+02 : f32
    %250 = vector.broadcast %cst_96 : f32 to vector<32x1xf32>
    %251 = arith.divf %249, %250 : vector<32x1xf32>
    %252 = vector.broadcast %244 : vector<32x1xf32> to vector<32x128xf32>
    %253 = arith.subf %238, %252 : vector<32x128xf32>
    %cst_97 = arith.constant 9.99999974E-6 : f32
    %254 = vector.broadcast %cst_97 : f32 to vector<32x1xf32>
    %255 = arith.addf %251, %254 : vector<32x1xf32>
    %256 = math.rsqrt %255 : vector<32x1xf32>
    %257 = vector.broadcast %256 : vector<32x1xf32> to vector<32x128xf32>
    %258 = arith.mulf %253, %257 : vector<32x128xf32>
    %259 = vector.broadcast %239 : vector<1x128xf32> to vector<32x128xf32>
    %260 = arith.mulf %258, %259 : vector<32x128xf32>
    %261 = vector.broadcast %240 : vector<1x128xf32> to vector<32x128xf32>
    %262 = arith.addf %260, %261 : vector<32x128xf32>
    %263 = vector.shape_cast %262 : vector<32x128xf32> to vector<2x16x128xf32>
    %c0_98 = arith.constant 0 : index
    %c0_99 = arith.constant 0 : index
    %c0_100 = arith.constant 0 : index
    %264 = vector.load %arg21[%c0_98, %c0_99, %c0_100] : memref<2x16x128xf32, #tpu.memory_space<vmem>>, vector<2x16x128xf32>
    tpu.vector_store %arg21[%c0_98, %c0_99, %c0_100], %263 {strides = array<i32>} : memref<2x16x128xf32, #tpu.memory_space<vmem>>, vector<2x16x128xf32>,
    return
  }
  func.func @transform_0(%arg0: i32) -> (i32, i32, i32) {
    %c0_i32 = arith.constant 0 : i32
    %c0_i32_0 = arith.constant 0 : i32
    %c0_i32_1 = arith.constant 0 : i32
    return %arg0, %c0_i32, %c0_i32_0 : i32, i32, i32
  }
  func.func @transform_1(%arg0: i32) -> (i32, i32, i32) {
    %c0_i32 = arith.constant 0 : i32
    %c0_i32_0 = arith.constant 0 : i32
    %c0_i32_1 = arith.constant 0 : i32
    return %arg0, %c0_i32, %c0_i32_0 : i32, i32, i32
  }
  func.func @transform_2(%arg0: i32) -> (i32, i32) {
    %c0_i32 = arith.constant 0 : i32
    %c0_i32_0 = arith.constant 0 : i32
    %c0_i32_1 = arith.constant 0 : i32
    return %c0_i32, %c0_i32_0 : i32, i32
  }
  func.func @transform_3(%arg0: i32) -> (i32, i32) {
    %c0_i32 = arith.constant 0 : i32
    %c0_i32_0 = arith.constant 0 : i32
    %c0_i32_1 = arith.constant 0 : i32
    return %c0_i32, %c0_i32_0 : i32, i32
  }
  func.func @transform_4(%arg0: i32) -> (i32, i32) {
    %c0_i32 = arith.constant 0 : i32
    %c0_i32_0 = arith.constant 0 : i32
    %c0_i32_1 = arith.constant 0 : i32
    return %c0_i32, %c0_i32_0 : i32, i32
  }
  func.func @transform_5(%arg0: i32) -> (i32, i32) {
    %c0_i32 = arith.constant 0 : i32
    %c0_i32_0 = arith.constant 0 : i32
    %c0_i32_1 = arith.constant 0 : i32
    return %c0_i32, %c0_i32_0 : i32, i32
  }
  func.func @transform_6(%arg0: i32) -> (i32, i32) {
    %c0_i32 = arith.constant 0 : i32
    %c0_i32_0 = arith.constant 0 : i32
    %c0_i32_1 = arith.constant 0 : i32
    return %c0_i32, %c0_i32_0 : i32, i32
  }
  func.func @transform_7(%arg0: i32) -> (i32, i32) {
    %c0_i32 = arith.constant 0 : i32
    %c0_i32_0 = arith.constant 0 : i32
    %c0_i32_1 = arith.constant 0 : i32
    return %c0_i32, %c0_i32_0 : i32, i32
  }
  func.func @transform_8(%arg0: i32) -> (i32, i32) {
    %c0_i32 = arith.constant 0 : i32
    %c0_i32_0 = arith.constant 0 : i32
    %c0_i32_1 = arith.constant 0 : i32
    return %c0_i32, %c0_i32_0 : i32, i32
  }
  func.func @transform_9(%arg0: i32) -> (i32, i32) {
    %c0_i32 = arith.constant 0 : i32
    %c0_i32_0 = arith.constant 0 : i32
    %c0_i32_1 = arith.constant 0 : i32
    return %c0_i32, %c0_i32_0 : i32, i32
  }
  func.func @transform_10(%arg0: i32) -> (i32, i32) {
    %c0_i32 = arith.constant 0 : i32
    %c0_i32_0 = arith.constant 0 : i32
    %c0_i32_1 = arith.constant 0 : i32
    return %c0_i32, %c0_i32_0 : i32, i32
  }
  func.func @transform_11(%arg0: i32) -> (i32, i32) {
    %c0_i32 = arith.constant 0 : i32
    %c0_i32_0 = arith.constant 0 : i32
    %c0_i32_1 = arith.constant 0 : i32
    return %c0_i32, %c0_i32_0 : i32, i32
  }
  func.func @transform_12(%arg0: i32) -> (i32, i32) {
    %c0_i32 = arith.constant 0 : i32
    %c0_i32_0 = arith.constant 0 : i32
    %c0_i32_1 = arith.constant 0 : i32
    return %c0_i32, %c0_i32_0 : i32, i32
  }
  func.func @transform_13(%arg0: i32) -> (i32, i32) {
    %c0_i32 = arith.constant 0 : i32
    %c0_i32_0 = arith.constant 0 : i32
    %c0_i32_1 = arith.constant 0 : i32
    return %c0_i32, %c0_i32_0 : i32, i32
  }
  func.func @transform_14(%arg0: i32) -> (i32, i32) {
    %c0_i32 = arith.constant 0 : i32
    %c0_i32_0 = arith.constant 0 : i32
    %c0_i32_1 = arith.constant 0 : i32
    return %c0_i32, %c0_i32_0 : i32, i32
  }
  func.func @transform_15(%arg0: i32) -> (i32, i32) {
    %c0_i32 = arith.constant 0 : i32
    %c0_i32_0 = arith.constant 0 : i32
    %c0_i32_1 = arith.constant 0 : i32
    return %c0_i32, %c0_i32_0 : i32, i32
  }
  func.func @transform_16(%arg0: i32) -> (i32, i32) {
    %c0_i32 = arith.constant 0 : i32
    %c0_i32_0 = arith.constant 0 : i32
    %c0_i32_1 = arith.constant 0 : i32
    return %c0_i32, %c0_i32_0 : i32, i32
  }
  func.func @transform_17(%arg0: i32) -> (i32, i32) {
    %c0_i32 = arith.constant 0 : i32
    %c0_i32_0 = arith.constant 0 : i32
    %c0_i32_1 = arith.constant 0 : i32
    return %c0_i32, %c0_i32_0 : i32, i32
  }
  func.func @transform_18(%arg0: i32) -> (i32, i32) {
    %c0_i32 = arith.constant 0 : i32
    %c0_i32_0 = arith.constant 0 : i32
    %c0_i32_1 = arith.constant 0 : i32
    return %c0_i32, %c0_i32_0 : i32, i32
  }
  func.func @transform_19(%arg0: i32) -> (i32, i32) {
    %c0_i32 = arith.constant 0 : i32
    %c0_i32_0 = arith.constant 0 : i32
    %c0_i32_1 = arith.constant 0 : i32
    return %c0_i32, %c0_i32_0 : i32, i32
  }
  func.func @transform_20(%arg0: i32) -> (i32, i32, i32) {
    %c0_i32 = arith.constant 0 : i32
    %c0_i32_0 = arith.constant 0 : i32
    %c0_i32_1 = arith.constant 0 : i32
    return %arg0, %c0_i32, %c0_i32_0 : i32, i32, i32
  }
}

</mosaic_0001>

<bundles_post_ra>
// kernel: tpu_custom_call.1
= control target key start
LH: loop header
LB: loop body
LE: loop exit
PB: predicated region body
PF: predicated region fallthrough
CT: control target
= control target key end

     0   :  { %s7411_s0 = inlined_call_operand.hbm [shape: bf16[4,16,128], index: 0, kind: input, shape index: {}]   ;;  %s7412_s1 = inlined_call_operand.hbm [shape: bf16[4,32,128], index: 1, kind: input, shape index: {}]   ;;  %s7413_s2 = inlined_call_operand.hbm [shape: bf16[128,128], index: 2, kind: input, shape index: {}]   ;;  %s7414_s3 = inlined_call_operand.hbm [shape: bf16[128,128], index: 3, kind: input, shape index: {}]   ;;  %s7415_s4 = inlined_call_operand.hbm [shape: bf16[128,128], index: 4, kind: input, shape index: {}]   ;;  %s7416_s5 = inlined_call_operand.hbm [shape: bf16[128,128], index: 5, kind: input, shape index: {}]   ;;  %s7417_s6 = inlined_call_operand.hbm [shape: bf16[128,128], index: 6, kind: input, shape index: {}]   ;;  %s7418_s7 = inlined_call_operand.hbm [shape: bf16[128,128], index: 7, kind: input, shape index: {}]   ;;  %s7419_s8 = inlined_call_operand.hbm [shape: bf16[128,128], index: 8, kind: input, shape index: {}]   ;;  %s7420_s9 = inlined_call_operand.hbm [shape: bf16[128,128], index: 9, kind: input, shape index: {}]   ;;  %s7421_s10 = inlined_call_operand.hbm [shape: bf16[128,256], index: 10, kind: input, shape index: {}]   ;;  %s7422_s11 = inlined_call_operand.vmem [shape: f32[1,256], index: 11, kind: input, shape index: {}]   ;;  %s7423_s12 = inlined_call_operand.hbm [shape: bf16[256,128], index: 12, kind: input, shape index: {}]   ;;  %s7424_s13 = inlined_call_operand.vmem [shape: f32[1,128], index: 13, kind: input, shape index: {}]   ;;  %s7425_s14 = inlined_call_operand.vmem [shape: f32[1,128], index: 14, kind: input, shape index: {}]   ;;  %s7426_s15 = inlined_call_operand.vmem [shape: f32[1,128], index: 15, kind: input, shape index: {}]   ;;  %s7427_s16 = inlined_call_operand.vmem [shape: f32[1,128], index: 16, kind: input, shape index: {}]   ;;  %s7428_s17 = inlined_call_operand.vmem [shape: f32[1,128], index: 17, kind: input, shape index: {}]   ;;  %s7429_s18 = inlined_call_operand.vmem [shape: f32[1,128], index: 18, kind: input, shape index: {}]   ;;  %s7430_s19 = inlined_call_operand.vmem [shape: f32[1,128], index: 19, kind: input, shape index: {}]   ;;  %s7431_s20 = inlined_call_operand.hbm [shape: f32[4,16,128], index: 20, kind: output, shape index: {}]  }
   0x1   :  { %7447 = sst [smem:[#allocation36_spill]] %s7411_s0 }
   0x2   :  { %7448 = sst [smem:[#allocation37_spill]] %s7412_s1 }
   0x3   :  { %7449 = sst [smem:[#allocation38_spill]] %s7413_s2 }
   0x4   :  { %7450 = sst [smem:[#allocation39_spill]] %s7414_s3 }
   0x5   :  { %7451 = sst [smem:[#allocation40_spill]] %s7415_s4 }
   0x6   :  { %7452 = sst [smem:[#allocation41_spill]] %s7416_s5 }
   0x7   :  { %7453 = sst [smem:[#allocation42_spill]] %s7417_s6 }
   0x8   :  { %7454 = sst [smem:[#allocation43_spill]] %s7418_s7 }
   0x9   :  { %7455 = sst [smem:[#allocation44_spill]] %s7419_s8 }
   0xa   :  { %7456 = sst [smem:[#allocation45_spill]] %s7420_s9 }
   0xb   :  { %7457 = sst [smem:[#allocation46_spill]] %s7421_s10 }
   0xc   :  { %7458 = sst [smem:[#allocation47_spill]] %s7423_s12 }
   0xd   :  { %7459 = sst [smem:[#allocation48_spill]] %s7429_s18 }
   0xe   :  { %7460 = sst [smem:[#allocation49_spill]] %s7430_s19 }
   0xf   :  { %7461 = sst [smem:[#allocation50_spill]] %s7431_s20 }
  0x10   :  { %25 = vsyncpa [#allocation3], 0 }
  0x11   :  { %27 = vsyncpa [#allocation3 + $0x1], 0 }
  0x12   :  { %28 = vsyncpa [#allocation6], 0 }
  0x13   :  { %30 = vsyncpa [#allocation6 + $0x1], 0 }
  0x14   :  { %31 = vsyncpa [#allocation9], 0 }
  0x15   :  { %32 = vsyncpa [#allocation12], 0 }
  0x16   :  { %33 = vsyncpa [#allocation15], 0 }
  0x17   :  { %34 = vsyncpa [#allocation18], 0 }
  0x18   :  { %35 = vsyncpa [#allocation21], 0 }
  0x19   :  { %36 = vsyncpa [#allocation4], 0 }
  0x1a   :  { %38 = vsyncpa [#allocation4 + $0x1], 0  ;;  %s6433_s1 = smov 0   ;;  %s6435_s22 = smov 0  }
  0x1b   :  { %s6437_s23 = smov 0   ;;  %s6439_s24 = smov 0  }
  0x1c LB: > { %7462 = sst [smem:[#allocation32_spill]] %s6297_s23  ;;  %s6303_s2 = smov [#allocation7]   ;;  %s6301_s24 = sphi %s6439_s24, %s7510_s24   ;;  %s6297_s23 = sphi %s6437_s23, %s7512_s23   ;;  %s6293_s22 = sphi %s6435_s22, %s7514_s22   ;;  %s6289_s1 = sphi %s6433_s1, %s7513_s1  }
  0x1d   : > { %s517_s25 = sshll.u32 %s6303_s2, 4  ;;  %s6454_s3 = sadd.s32 4294967295, %s6301_s24   ;;  %s518_s25 = int_to_ptr.vmem [resolvable:$true] %s517_s25 }
  0x1e   : > { %p4692_p0 = scmp.ge.s32.totalorder %s6301_s24, 1  ;;  %p7439_p1 = scmp.eq.s32.totalorder %s6454_s3, 0 }
  0x1f   : > { %p505_p2 = scmp.lt.s32.totalorder %s6301_s24, 3  ;;  %s6304_s27 = smov [#allocation8]  }
  0x20   : > { %s530_s28 = sshll.u32 %s6304_s27, 4  ;;  %s6305_s29 = smov [#allocation11]   ;;  %s6472_s28 = int_to_ptr.vmem [resolvable:$true] %s530_s28 }
  0x21   : > { %p6459_p3 = pnand %p4692_p0, %p505_p2  ;;  %s556_s30 = sshll.u32 %s6305_s29, 4  ;;  %s6474_s30 = int_to_ptr.vmem [resolvable:$true] %s556_s30 }
  0x22   : > { %s5904_s21 = scalar_lea.vmem %s518_s25, 1024  ;;  %p5912_p11 = scmp.lt.s32.totalorder %s518_s25, %s518_s25 }
  0x23   : > { %p5509_p5 = pneg %p6459_p3  ;;  %p5905_p8 = scmp.ne.s32.totalorder %s518_s25, %s5904_s21 }
  0x24   : > { %p5913_p12 = scmp.lt.s32.totalorder %s5904_s21, %s5904_s21 }
  0x25   : > { %p6468_p6 = pnand %p5509_p5, %p7439_p1 }
  0x26   : > { %p5914_p13 = por %p5913_p12, %p5912_p11 }
  0x27   : > { %p6478_p7 = pneg %p6468_p6 }
  0x29   : > { %p5907_p9 = pnand %p5905_p8, %p6478_p7 }
  0x2b   : > { %p5908_p10 = pneg %p5907_p9 }
  0x2d   : > { %p5915_p0 = pnand %p5914_p13, %p5908_p10 }
  0x2f   : > { %5918 = shalt.err (!%p5915_p0)
}
  0x30   : > { %s7435_s2 = smov 64   ;;  %s7437_s27 = smov 4  }
  0x31   : > { %s7466_s19 = sld [smem:[#allocation38_spill]]  ;;  %s5930_s18 = scalar_lea.vmem %s6472_s28, 1024 }
  0x32   : > { %p5931_p2 = scmp.ne.s32.totalorder %s6472_s28, %s5930_s18  ;;  %p5938_p9 = scmp.lt.s32.totalorder %s6472_s28, %s6472_s28 }
  0x33   : > { %p5939_p10 = scmp.lt.s32.totalorder %s5930_s18, %s5930_s18 }
  0x34   : > { %p5933_p5 = pnand %p5931_p2, %p6478_p7 }
  0x35   : > { %p5940_p11 = por %p5939_p10, %p5938_p9 }
  0x36   : > { %p5934_p8 = pneg %p5933_p5 }
  0x37   : > { %5512 = dma.hbm_to_vmem [thread:$0]  (!%p6468_p6), %s7466_s19, 1024, %s518_s25, [#allocation6], %s7435_s2, %s7435_s2, %s7437_s27  }
  0x38   : > { %p5941_p12 = pnand %p5940_p11, %p5934_p8 }
  0x3a   : > { %5944 = shalt.err (!%p5941_p12)
}
  0x3b   : > { %s7467_s19 = sld [smem:[#allocation39_spill]]  ;;  %s5956_s25 = scalar_lea.vmem %s6474_s30, 1024 }
  0x3c   : > { %p5957_p13 = scmp.ne.s32.totalorder %s6474_s30, %s5956_s25  ;;  %p5964_p5 = scmp.lt.s32.totalorder %s6474_s30, %s6474_s30 }
  0x3d   : > { %p5965_p8 = scmp.lt.s32.totalorder %s5956_s25, %s5956_s25 }
  0x3e   : > { %p5959_p0 = pnand %p5957_p13, %p6478_p7 }
  0x3f   : > { %p5966_p9 = por %p5965_p8, %p5964_p5 }
  0x40   : > { %p5960_p2 = pneg %p5959_p0 }
  0x41   : > { %5515 = dma.hbm_to_vmem [thread:$0]  (!%p6468_p6), %s7467_s19, 1024, %s6472_s28, [#allocation9], %s7435_s2, %s7435_s2, %s7437_s27  }
  0x42   : > { %p5967_p10 = pnand %p5966_p9, %p5960_p2 }
  0x44   : > { %5970 = shalt.err (!%p5967_p10)
}
  0x45   : > { %s7468_s5 = sld [smem:[#allocation41_spill]]  ;;  %s6308_s28 = smov [#allocation14]  }
  0x46   : > { %s582_s21 = sshll.u32 %s6308_s28, 4  ;;  %s6309_s20 = smov [#allocation17]   ;;  %s583_s21 = int_to_ptr.vmem [resolvable:$true] %s582_s21 }
  0x47   : > { %s608_s19 = sshll.u32 %s6309_s20, 4  ;;  %s5982_s25 = scalar_lea.vmem %s583_s21, 1024  ;;  %s609_s19 = int_to_ptr.vmem [resolvable:$true] %s608_s19 }
  0x48   : > { %p5983_p11 = scmp.ne.s32.totalorder %s583_s21, %s5982_s25  ;;  %p5990_p0 = scmp.lt.s32.totalorder %s583_s21, %s583_s21 }
  0x49   : > { %p5991_p2 = scmp.lt.s32.totalorder %s5982_s25, %s5982_s25 }
  0x4a   : > { %p5985_p12 = pnand %p5983_p11, %p6478_p7 }
  0x4b   : > { %5521 = dma.hbm_to_vmem [thread:$0]  (!%p6468_p6), %s7468_s5, 1024, %s6474_s30, [#allocation12], %s7435_s2, %s7435_s2, %s7437_s27  }
  0x4c   : > { %p5986_p13 = pneg %p5985_p12  ;;  %p5992_p5 = por %p5991_p2, %p5990_p0 }
  0x4e   : > { %p5993_p8 = pnand %p5992_p5, %p5986_p13 }
  0x50   : > { %5996 = shalt.err (!%p5993_p8)
}
  0x51   : > { %s7469_s7 = sld [smem:[#allocation43_spill]]  ;;  %s6008_s29 = scalar_lea.vmem %s609_s19, 1024 }
  0x52   : > { %p6009_p9 = scmp.ne.s32.totalorder %s609_s19, %s6008_s29  ;;  %p6016_p12 = scmp.lt.s32.totalorder %s609_s19, %s609_s19 }
  0x53   : > { %p6017_p0 = scmp.lt.s32.totalorder %s6008_s29, %s6008_s29 }
  0x54   : > { %p6011_p10 = pnand %p6009_p9, %p6478_p7 }
  0x55   : > { %p6018_p13 = por %p6017_p0, %p6016_p12 }
  0x56   : > { %p6012_p11 = pneg %p6011_p10 }
  0x57   : > { %5527 = dma.hbm_to_vmem [thread:$0]  (!%p6468_p6), %s7469_s7, 1024, %s583_s21, [#allocation15], %s7435_s2, %s7435_s2, %s7437_s27  }
  0x58   : > { %p6019_p2 = pnand %p6018_p13, %p6012_p11 }
  0x5a   : > { %6022 = shalt.err (!%p6019_p2)
}
  0x5b   : > { %s7470_s9 = sld [smem:[#allocation45_spill]]  ;;  %s6310_s21 = smov [#allocation10]  }
  0x5c   : > { %s543_s25 = sshll.u32 %s6310_s21, 4  ;;  %s6311_s30 = smov [#allocation13]   ;;  %s544_s25 = int_to_ptr.vmem [resolvable:$true] %s543_s25 }
  0x5d   : > { %s569_s18 = sshll.u32 %s6311_s30, 4  ;;  %s6034_s5 = scalar_lea.vmem %s544_s25, 1024  ;;  %s570_s18 = int_to_ptr.vmem [resolvable:$true] %s569_s18 }
  0x5e   : > { %p6035_p5 = scmp.ne.s32.totalorder %s544_s25, %s6034_s5  ;;  %p6042_p10 = scmp.lt.s32.totalorder %s544_s25, %s544_s25 }
  0x5f   : > { %p6043_p11 = scmp.lt.s32.totalorder %s6034_s5, %s6034_s5 }
  0x60   : > { %p6037_p8 = pnand %p6035_p5, %p6478_p7 }
  0x61   : > { %5533 = dma.hbm_to_vmem [thread:$0]  (!%p6468_p6), %s7470_s9, 1024, %s609_s19, [#allocation18], %s7435_s2, %s7435_s2, %s7437_s27  }
  0x62   : > { %p6038_p9 = pneg %p6037_p8  ;;  %p6044_p12 = por %p6043_p11, %p6042_p10 }
  0x64   : > { %p6045_p0 = pnand %p6044_p12, %p6038_p9 }
  0x66   : > { %6048 = shalt.err (!%p6045_p0)
}
  0x67   : > { %s7471_s28 = sld [smem:[#allocation40_spill]]  ;;  %s6060_s20 = scalar_lea.vmem %s570_s18, 1024 }
  0x68   : > { %p6061_p13 = scmp.ne.s32.totalorder %s570_s18, %s6060_s20  ;;  %p6068_p8 = scmp.lt.s32.totalorder %s570_s18, %s570_s18 }
  0x69   : > { %p6069_p10 = scmp.lt.s32.totalorder %s6060_s20, %s6060_s20 }
  0x6a   : > { %p6063_p2 = pnand %p6061_p13, %p6478_p7 }
  0x6b   : > { %p6070_p9 = por %p6069_p10, %p6068_p8 }
  0x6c   : > { %p6064_p5 = pneg %p6063_p2 }
  0x6d   : > { %5518 = dma.hbm_to_vmem [thread:$0]  (!%p6468_p6), %s7471_s28, 1024, %s544_s25, [#allocation9], %s7435_s2, %s7435_s2, %s7437_s27  }
  0x6e   : > { %p6071_p11 = pnand %p6070_p9, %p6064_p5 }
  0x70   : > { %6074 = shalt.err (!%p6071_p11)
}
  0x71   : > { %s7472_s6 = sld [smem:[#allocation42_spill]]  ;;  %s6312_s25 = smov [#allocation16]  }
  0x72   : > { %s595_s30 = sshll.u32 %s6312_s25, 4  ;;  %s6313_s19 = smov [#allocation19]   ;;  %s596_s30 = int_to_ptr.vmem [resolvable:$true] %s595_s30 }
  0x73   : > { %s621_s29 = sshll.u32 %s6313_s19, 4  ;;  %s6086_s28 = scalar_lea.vmem %s596_s30, 1024  ;;  %s622_s29 = int_to_ptr.vmem [resolvable:$true] %s621_s29 }
  0x74   : > { %p6087_p12 = scmp.ne.s32.totalorder %s596_s30, %s6086_s28  ;;  %p6094_p2 = scmp.lt.s32.totalorder %s596_s30, %s596_s30 }
  0x75   : > { %p6095_p5 = scmp.lt.s32.totalorder %s6086_s28, %s6086_s28 }
  0x76   : > { %p6089_p0 = pnand %p6087_p12, %p6478_p7 }
  0x77   : > { %5524 = dma.hbm_to_vmem [thread:$0]  (!%p6468_p6), %s7472_s6, 1024, %s570_s18, [#allocation12], %s7435_s2, %s7435_s2, %s7437_s27  }
  0x78   : > { %p6090_p13 = pneg %p6089_p0  ;;  %p6096_p8 = por %p6095_p5, %p6094_p2 }
  0x7a   : > { %p6097_p10 = pnand %p6096_p8, %p6090_p13 }
  0x7c   : > { %6100 = shalt.err (!%p6097_p10)
}
  0x7d   : > { %s7473_s8 = sld [smem:[#allocation44_spill]]  ;;  %s6112_s5 = scalar_lea.vmem %s622_s29, 2048 }
  0x7e   : > { %p6113_p9 = scmp.ne.s32.totalorder %s622_s29, %s6112_s5  ;;  %p6120_p0 = scmp.lt.s32.totalorder %s622_s29, %s622_s29 }
  0x7f   : > { %p6121_p2 = scmp.lt.s32.totalorder %s6112_s5, %s6112_s5 }
  0x80   : > { %p6115_p11 = pnand %p6113_p9, %p6478_p7 }
  0x81   : > { %p6122_p13 = por %p6121_p2, %p6120_p0 }
  0x82   : > { %p6116_p12 = pneg %p6115_p11 }
  0x83   : > { %5530 = dma.hbm_to_vmem [thread:$0]  (!%p6468_p6), %s7473_s8, 1024, %s596_s30, [#allocation15], %s7435_s2, %s7435_s2, %s7437_s27  }
  0x84   : > { %p6123_p5 = pnand %p6122_p13, %p6116_p12 }
  0x86   : > { %6126 = shalt.err (!%p6123_p5)
}
  0x87   : > { %s6314_s21 = smov 128   ;;  %s6315_s25 = smov 8  }
  0x88   : > { %s7474_s10 = sld [smem:[#allocation46_spill]]  ;;  %s6316_s30 = smov [#allocation20]  }
  0x89   : > { %s637_s18 = sshll.u32 %s6316_s30, 4  ;;  %s638_s18 = int_to_ptr.vmem [resolvable:$true] %s637_s18 }
  0x8a   : > { %s6138_s20 = scalar_lea.vmem %s638_s18, 2048  ;;  %p6146_p11 = scmp.lt.s32.totalorder %s638_s18, %s638_s18 }
  0x8b   : > { %p6139_p8 = scmp.ne.s32.totalorder %s638_s18, %s6138_s20  ;;  %p6147_p12 = scmp.lt.s32.totalorder %s6138_s20, %s6138_s20 }
  0x8d   : > { %p6141_p10 = pnand %p6139_p8, %p6478_p7  ;;  %p6148_p0 = por %p6147_p12, %p6146_p11 }
  0x8e   : > { %5536 = dma.hbm_to_vmem [thread:$0]  (!%p6468_p6), %s7474_s10, 2048, %s622_s29, [#allocation18], %s6314_s21, %s6314_s21, %s6315_s25  }
  0x8f   : > { %p6142_p9 = pneg %p6141_p10 }
  0x91   : > { %p6149_p2 = pnand %p6148_p0, %p6142_p9 }
  0x93   : > { %6152 = shalt.err (!%p6149_p2)
}
  0x94   : > { %s7475_s12 = sld [smem:[#allocation47_spill]]  ;;  %s4691_s4 = sadd.s32 4294967294, %s6301_s24  }
  0x95   : > { %s6591_s0 = sadd.s32 1, %s6301_s24   ;;  %s51_s25 = sadd.s32 1, %s6297_s23 }
  0x96   : > { %7476 = sst [smem:[#allocation33_spill]] %s6591_s0  ;;  %s48_s21 = ssub.s32 %s6301_s24, %s6591_s0 }
  0x97   : > { %p49_p7 = scmp.eq.s32.totalorder %s48_s21, 0  ;;  %p58_p13 = scmp.ne.s32.totalorder %s6297_s23, %s6293_s22 }
  0x98   : > { %p59_p5 = scmp.eq.s32.totalorder %s6301_s24, 0  ;;  %p64_p8 = scmp.ne.s32.totalorder %s6293_s22, %s6289_s1 }
  0x99   : > { %s6602_s19 = scalar_select %p49_p7, %s6297_s23, %s51_s25  }
  0x9a   : > { %5539 = dma.hbm_to_vmem [thread:$0]  (!%p6468_p6), %s7475_s12, 2048, %s638_s18, [#allocation21], %s7435_s2, %s7435_s2, %s7437_s27  }
  0x9b   : > { %7477 = sst [smem:[#allocation34_spill]] %s6602_s19  ;;  %p6604_p10 = por %p59_p5, %p58_p13 }
  0x9c   : > { %p6610_p6 = por %p7439_p1, %p64_p8  ;;  %p492_p9 = scmp.eq.s32.totalorder %s6454_s3, 1 }
  0x9d   : > { %p498_p11 = scmp.eq.s32.totalorder %s4691_s4, 1  ;;  %p5561_p12 = scmp.lt.s32.totalorder %s6301_s24, 2 }
  0x9e   : > { %s7479_s30 = scalar_select %p6610_p6, 1, 0 }
  0x9f   : > { %s6617_s18 = sand.u32 1, %s6297_s23   ;;  %p6619_p0 = por %p492_p9, %p58_p13 }
  0xa0   : > { %p6623_p2 = por %p498_p11, %p64_p8  ;;  %s4704_s29 = sshll.u32 %s6617_s18, 4 }
  0xa1   : > { %s7480_s20 = scalar_select %p6619_p0, 1, 0 }
  0xa2   : > { %s7481_s5 = scalar_select %p6623_p2, 1, 0 }
  0xa3   : > { %s4874_s21 = sshll.u32 %s6301_s24, 8  ;;  %s7483_s27 = sld [smem:[#allocation36_spill]] }
  0xa4   : > { %7482 = sst [smem:[#allocation35_spill]] %s7481_s5  ;;  %s676_s6 = scalar_lea.vmem [#allocation2], %s4704_s29 }
  0xa5   : > { %s684_s7 = sshll.u32 %s676_s6, 4  ;;  %p6638_p7 = pnand %p5561_p12, %p6604_p10  ;;  %s6634_s7 = int_to_ptr.vmem [resolvable:$true] %s684_s7 }
  0xa6   : > { %s673_s12 = scalar_lea.sflag [#allocation3], %s6617_s18 }
  0xa7   : > { %p6155_p5 = pneg %p6638_p7 }
  0xa9   : > { %s6632_s4 = scalar_lea.hbm %s7483_s27, %s4874_s21  ;;  %s6158_s28 = scalar_lea.hbm %s7483_s27, 512 }
  0xaa   : > { %s6153_s2 = scalar_lea.hbm %s6632_s4, 256  ;;  %p6159_p10 = scmp.lt.s32.totalorder %s6632_s4, %s7483_s27 }
  0xab   : > { %p6154_p13 = scmp.ne.s32.totalorder %s6632_s4, %s6153_s2  ;;  %p6160_p11 = scmp.lt.s32.totalorder %s6158_s28, %s6153_s2 }
  0xad   : > { %p6156_p8 = pnand %p6155_p5, %p6154_p13  ;;  %p6161_p12 = por %p6160_p11, %p6159_p10 }
  0xaf   : > { %p6157_p9 = pneg %p6156_p8 }
  0xb1   : > { %p6162_p4 = pnand %p6161_p12, %p6157_p9 }
  0xb3   : > { %6165 = shalt.err (!%p6162_p4)
}
  0xb4   : > { %s6166_s9 = scalar_lea.vmem %s6634_s7, 256  ;;  %s6317_s6 = smov [#allocation2]  }
  0xb5   : > { %p6167_p1 = scmp.ne.s32.totalorder %s6634_s7, %s6166_s9  ;;  %s6171_s29 = sshll.u32 %s6317_s6, 4  ;;  %s6172_s29 = int_to_ptr.vmem [resolvable:$false] %s6171_s29 }
  0xb6   : > { %s6173_s10 = scalar_lea.vmem %s6172_s29, 512  ;;  %p6174_p2 = scmp.lt.s32.totalorder %s6634_s7, %s6172_s29 }
  0xb7   : > { %p6169_p13 = pnand %p6167_p1, %p6155_p5  ;;  %p6175_p0 = scmp.lt.s32.totalorder %s6173_s10, %s6166_s9 }
  0xb9   : > { %p6170_p8 = pneg %p6169_p13  ;;  %p6176_p6 = por %p6175_p0, %p6174_p2 }
  0xbb   : > { %p6177_p10 = pnand %p6176_p6, %p6170_p8 }
  0xbd   : > { %6180 = shalt.err (!%p6177_p10)
}
  0xbe   : > { %s7485_s2 = smov 4   ;;  %s7486_s28 = smov 64  }
  0xbf   : > { %5543 = dma.hbm_to_vmem [thread:$0]  (!%p6638_p7), %s6632_s4, 256, %s6634_s7, %s673_s12, %s7486_s28, %s7486_s28, %s7485_s2  }
  0xc0   : > { %s4876_s21 = sshll.u32 %s6301_s24, 9  ;;  %s7487_s10 = sld [smem:[#allocation37_spill]] }
  0xc1   : > { %s7488_s29 = sshll.u32 %s6617_s18, 5  ;;  %s7489_s23 = sand.u32 1, %s6301_s24  }
  0xc2   : > { %s698_s27 = scalar_lea.vmem [#allocation5], %s7488_s29  ;;  %s695_s0 = scalar_lea.sflag [#allocation6], %s7489_s23 }
  0xc3   : > { %s706_s19 = sshll.u32 %s698_s27, 4  ;;  %s6682_s19 = int_to_ptr.vmem [resolvable:$true] %s706_s19 }
  0xc6   : > { %s6678_s6 = scalar_lea.hbm %s7487_s10, %s4876_s21  ;;  %s6186_s4 = scalar_lea.hbm %s7487_s10, 1024 }
  0xc7   : > { %s6181_s5 = scalar_lea.hbm %s6678_s6, 512  ;;  %p6187_p0 = scmp.lt.s32.totalorder %s6678_s6, %s7487_s10 }
  0xc8   : > { %p6182_p1 = scmp.ne.s32.totalorder %s6678_s6, %s6181_s5  ;;  %p6188_p2 = scmp.lt.s32.totalorder %s6186_s4, %s6181_s5 }
  0xca   : > { %p6184_p4 = pnand %p6182_p1, %p6155_p5  ;;  %p6189_p9 = por %p6188_p2, %p6187_p0 }
  0xcc   : > { %p6185_p6 = pneg %p6184_p4 }
  0xce   : > { %p6190_p11 = pnand %p6189_p9, %p6185_p6 }
  0xd0   : > { %6193 = shalt.err (!%p6190_p11)
}
  0xd1   : > { %s6194_s23 = scalar_lea.vmem %s6682_s19, 512  ;;  %s6318_s27 = smov [#allocation5]  }
  0xd2   : > { %p6195_p12 = scmp.ne.s32.totalorder %s6682_s19, %s6194_s23  ;;  %s6199_s25 = sshll.u32 %s6318_s27, 4  ;;  %s6200_s25 = int_to_ptr.vmem [resolvable:$false] %s6199_s25 }
  0xd3   : > { %s6201_s9 = scalar_lea.vmem %s6200_s25, 1024  ;;  %p6202_p10 = scmp.lt.s32.totalorder %s6682_s19, %s6200_s25 }
  0xd4   : > { %p6197_p13 = pnand %p6195_p12, %p6155_p5  ;;  %p6203_p1 = scmp.lt.s32.totalorder %s6201_s9, %s6194_s23 }
  0xd6   : > { %p6198_p8 = pneg %p6197_p13  ;;  %p6204_p4 = por %p6203_p1, %p6202_p10 }
  0xd8   : > { %p6205_p0 = pnand %p6204_p4, %p6198_p8 }
  0xda   : > { %6208 = shalt.err (!%p6205_p0)
}
  0xdb   : > { %5546 = dma.hbm_to_vmem [thread:$0]  (!%p6638_p7), %s6678_s6, 512, %s6682_s19, %s695_s0, %s7486_s28, %s7486_s28, %s7485_s2  }
  0xdc   : > { %718 = sbr.rel (%p6459_p3) target bundleno = 7392 (0x1ce0), region = 100  ;;  %s6714_s5 = sand.u32 (!%p6459_p3), 1, %s6293_s22  }
  0xdd   : > { %s4713_s29 = sshll.u32 (!%p6459_p3), %s6714_s5, 4  ;;  %s721_s7 = scalar_lea.sflag (!%p6459_p3), [#allocation3], %s6714_s5 }
  0xde   : > { %s6718_s12 = scalar_lea.vmem (!%p6459_p3), [#allocation2], %s4713_s29  ;;  %p7490_p5 = scmp.ne.s32.totalorder (!%p6459_p3), %s7479_s30, 0 }
  0xe1   : > { %6252 = dma.done.wait (%p7490_p5), %s721_s7, 256  }
  0xe2   : > { %6254 = vsyncadd (%p7490_p5), %s721_s7, 4294967040  ;;  %s729_s8 = sand.u32 1, %s6454_s3   ;;  %s4714_s26 = sshll.u32 %s6714_s5, 5 }
  0xe3   : > { %s730_s0 = scalar_lea.sflag [#allocation6], %s729_s8  ;;  %s6728_s19 = scalar_lea.vmem [#allocation5], %s4714_s26 }
  0xe4   : > { %6256 = dma.done.wait (%p7490_p5), %s730_s0, 512  }
  0xe5   : > { %6258 = vsyncadd (%p7490_p5), %s730_s0, 4294966784  ;;  %p7491_p3 = scmp.eq.s32.totalorder %s6454_s3, 0 }
  0xe7   : > { %6260 = dma.done.wait (%p7491_p3), [#allocation6], 1024   ;;  %p7492_p7 = pmov %p7491_p3 }
  0xe8   : > { %p7493_p6 = pmov %p7491_p3 }
  0xe9   : > { %6262 = vsyncadd (%p7492_p7), [#allocation6], 4294966272 }
  0xea   : > { %6264 = dma.done.wait (%p7493_p6), [#allocation9], 2048   ;;  %p7494_p2 = pmov %p7491_p3 }
  0xec   : > { %6266 = vsyncadd (%p7494_p2), [#allocation9], 4294965248  ;;  %p7495_p9 = pmov %p7494_p2 }
  0xed   : > { %p7496_p11 = pmov %p7494_p2 }
  0xee   : > { %6268 = dma.done.wait (%p7495_p9), [#allocation12], 2048  }
  0xef   : > { %6270 = vsyncadd (%p7496_p11), [#allocation12], 4294965248  ;;  %p7497_p12 = pmov %p7494_p2 }
  0xf0   : > { %p7498_p13 = pmov %p7494_p2 }
  0xf1   : > { %6272 = dma.done.wait (%p7497_p12), [#allocation15], 2048  }
  0xf2   : > { %6274 = vsyncadd (%p7498_p13), [#allocation15], 4294965248  ;;  %p7499_p8 = pmov %p7494_p2 }
  0xf3   : > { %p7500_p10 = pmov %p7494_p2 }
  0xf4   : > { %6276 = dma.done.wait (%p7499_p8), [#allocation18], 3072  }
  0xf5   : > { %6278 = vsyncadd (%p7500_p10), [#allocation18], 4294964224  ;;  %p7501_p1 = pmov %p7494_p2 }
  0xf7   : > { %6280 = dma.done.wait (%p7501_p1), [#allocation21], 2048   ;;  %p7502_p4 = pmov %p7501_p1 }
  0xf8   : > { %v5627_v0 = vld [vmem:[#allocation8 + $0x38] sm:$0xff]   ;;  %v5629_v2 = vld [vmem:[#allocation8 + $0x30] sm:$0xff]   ;;  %v5631_v4 = vld [vmem:[#allocation8 + $0x28] sm:$0xff]   ;;  %v6319_v18 = vmov 0.0   ;;  %vm6320_vm0 = vmmov 0   ;;  %vm1208_vm1 = vcmask 261120  }
  0xf9   : > { %6282 = vsyncadd (%p7502_p4), [#allocation21], 4294965248  ;;  %v5628_v1 = vld [vmem:[#allocation7 + $0x38] sm:$0xff]   ;;  %5091 = vmatprep.subr.bf16.mxu1 %v5627_v0  ;;  %v5630_v3 = vld [vmem:[#allocation7 + $0x30] sm:$0xff]   ;;  %vm1303_vm2 = vcmask 130048   ;;  %s6321_s30 = smov 96  }
  0xfa   : > { %5092 = vmatpush3.bf16.msra.mxu1 %v5627_v0  ;;  %5071 = vmatprep.subr.bf16.mxu0 %v5628_v1  ;;  %v5632_v5 = vld [vmem:[#allocation7 + $0x28] sm:$0xff]   ;;  %v5633_v6 = vld [vmem:[#allocation8 + $0x20] sm:$0xff]   ;;  %v5635_v8 = vld [vmem:[#allocation8 + $0x18] sm:$0xff]   ;;  %s6322_s2 = smov 64   ;;  %s6323_s28 = smov 32   ;;  %vm2202_vm3 = vcmask 523264  }
  0xfb   : > { %5072 = vmatpush3.bf16.msra.mxu0 %v5628_v1  ;;  %5093 = vmatprep.subr.bf16.mxu1 %v5629_v2  ;;  %v5634_v7 = vld [vmem:[#allocation7 + $0x20] sm:$0xff]   ;;  %v5636_v9 = vld [vmem:[#allocation7 + $0x18] sm:$0xff]   ;;  %v5637_v10 = vld [vmem:[#allocation8 + $0x10] sm:$0xff]   ;;  %vm2207_vm4 = vcmask 785408   ;;  %s7504_s6 = sld [smem:[#allocation49_spill]]  ;;  %s834_s4 = scalar_lea.vmem [#allocation22], %s4714_s26 }
  0xfc   : > { %5073 = vmatprep.subr.bf16.mxu0 %v5630_v3  ;;  %v5638_v11 = vld [vmem:[#allocation7 + $0x10] sm:$0xff]   ;;  %v5639_v13 = vld [vmem:[#allocation8 + $0x8] sm:$0xff]   ;;  %v5641_v15 = vld [vmem:[#allocation8] sm:$0xff]   ;;  %s4878_s18 = sshll.u32 %s6454_s3, 9  ;;  %s4500_s21 = sshll.u32 %s834_s4, 4  ;;  %s7368_s21 = int_to_ptr.vmem [resolvable:$true] %s4500_s21 }
  0xfd   : > { %v839_v12 = vld [vmem:[%s6718_s12] sm:$0xff]   ;;  %v5640_v14 = vld [vmem:[#allocation7 + $0x8] sm:$0xff]   ;;  %v5645_v33 = vld [vmem:[#allocation10 + $0x38] sm:$0xff]   ;;  %s7505_s25 = sld [smem:[#allocation50_spill]]  ;;  %s4486_s9 = scalar_lea.sflag [#allocation4], %s6714_s5 }
  0xfe   : > { %5094 = vmatpush3.bf16.msra.mxu1 %v5629_v2  ;;  %5107 = vmatprep.mubr.bf16.mxu1 %v839_v12  ;;  %v5642_v16 = vld [vmem:[#allocation7] sm:$0xff]   ;;  %v841_v17 = vld [vmem:[%s6718_s12 + $0x8] sm:$0xff]   ;;  %v5646_v34 = vld [vmem:[#allocation10 + $0x30] sm:$0xff]   ;;  %s6209_s29 = scalar_lea.vmem %s7368_s21, 512  ;;  %p7506_p5 = scmp.ne.s32.totalorder %s7480_s20, 0 }
  0xff   : > { %5074 = vmatpush3.bf16.msra.mxu0 %v5630_v3  ;;  %5095 = vmatprep.subr.bf16.mxu1 %v5631_v4  ;;  %v5647_v35 = vld [vmem:[#allocation10 + $0x28] sm:$0xff]   ;;  %v5648_v36 = vld [vmem:[#allocation10 + $0x20] sm:$0xff]   ;;  %v5649_v37 = vld [vmem:[#allocation10 + $0x18] sm:$0xff]   ;;  %p6210_p0 = scmp.ne.s32.totalorder %s7368_s21, %s6209_s29  ;;  %s6325_s3 = smov [#allocation22]  }
 0x100   : > { %5075 = vmatprep.subr.bf16.mxu0 %v5632_v5  ;;  %5087 = vmatprep.mubr.bf16.mxu0 %v839_v12  ;;  %v5650_v38 = vld [vmem:[#allocation10 + $0x10] sm:$0xff]   ;;  %v5651_v39 = vld [vmem:[#allocation10 + $0x8] sm:$0xff]   ;;  %v5652_v40 = vld [vmem:[#allocation10] sm:$0xff]   ;;  %s6213_s7 = sshll.u32 %s6325_s3, 4  ;;  %s6214_s7 = int_to_ptr.vmem [resolvable:$false] %s6213_s7 }
 0x101   : > { %p6211_p3 = pnand %p6210_p0, %p7506_p5  ;;  %p6216_p6 = scmp.lt.s32.totalorder %s7368_s21, %s6214_s7 }
 0x102   : > { %5096 = vmatpush3.bf16.msra.mxu1 %v5631_v4 }
 0x103   : > { %5076 = vmatpush3.bf16.msra.mxu0 %v5632_v5  ;;  %5097 = vmatprep.subr.bf16.mxu1 %v5633_v6  ;;  %s7366_s26 = scalar_lea.hbm %s7505_s25, %s4878_s18  ;;  %p6212_p7 = pneg %p6211_p3 }
 0x104   : > { %5077 = vmatprep.subr.bf16.mxu0 %v5634_v7 }
 0x106   : > { %5098 = vmatpush3.bf16.msra.mxu1 %v5633_v6 }
 0x107   : > { %5078 = vmatpush3.bf16.msra.mxu0 %v5634_v7  ;;  %5099 = vmatprep.subr.bf16.mxu1 %v5635_v8 }
 0x108   : > { %5079 = vmatprep.subr.bf16.mxu0 %v5636_v9 }
 0x10a   : > { %5100 = vmatpush3.bf16.msra.mxu1 %v5635_v8 }
 0x10b   : > { %5080 = vmatpush3.bf16.msra.mxu0 %v5636_v9  ;;  %5101 = vmatprep.subr.bf16.mxu1 %v5637_v10 }
 0x10c   : > { %5081 = vmatprep.subr.bf16.mxu0 %v5638_v11 }
 0x10e   : > { %5102 = vmatpush3.bf16.msra.mxu1 %v5637_v10 }
 0x10f   : > { %5082 = vmatpush3.bf16.msra.mxu0 %v5638_v11  ;;  %5103 = vmatprep.subr.bf16.mxu1 %v5639_v13 }
 0x110   : > { %5083 = vmatprep.subr.bf16.mxu0 %v5640_v14 }
 0x112   : > { %5104 = vmatpush3.bf16.msra.mxu1 %v5639_v13 }
 0x113   : > { %5084 = vmatpush3.bf16.msra.mxu0 %v5640_v14  ;;  %5105 = vmatprep.subr.bf16.mxu1 %v5641_v15 }
 0x114   : > { %5085 = vmatprep.subr.bf16.mxu0 %v5642_v16 }
 0x116   : > { %5106 = vmatpush3.bf16.msra.mxu1 %v5641_v15 }
 0x117   : > { %5086 = vmatpush3.bf16.msra.mxu0 %v5642_v16  ;;  %5131 = vmatprep.subr.bf16.mxu1 %v6319_v18 }
 0x118   : > { %5111 = vmatprep.subr.bf16.mxu0 %v5645_v33 }
 0x119   : > { %5108 = vmatmul.mubr.bf16.vlgmr.msra.gmra.mxu1 %v841_v17 }
 0x11a   : > { %5088 = vmatmul.mubr.bf16.vlgmr.msra.gmra.mxu0 %v841_v17  ;;  %5133 = vmatprep.mubr.msk.bf16.mxu1 %vm6320_vm0, %v6319_v18 }
 0x11b   : > { %5127 = vmatprep.mubr.bf16.mxu0 %v839_v12  ;;  %5112 = vmatpush3.bf16.msra.mxu0 %v5645_v33 }
 0x11c   : > { %5113 = vmatprep.subr.bf16.mxu0 %v5646_v34 }
 0x11f   : > { %5114 = vmatpush3.bf16.msra.mxu0 %v5646_v34 }
 0x120   : > { %5115 = vmatprep.subr.bf16.mxu0 %v5647_v35 }
 0x123   : > { %5116 = vmatpush3.bf16.msra.mxu0 %v5647_v35 }
 0x124   : > { %5117 = vmatprep.subr.bf16.mxu0 %v5648_v36 }
 0x127   : > { %5118 = vmatpush3.bf16.msra.mxu0 %v5648_v36 }
 0x128   : > { %5119 = vmatprep.subr.bf16.mxu0 %v5649_v37 }
 0x12b   : > { %5120 = vmatpush3.bf16.msra.mxu0 %v5649_v37 }
 0x12c   : > { %5121 = vmatprep.subr.bf16.mxu0 %v5650_v38 }
 0x12f   : > { %5122 = vmatpush3.bf16.msra.mxu0 %v5650_v38 }
 0x130   : > { %5123 = vmatprep.subr.bf16.mxu0 %v5651_v39 }
 0x133   : > { %5124 = vmatpush3.bf16.msra.mxu0 %v5651_v39 }
 0x134   : > { %5125 = vmatprep.subr.bf16.mxu0 %v5652_v40 }
 0x137   : > { %5126 = vmatpush3.bf16.msra.mxu0 %v5652_v40 }
 0x138   : > { %5155 = vmatprep.subr.bf16.mxu0 %v6319_v18 }
 0x13a   : > { %5128 = vmatmul.mubr.bf16.vlgmr.msra.gmra.mxu0 %v841_v17 }
 0x13b   : > { %5157 = vmatprep.mubr.msk.bf16.mxu0 %vm6320_vm0, %v6319_v18 }
 0x1d9   : > { %v5109_v19 = vpop.f32.mrf.mxu1 }
 0x1da   : > { %v5089_v20 = vpop.f32.mrf.mxu0 }
 0x1db   : > { %v1074_v21 = vpop.f32.mrf.mxu1 }
 0x1dc   : > { %v961_v22 = vpop.f32.mrf.mxu0 }
 0x1dd   : > { %v5110_v23 = vpop.f32.mrf.mxu1 }
 0x1de   : > { %v5090_v26 = vpop.f32.mrf.mxu0  ;;  %v6768_v29 = vpack.c.bf16 %v5110_v23, %v5109_v19 }
 0x1df   : > { %v1077_v24 = vpop.f32.mrf.mxu1  ;;  %v6779_v32 = vpack.c.bf16 %v5090_v26, %v5089_v20 }
 0x1e0   : > { %v6763_v25 = vpack.c.bf16 %v1077_v24, %v1074_v21  ;;  %v964_v28 = vpop.f32.mrf.mxu0  ;;  %v1260_v31 = vsel %vm1208_vm1, %v6768_v29, 0 }
 0x1e1   : > { %v6770_v30 = vpack.c.bf16 %v964_v28, %v961_v22 }
 0x1e2   : > { %v1213_v27 = vsel %vm1208_vm1, %v6763_v25, 0 }
 0x1e3   : > { %5132 = vmatpush3.bf16.xpose.msra.mxu1 %v1213_v27 }
 0x1e4   : > { %5137 = vmatprep.subr.bf16.mxu1 %v6319_v18 }
 0x1ea   : > { %5134 = vmatmul.mubr.msk.bf16.vlgmr.msra.gmra.mxu1 %vm1208_vm1, %v6770_v30 }
 0x1eb   : > { %5138 = vmatpush3.bf16.xpose.msra.mxu1 %v1260_v31  ;;  %5139 = vmatprep.mubr.msk.bf16.mxu1 %vm6320_vm0, %v6319_v18 }
 0x1ec   : > { %5143 = vmatprep.subr.bf16.mxu1 %v6319_v18 }
 0x1f2   : > { %5140 = vmatmul.mubr.msk.bf16.vlgmr.msra.gmra.mxu1 %vm1208_vm1, %v6779_v32 }
 0x1f3   : > { %5145 = vmatprep.mubr.msk.bf16.mxu1 %vm6320_vm0, %v6319_v18 }
 0x1fa   : > { %v5129_v4 = vpop.f32.mrf.mxu0 }
 0x1fc   : > { %v1187_v5 = vpop.f32.mrf.mxu0 }
 0x1fe   : > { %v5130_v6 = vpop.f32.mrf.mxu0 }
 0x1ff   : > { %v6797_v7 = vpack.c.bf16 %v5130_v6, %v5129_v4 }
 0x200   : > { %v1190_v8 = vpop.f32.mrf.mxu0 }
 0x201   : > { %v6799_v9 = vpack.c.bf16 %v1190_v8, %v1187_v5 }
 0x203   : > { %5144 = vmatpush3.bf16.msra.mxu1 %v6799_v9 }
 0x204   : > { %5149 = vmatprep.subr.bf16.mxu1 %v6319_v18 }
 0x2aa   : > { %v1249_v41 = vpop.f32.mrf.mxu1 }
 0x2ab   : > { %v1304_v42 = vsel %vm1303_vm2, %v1249_v41, -inf }
 0x2ac   : > { %1305 = vmax.xlane.f32.xlu0 %v1304_v42  ;;  %v5135_v43 = vpop.f32.mrf.mxu1 }
 0x2ae   : > { %v1252_v44 = vpop.f32.mrf.mxu1 }
 0x2af   : > { %v1307_v45 = vsel %vm1303_vm2, %v1252_v44, -inf }
 0x2b0   : > { %1308 = vmax.xlane.f32.xlu0 %v1307_v45  ;;  %v5136_v46 = vpop.f32.mrf.mxu1 }
 0x2b2   : > { %v1296_v47 = vpop.f32.mrf.mxu1 }
 0x2b3   : > { %v1310_v48 = vsel %vm1303_vm2, %v1296_v47, -inf }
 0x2b4   : > { %1311 = vmax.xlane.f32.xlu1 %v1310_v48  ;;  %v5141_v49 = vpop.f32.mrf.mxu1 }
 0x2b6   : > { %v1299_v50 = vpop.f32.mrf.mxu1 }
 0x2b7   : > { %v1313_v51 = vsel %vm1303_vm2, %v1299_v50, -inf }
 0x2b8   : > { %1314 = vmax.xlane.f32.xlu1 %v1313_v51  ;;  %v5142_v52 = vpop.f32.mrf.mxu1 }
 0x335   : > { %v1306_v53 = vpop.xlane.xlu0 %1305 }
 0x336   : > { %v1316_v54 = vsub.f32 %v1249_v41, %v1306_v53 }
 0x338   : > { %v1320_v55 = vmul.f32 1.442695, %v1316_v54 }
 0x339   : > { %v1309_v56 = vpop.xlane.xlu0 %1308 }
 0x33a   : > { %5739 = vpow2.f32 %v1320_v55  ;;  %v1317_v57 = vsub.f32 %v1252_v44, %v1309_v56 }
 0x33c   : > { %v1322_v58 = vmul.f32 1.442695, %v1317_v57 }
 0x33d   : > { %v1312_v59 = vpop.xlane.xlu1 %1311 }
 0x33e   : > { %5741 = vpow2.f32 %v1322_v58  ;;  %v1318_v60 = vsub.f32 %v1296_v47, %v1312_v59 }
 0x340   : > { %v1324_v61 = vmul.f32 1.442695, %v1318_v60 }
 0x341   : > { %v1315_v10 = vpop.xlane.xlu1 %1314 }
 0x342   : > { %5743 = vpow2.f32 %v1324_v61  ;;  %v1319_v11 = vsub.f32 %v1299_v50, %v1315_v10 }
 0x344   : > { %v1326_v12 = vmul.f32 1.442695, %v1319_v11 }
 0x346   : > { %5745 = vpow2.f32 %v1326_v12 }
 0x347   : > { %v5740_v62 = vpop.eup %5739 }
 0x348   : > { %v1328_v63 = vsel %vm1303_vm2, %v5740_v62, 0.0 }
 0x349   : > { %1329 = vadd.xlane.f32.xlu0 %v1328_v63 }
 0x34b   : > { %v5742_v0 = vpop.eup %5741 }
 0x34c   : > { %v1331_v1 = vsel %vm1303_vm2, %v5742_v0, 0.0 }
 0x34d   : > { %1332 = vadd.xlane.f32.xlu1 %v1331_v1 }
 0x34f   : > { %v5744_v2 = vpop.eup %5743 }
 0x350   : > { %v1334_v3 = vsel %vm1303_vm2, %v5744_v2, 0.0 }
 0x351   : > { %1335 = vadd.xlane.f32.xlu0 %v1334_v3 }
 0x353   : > { %v5746_v13 = vpop.eup %5745 }
 0x354   : > { %v1337_v14 = vsel %vm1303_vm2, %v5746_v13, 0.0 }
 0x35e   : > { %1497 = vrot.lane.b32.xlu1 %v6768_v29, %s6321_s30 }
 0x367   : > { %1444 = vrot.lane.b32.xlu0 %v6763_v25, %s6321_s30 }
 0x382   : > { %1338 = vadd.xlane.f32.xlu1 %v1337_v14 }
 0x393   : > { %1441 = vrot.lane.b32.xlu1 %v6770_v30, %s6321_s30 }
 0x397   : > { %1494 = vrot.lane.b32.xlu1 %v6779_v32, %s6321_s30 }
 0x3d2   : > { %v1330_v15 = vpop.xlane.xlu0 %1329 }
 0x3d3   : > { %5747 = vrcp.f32 %v1330_v15 }
 0x3d6   : > { %v1333_v16 = vpop.xlane.xlu1 %1332 }
 0x3d7   : > { %5749 = vrcp.f32 %v1333_v16 }
 0x3da   : > { %v1336_v17 = vpop.xlane.xlu0 %1335  ;;  %v1498_v27 = vpop.permute.xlu1 %1497 }
 0x3db   : > { %5751 = vrcp.f32 %v1336_v17  ;;  %v1503_v38 = vsel %vm1208_vm1, %v1498_v27, 0 }
 0x3de   : > { %v1445_v19 = vpop.permute.xlu0 %1444 }
 0x3df   : > { %v1450_v20 = vsel %vm1208_vm1, %v1445_v19, 0 }
 0x3e0   : > { %5156 = vmatpush3.bf16.xpose.msra.mxu0 %v1450_v20  ;;  %v5748_v21 = vpop.eup %5747 }
 0x3e1   : > { %5167 = vmatprep.subr.bf16.mxu0 %v6319_v18  ;;  %v1344_v23 = vmul.f32 %v5748_v21, %v5740_v62 }
 0x3e4   : > { %v5750_v22 = vpop.eup %5749 }
 0x3e5   : > { %v1345_v24 = vmul.f32 %v5750_v22, %v5742_v0 }
 0x3e7   : > { %v1348_v26 = vpack.c.bf16 %v1345_v24, %v1344_v23 }
 0x3e8   : > { %v5752_v33 = vpop.eup %5751 }
 0x3e9   : > { %5146 = vmatmul.mubr.msk.bf16.vlgmr.msra.gmra.mxu1 %vm1303_vm2, %v1348_v26  ;;  %v1346_v35 = vmul.f32 %v5752_v33, %v5744_v2 }
 0x3ea   : > { %5150 = vmatpush3.bf16.msra.mxu1 %v6797_v7  ;;  %5151 = vmatprep.mubr.msk.bf16.mxu1 %vm6320_vm0, %v6319_v18 }
 0x3eb   : > { %5161 = vmatprep.subr.bf16.mxu1 %v6319_v18 }
 0x40b   : > { %v1339_v28 = vpop.xlane.xlu1 %1338 }
 0x40c   : > { %5753 = vrcp.f32 %v1339_v28 }
 0x40f   : > { %v1442_v31 = vpop.permute.xlu1 %1441 }
 0x410   : > { %5158 = vmatmul.mubr.msk.bf16.vlgmr.msra.gmra.mxu0 %vm1208_vm1, %v1442_v31 }
 0x411   : > { %5169 = vmatprep.mubr.msk.bf16.mxu0 %vm6320_vm0, %v6319_v18 }
 0x413   : > { %v1495_v39 = vpop.permute.xlu1 %1494 }
 0x419   : > { %v5754_v34 = vpop.eup %5753 }
 0x41a   : > { %v1347_v36 = vmul.f32 %v5754_v34, %v5746_v13 }
 0x41c   : > { %v1349_v37 = vpack.c.bf16 %v1347_v36, %v1346_v35 }
 0x41e   : > { %5152 = vmatmul.mubr.msk.bf16.vlgmr.msra.gmra.mxu1 %vm1303_vm2, %v1349_v37 }
 0x41f   : > { %5162 = vmatpush3.bf16.xpose.msra.mxu1 %v1503_v38  ;;  %5163 = vmatprep.mubr.msk.bf16.mxu1 %vm6320_vm0, %v6319_v18 }
 0x420   : > { %5173 = vmatprep.subr.bf16.mxu1 %v6319_v18 }
 0x426   : > { %5164 = vmatmul.mubr.msk.bf16.vlgmr.msra.gmra.mxu1 %vm1208_vm1, %v1495_v39 }
 0x427   : > { %5175 = vmatprep.mubr.msk.bf16.mxu1 %vm6320_vm0, %v6319_v18 }
 0x4a9   : > { %v6828_v40 = vpop.f32.mrf.mxu1 }
 0x4ab   : > { %v5147_v41 = vpop.f32.mrf.mxu1 }
 0x4ad   : > { %v6830_v42 = vpop.f32.mrf.mxu1 }
 0x4ae   : > { %v1438_v43 = vpack.c.bf16 %v6830_v42, %v6828_v40 }
 0x4af   : > { %v5148_v44 = vpop.f32.mrf.mxu1 }
 0x4d0   : > { %v1486_v45 = vpop.f32.mrf.mxu0 }
 0x4d1   : > { %v1546_v46 = vsel %vm1303_vm2, %v1486_v45, -inf }
 0x4d2   : > { %1547 = vmax.xlane.f32.xlu0 %v1546_v46  ;;  %v5159_v47 = vpop.f32.mrf.mxu0 }
 0x4d4   : > { %v1489_v48 = vpop.f32.mrf.mxu0 }
 0x4d5   : > { %v1549_v49 = vsel %vm1303_vm2, %v1489_v48, -inf }
 0x4d6   : > { %1550 = vmax.xlane.f32.xlu1 %v1549_v49  ;;  %v5160_v50 = vpop.f32.mrf.mxu0 }
 0x4de   : > { %v6836_v51 = vpop.f32.mrf.mxu1 }
 0x4e0   : > { %v5153_v52 = vpop.f32.mrf.mxu1 }
 0x4e2   : > { %v6838_v53 = vpop.f32.mrf.mxu1 }
 0x4e3   : > { %v1439_v54 = vpack.c.bf16 %v6838_v53, %v6836_v51 }
 0x4e4   : > { %v5154_v55 = vpop.f32.mrf.mxu1 }
 0x4e6   : > { %v1539_v56 = vpop.f32.mrf.mxu1 }
 0x4e7   : > { %v1552_v57 = vsel %vm1303_vm2, %v1539_v56, -inf }
 0x4e8   : > { %1553 = vmax.xlane.f32.xlu0 %v1552_v57  ;;  %v5165_v58 = vpop.f32.mrf.mxu1 }
 0x4ea   : > { %v1542_v59 = vpop.f32.mrf.mxu1 }
 0x4eb   : > { %v1555_v60 = vsel %vm1303_vm2, %v1542_v59, -inf }
 0x4ec   : > { %1556 = vmax.xlane.f32.xlu0 %v1555_v60  ;;  %v5166_v61 = vpop.f32.mrf.mxu1 }
 0x55b   : > { %v1548_v62 = vpop.xlane.xlu0 %1547 }
 0x55c   : > { %v1558_v63 = vsub.f32 %v1486_v45, %v1548_v62 }
 0x55e   : > { %v1562_v0 = vmul.f32 1.442695, %v1558_v63 }
 0x55f   : > { %v1551_v1 = vpop.xlane.xlu1 %1550 }
 0x560   : > { %5755 = vpow2.f32 %v1562_v0  ;;  %v1559_v2 = vsub.f32 %v1489_v48, %v1551_v1 }
 0x562   : > { %v1564_v3 = vmul.f32 1.442695, %v1559_v2 }
 0x564   : > { %5757 = vpow2.f32 %v1564_v3 }
 0x56d   : > { %v5756_v4 = vpop.eup %5755 }
 0x56e   : > { %v1570_v5 = vsel %vm1303_vm2, %v5756_v4, 0.0 }
 0x56f   : > { %1571 = vadd.xlane.f32.xlu0 %v1570_v5 }
 0x571   : > { %v5758_v6 = vpop.eup %5757  ;;  %v1554_v8 = vpop.xlane.xlu0 %1553 }
 0x572   : > { %v1560_v10 = vsub.f32 %v1539_v56, %v1554_v8  ;;  %v1573_v11 = vsel %vm1303_vm2, %v5758_v6, 0.0 }
 0x573   : > { %1574 = vadd.xlane.f32.xlu1 %v1573_v11 }
 0x574   : > { %v1566_v12 = vmul.f32 1.442695, %v1560_v10 }
 0x575   : > { %v1557_v15 = vpop.xlane.xlu0 %1556 }
 0x576   : > { %5759 = vpow2.f32 %v1566_v12  ;;  %v1561_v16 = vsub.f32 %v1542_v59, %v1557_v15 }
 0x578   : > { %v1568_v17 = vmul.f32 1.442695, %v1561_v16 }
 0x57a   : > { %5761 = vpow2.f32 %v1568_v17 }
 0x583   : > { %v5760_v13 = vpop.eup %5759 }
 0x584   : > { %1641 = vrot.lane.b32.xlu1 %v6797_v7, %s6321_s30  ;;  %v1576_v14 = vsel %vm1303_vm2, %v5760_v13, 0.0 }
 0x585   : > { %1577 = vadd.xlane.f32.xlu0 %v1576_v14 }
 0x587   : > { %v5762_v19 = vpop.eup %5761 }
 0x588   : > { %1692 = vrot.lane.b32.xlu1 %v6763_v25, %s6322_s2  ;;  %v1579_v20 = vsel %vm1303_vm2, %v5762_v19, 0.0 }
 0x59b   : > { %1593 = vrot.lane.b32.xlu0 %v6799_v9, %s6321_s30 }
 0x59f   : > { %1690 = vrot.lane.b32.xlu0 %v6770_v30, %s6322_s2 }
 0x5ac   : > { %1580 = vadd.xlane.f32.xlu1 %v1579_v20 }
 0x5bd   : > { %1743 = vrot.lane.b32.xlu1 %v6768_v29, %s6322_s2 }
 0x5c1   : > { %1741 = vrot.lane.b32.xlu1 %v6779_v32, %s6322_s2 }
 0x5f8   : > { %v1572_v22 = vpop.xlane.xlu0 %1571 }
 0x5fc   : > { %v1575_v21 = vpop.xlane.xlu1 %1574 }
 0x5fd   : > { %5763 = vrcp.f32 %v1575_v21 }
 0x5fe   : > { %5765 = vrcp.f32 %v1572_v22 }
 0x600   : > { %v1642_v23 = vpop.permute.xlu1 %1641 }
 0x601   : > { %5174 = vmatpush3.bf16.msra.mxu1 %v1642_v23 }
 0x602   : > { %5185 = vmatprep.subr.bf16.mxu1 %v6319_v18 }
 0x604   : > { %v1693_v34 = vpop.permute.xlu1 %1692 }
 0x605   : > { %v1698_v36 = vsel %vm1208_vm1, %v1693_v34, 0 }
 0x60a   : > { %v5764_v24 = vpop.eup %5763 }
 0x60b   : > { %v5766_v27 = vpop.eup %5765  ;;  %v1587_v28 = vmul.f32 %v5764_v24, %v5758_v6 }
 0x60c   : > { %v1586_v33 = vmul.f32 %v5766_v27, %v5756_v4 }
 0x60e   : > { %v1578_v26 = vpop.xlane.xlu0 %1577  ;;  %v1590_v35 = vpack.c.bf16 %v1587_v28, %v1586_v33 }
 0x60f   : > { %5767 = vrcp.f32 %v1578_v26 }
 0x612   : > { %v1594_v31 = vpop.permute.xlu0 %1593 }
 0x613   : > { %5168 = vmatpush3.bf16.msra.mxu0 %v1594_v31 }
 0x614   : > { %5179 = vmatprep.subr.bf16.mxu0 %v6319_v18 }
 0x616   : > { %5170 = vmatmul.mubr.msk.bf16.vlgmr.msra.gmra.mxu0 %vm1303_vm2, %v1590_v35  ;;  %v1691_v37 = vpop.permute.xlu0 %1690 }
 0x617   : > { %5180 = vmatpush3.bf16.xpose.msra.mxu0 %v1698_v36  ;;  %5181 = vmatprep.mubr.msk.bf16.mxu0 %vm6320_vm0, %v6319_v18 }
 0x618   : > { %5191 = vmatprep.subr.bf16.mxu0 %v6319_v18 }
 0x61c   : > { %v5768_v39 = vpop.eup %5767 }
 0x61d   : > { %v1588_v44 = vmul.f32 %v5768_v39, %v5760_v13 }
 0x61e   : > { %5182 = vmatmul.mubr.msk.bf16.vlgmr.msra.gmra.mxu0 %vm1208_vm1, %v1691_v37 }
 0x61f   : > { %5193 = vmatprep.mubr.msk.bf16.mxu0 %vm6320_vm0, %v6319_v18 }
 0x635   : > { %v1581_v38 = vpop.xlane.xlu1 %1580 }
 0x636   : > { %5769 = vrcp.f32 %v1581_v38 }
 0x639   : > { %v1744_v46 = vpop.permute.xlu1 %1743 }
 0x63a   : > { %v1749_v48 = vsel %vm1208_vm1, %v1744_v46, 0 }
 0x63d   : > { %v1742_v49 = vpop.permute.xlu1 %1741 }
 0x643   : > { %v5770_v41 = vpop.eup %5769 }
 0x644   : > { %v1589_v45 = vmul.f32 %v5770_v41, %v5762_v19 }
 0x646   : > { %v1591_v47 = vpack.c.bf16 %v1589_v45, %v1588_v44 }
 0x648   : > { %5176 = vmatmul.mubr.msk.bf16.vlgmr.msra.gmra.mxu1 %vm1303_vm2, %v1591_v47 }
 0x649   : > { %5186 = vmatpush3.bf16.xpose.msra.mxu1 %v1749_v48  ;;  %5187 = vmatprep.mubr.msk.bf16.mxu1 %vm6320_vm0, %v6319_v18 }
 0x64a   : > { %5197 = vmatprep.subr.bf16.mxu1 %v6319_v18 }
 0x650   : > { %5188 = vmatmul.mubr.msk.bf16.vlgmr.msra.gmra.mxu1 %vm1208_vm1, %v1742_v49 }
 0x651   : > { %5199 = vmatprep.mubr.msk.bf16.mxu1 %vm6320_vm0, %v6319_v18 }
 0x6d6   : > { %v6878_v50 = vpop.f32.mrf.mxu0 }
 0x6d8   : > { %v5171_v52 = vpop.f32.mrf.mxu0 }
 0x6da   : > { %v6880_v55 = vpop.f32.mrf.mxu0 }
 0x6db   : > { %v1688_v56 = vpack.c.bf16 %v6880_v55, %v6878_v50 }
 0x6dc   : > { %v5172_v57 = vpop.f32.mrf.mxu0 }
 0x6de   : > { %v1734_v58 = vpop.f32.mrf.mxu0 }
 0x6df   : > { %v1792_v59 = vsel %vm1303_vm2, %v1734_v58, -inf }
 0x6e0   : > { %1793 = vmax.xlane.f32.xlu0 %v1792_v59  ;;  %v5183_v60 = vpop.f32.mrf.mxu0 }
 0x6e2   : > { %v1737_v61 = vpop.f32.mrf.mxu0 }
 0x6e3   : > { %v1795_v62 = vsel %vm1303_vm2, %v1737_v61, -inf }
 0x6e4   : > { %1796 = vmax.xlane.f32.xlu1 %v1795_v62  ;;  %v5184_v63 = vpop.f32.mrf.mxu0 }
 0x708   : > { %v6886_v0 = vpop.f32.mrf.mxu1 }
 0x70a   : > { %v5177_v1 = vpop.f32.mrf.mxu1 }
 0x70c   : > { %v6888_v2 = vpop.f32.mrf.mxu1 }
 0x70d   : > { %v1689_v3 = vpack.c.bf16 %v6888_v2, %v6886_v0 }
 0x70e   : > { %v5178_v4 = vpop.f32.mrf.mxu1 }
 0x710   : > { %v1785_v5 = vpop.f32.mrf.mxu1 }
 0x711   : > { %v1798_v6 = vsel %vm1303_vm2, %v1785_v5, -inf }
 0x712   : > { %1799 = vmax.xlane.f32.xlu0 %v1798_v6  ;;  %v5189_v8 = vpop.f32.mrf.mxu1 }
 0x714   : > { %v1788_v10 = vpop.f32.mrf.mxu1 }
 0x715   : > { %v1801_v11 = vsel %vm1303_vm2, %v1788_v10, -inf }
 0x716   : > { %1802 = vmax.xlane.f32.xlu0 %v1801_v11  ;;  %v5190_v12 = vpop.f32.mrf.mxu1 }
 0x769   : > { %v1794_v13 = vpop.xlane.xlu0 %1793 }
 0x76a   : > { %v1804_v14 = vsub.f32 %v1734_v58, %v1794_v13 }
 0x76c   : > { %v1808_v15 = vmul.f32 1.442695, %v1804_v14 }
 0x76d   : > { %v1797_v16 = vpop.xlane.xlu1 %1796 }
 0x76e   : > { %5771 = vpow2.f32 %v1808_v15  ;;  %v1805_v17 = vsub.f32 %v1737_v61, %v1797_v16 }
 0x770   : > { %v1810_v19 = vmul.f32 1.442695, %v1805_v17 }
 0x772   : > { %5773 = vpow2.f32 %v1810_v19 }
 0x77b   : > { %v5772_v20 = vpop.eup %5771 }
 0x77c   : > { %v1816_v21 = vsel %vm1303_vm2, %v5772_v20, 0.0 }
 0x77d   : > { %1817 = vadd.xlane.f32.xlu0 %v1816_v21 }
 0x77f   : > { %v5774_v22 = vpop.eup %5773 }
 0x780   : > { %v1819_v23 = vsel %vm1303_vm2, %v5774_v22, 0.0 }
 0x781   : > { %1820 = vadd.xlane.f32.xlu1 %v1819_v23 }
 0x792   : > { %1885 = vrot.lane.b32.xlu1 %v6797_v7, %s6322_s2 }
 0x796   : > { %1936 = vrot.lane.b32.xlu1 %v6763_v25, %s6323_s28 }
 0x79b   : > { %v1800_v24 = vpop.xlane.xlu0 %1799 }
 0x79c   : > { %v1806_v26 = vsub.f32 %v1785_v5, %v1800_v24 }
 0x79e   : > { %v1812_v27 = vmul.f32 1.442695, %v1806_v26 }
 0x79f   : > { %v1803_v28 = vpop.xlane.xlu0 %1802 }
 0x7a0   : > { %5775 = vpow2.f32 %v1812_v27  ;;  %v1807_v31 = vsub.f32 %v1788_v10, %v1803_v28 }
 0x7a2   : > { %v1814_v33 = vmul.f32 1.442695, %v1807_v31 }
 0x7a4   : > { %5777 = vpow2.f32 %v1814_v33 }
 0x7ad   : > { %v5776_v34 = vpop.eup %5775 }
 0x7ae   : > { %v1822_v35 = vsel %vm1303_vm2, %v5776_v34, 0.0 }
 0x7af   : > { %1823 = vadd.xlane.f32.xlu0 %v1822_v35 }
 0x7b1   : > { %v5778_v36 = vpop.eup %5777 }
 0x7b2   : > { %v1825_v37 = vsel %vm1303_vm2, %v5778_v36, 0.0 }
 0x7ba   : > { %1826 = vadd.xlane.f32.xlu1 %v1825_v37 }
 0x7c5   : > { %1838 = vrot.lane.b32.xlu0 %v6799_v9, %s6322_s2 }
 0x7c9   : > { %1934 = vrot.lane.b32.xlu0 %v6770_v30, %s6323_s28 }
 0x7cb   : > { %1987 = vrot.lane.b32.xlu1 %v6768_v29, %s6323_s28 }
 0x7cf   : > { %1985 = vrot.lane.b32.xlu1 %v6779_v32, %s6323_s28 }
 0x806   : > { %v1818_v39 = vpop.xlane.xlu0 %1817 }
 0x80a   : > { %v1821_v25 = vpop.xlane.xlu1 %1820 }
 0x80b   : > { %5779 = vrcp.f32 %v1821_v25 }
 0x80c   : > { %5781 = vrcp.f32 %v1818_v39 }
 0x80e   : > { %v1886_v38 = vpop.permute.xlu1 %1885 }
 0x80f   : > { %5198 = vmatpush3.bf16.msra.mxu1 %v1886_v38 }
 0x810   : > { %5209 = vmatprep.subr.bf16.mxu1 %v6319_v18 }
 0x812   : > { %v1937_v48 = vpop.permute.xlu1 %1936 }
 0x813   : > { %v1942_v32 = vsel %vm1208_vm1, %v1937_v48, 0 }
 0x818   : > { %v5780_v41 = vpop.eup %5779 }
 0x819   : > { %v5782_v45 = vpop.eup %5781  ;;  %v1833_v46 = vmul.f32 %v5780_v41, %v5774_v22 }
 0x81a   : > { %v1832_v30 = vmul.f32 %v5782_v45, %v5772_v20 }
 0x81c   : > { %v1836_v29 = vpack.c.bf16 %v1833_v46, %v1832_v30 }
 0x838   : > { %v1824_v44 = vpop.xlane.xlu0 %1823 }
 0x839   : > { %5783 = vrcp.f32 %v1824_v44 }
 0x83c   : > { %v1839_v47 = vpop.permute.xlu0 %1838 }
 0x83d   : > { %5192 = vmatpush3.bf16.msra.mxu0 %v1839_v47 }
 0x83e   : > { %5203 = vmatprep.subr.bf16.mxu0 %v6319_v18 }
 0x840   : > { %5194 = vmatmul.mubr.msk.bf16.vlgmr.msra.gmra.mxu0 %vm1303_vm2, %v1836_v29  ;;  %v1935_v52 = vpop.permute.xlu0 %1934 }
 0x841   : > { %5204 = vmatpush3.bf16.xpose.msra.mxu0 %v1942_v32  ;;  %5205 = vmatprep.mubr.msk.bf16.mxu0 %vm6320_vm0, %v6319_v18 }
 0x842   : > { %5215 = vmatprep.subr.bf16.mxu0 %v6319_v18 }
 0x843   : > { %v1827_v49 = vpop.xlane.xlu1 %1826 }
 0x844   : > { %5785 = vrcp.f32 %v1827_v49 }
 0x846   : > { %v5784_v57 = vpop.eup %5783 }
 0x847   : > { %v1834_v59 = vmul.f32 %v5784_v57, %v5776_v34  ;;  %v1988_v61 = vpop.permute.xlu1 %1987 }
 0x848   : > { %5206 = vmatmul.mubr.msk.bf16.vlgmr.msra.gmra.mxu0 %vm1208_vm1, %v1935_v52  ;;  %v1993_v63 = vsel %vm1208_vm1, %v1988_v61, 0 }
 0x849   : > { %5217 = vmatprep.mubr.msk.bf16.mxu0 %vm6320_vm0, %v6319_v18 }
 0x84b   : > { %v1986_v1 = vpop.permute.xlu1 %1985 }
 0x851   : > { %v5786_v58 = vpop.eup %5785 }
 0x852   : > { %v1835_v60 = vmul.f32 %v5786_v58, %v5778_v36 }
 0x854   : > { %v1837_v62 = vpack.c.bf16 %v1835_v60, %v1834_v59 }
 0x856   : > { %5200 = vmatmul.mubr.msk.bf16.vlgmr.msra.gmra.mxu1 %vm1303_vm2, %v1837_v62 }
 0x857   : > { %5210 = vmatpush3.bf16.xpose.msra.mxu1 %v1993_v63  ;;  %5211 = vmatprep.mubr.msk.bf16.mxu1 %vm6320_vm0, %v6319_v18 }
 0x858   : > { %5221 = vmatprep.subr.bf16.mxu1 %v6319_v18 }
 0x85e   : > { %5212 = vmatmul.mubr.msk.bf16.vlgmr.msra.gmra.mxu1 %vm1208_vm1, %v1986_v1 }
 0x85f   : > { %5223 = vmatprep.mubr.msk.bf16.mxu1 %vm6320_vm0, %v6319_v18 }
 0x900   : > { %v1878_v4 = vpop.f32.mrf.mxu0 }
 0x902   : > { %v5195_v5 = vpop.f32.mrf.mxu0 }
 0x903   : > { %v5653_v5 = vld [vmem:[#allocation11 + $0x38] sm:$0xff]  }
 0x904   : > { %v1881_v6 = vpop.f32.mrf.mxu0 }
 0x905   : > { %v1932_v8 = vpack.c.bf16 %v1881_v6, %v1878_v4  ;;  %v5654_v6 = vld [vmem:[#allocation11 + $0x30] sm:$0xff]  }
 0x906   : > { %v5196_v10 = vpop.f32.mrf.mxu0 }
 0x907   : > { %v5656_v10 = vld [vmem:[#allocation11 + $0x20] sm:$0xff]  }
 0x908   : > { %v1978_v11 = vpop.f32.mrf.mxu0 }
 0x909   : > { %v2036_v12 = vsel %vm1303_vm2, %v1978_v11, -inf }
 0x90a   : > { %2037 = vmax.xlane.f32.xlu0 %v2036_v12  ;;  %v5207_v13 = vpop.f32.mrf.mxu0  ;;  %v5658_v12 = vld [vmem:[#allocation11 + $0x10] sm:$0xff]  }
 0x90b   : > { %v5659_v13 = vld [vmem:[#allocation11 + $0x8] sm:$0xff]  }
 0x90c   : > { %v1981_v14 = vpop.f32.mrf.mxu0 }
 0x90d   : > { %v2039_v15 = vsel %vm1303_vm2, %v1981_v14, -inf }
 0x90e   : > { %2040 = vmax.xlane.f32.xlu1 %v2039_v15  ;;  %v5208_v16 = vpop.f32.mrf.mxu0  ;;  %v5660_v15 = vld [vmem:[#allocation11] sm:$0xff]  }
 0x916   : > { %v1925_v17 = vpop.f32.mrf.mxu1 }
 0x918   : > { %v5201_v19 = vpop.f32.mrf.mxu1 }
 0x91a   : > { %v1928_v20 = vpop.f32.mrf.mxu1 }
 0x91b   : > { %v1933_v21 = vpack.c.bf16 %v1928_v20, %v1925_v17 }
 0x91c   : > { %v5202_v22 = vpop.f32.mrf.mxu1 }
 0x91e   : > { %v2029_v23 = vpop.f32.mrf.mxu1 }
 0x91f   : > { %v2042_v24 = vsel %vm1303_vm2, %v2029_v23, -inf }
 0x920   : > { %2043 = vmax.xlane.f32.xlu0 %v2042_v24  ;;  %v5213_v26 = vpop.f32.mrf.mxu1 }
 0x922   : > { %v2032_v27 = vpop.f32.mrf.mxu1 }
 0x923   : > { %v2045_v28 = vsel %vm1303_vm2, %v2032_v27, -inf }
 0x924   : > { %2046 = vmax.xlane.f32.xlu0 %v2045_v28  ;;  %v5214_v31 = vpop.f32.mrf.mxu1 }
 0x993   : > { %v2038_v33 = vpop.xlane.xlu0 %2037 }
 0x994   : > { %v2048_v34 = vsub.f32 %v1978_v11, %v2038_v33  ;;  %v5657_v11 = vld [vmem:[#allocation11 + $0x18] sm:$0xff]  }
 0x996   : > { %v2052_v35 = vmul.f32 1.442695, %v2048_v34 }
 0x997   : > { %v2041_v36 = vpop.xlane.xlu1 %2040 }
 0x998   : > { %5787 = vpow2.f32 %v2052_v35  ;;  %v2049_v37 = vsub.f32 %v1981_v14, %v2041_v36 }
 0x99a   : > { %v2054_v25 = vmul.f32 1.442695, %v2049_v37 }
 0x99c   : > { %5789 = vpow2.f32 %v2054_v25 }
 0x9a5   : > { %v5788_v38 = vpop.eup %5787 }
 0x9a6   : > { %v2060_v39 = vsel %vm1303_vm2, %v5788_v38, 0.0 }
 0x9a7   : > { %2061 = vadd.xlane.f32.xlu0 %v2060_v39 }
 0x9a9   : > { %v5790_v41 = vpop.eup %5789  ;;  %v2044_v44 = vpop.xlane.xlu0 %2043 }
 0x9aa   : > { %v2050_v45 = vsub.f32 %v2029_v23, %v2044_v44  ;;  %v2063_v46 = vsel %vm1303_vm2, %v5790_v41, 0.0 }
 0x9ab   : > { %2064 = vadd.xlane.f32.xlu1 %v2063_v46 }
 0x9ac   : > { %v2056_v47 = vmul.f32 1.442695, %v2050_v45  ;;  %v5892_v45 = vld [vmem:[%s6718_s12 + $0x8] sm:$0xff]  }
 0x9ad   : > { %v2047_v30 = vpop.xlane.xlu0 %2046  ;;  %v2329_v46 = vunpack.c.l.bf16 %v5892_v45  ;;  %v2330_v53 = vunpack.c.h.bf16 %v5892_v45 }
 0x9ae   : > { %5791 = vpow2.f32 %v2056_v47  ;;  %v2051_v48 = vsub.f32 %v2032_v27, %v2047_v30 }
 0x9b0   : > { %v2058_v29 = vmul.f32 1.442695, %v2051_v48 }
 0x9b2   : > { %5793 = vpow2.f32 %v2058_v29 }
 0x9bb   : > { %v5792_v32 = vpop.eup %5791 }
 0x9bc   : > { %v2066_v49 = vsel %vm1303_vm2, %v5792_v32, 0.0 }
 0x9bd   : > { %2067 = vadd.xlane.f32.xlu0 %v2066_v49  ;;  %v5661_v49 = vld [vmem:[#allocation14 + $0x38] sm:$0xff]  }
 0x9bf   : > { %v5794_v52 = vpop.eup %5793 }
 0x9c0   : > { %v2069_v57 = vsel %vm1303_vm2, %v5794_v52, 0.0 }
 0x9c1   : > { %2070 = vadd.xlane.f32.xlu1 %v2069_v57  ;;  %v5663_v57 = vld [vmem:[#allocation14 + $0x28] sm:$0xff]  }
 0x9d2   : > { %2129 = vrot.lane.b32.xlu1 %v6797_v7, %s6323_s28 }
 0x9d3   : > { %2082 = vrot.lane.b32.xlu0 %v6799_v9, %s6323_s28 }
 0x9d6   : > { %2180 = vrot.lane.b32.xlu1 %v1688_v56, %s6323_s28 }
 0x9d7   : > { %2186 = vrot.lane.b32.xlu0 %v1932_v8, %s6322_s2  ;;  %v5655_v8 = vld [vmem:[#allocation11 + $0x28] sm:$0xff]  }
 0x9da   : > { %2182 = vrot.lane.b32.xlu1 %v1689_v3, %s6323_s28 }
 0x9de   : > { %2188 = vrot.lane.b32.xlu1 %v1933_v21, %s6322_s2 }
 0xa30   : > { %v2062_v59 = vpop.xlane.xlu0 %2061 }
 0xa34   : > { %v2065_v58 = vpop.xlane.xlu1 %2064 }
 0xa35   : > { %5795 = vrcp.f32 %v2065_v58  ;;  %v5664_v58 = vld [vmem:[#allocation14 + $0x20] sm:$0xff]  }
 0xa36   : > { %5797 = vrcp.f32 %v2062_v59  ;;  %v5665_v59 = vld [vmem:[#allocation14 + $0x18] sm:$0xff]  }
 0xa42   : > { %v5796_v7 = vpop.eup %5795 }
 0xa43   : > { %v5798_v60 = vpop.eup %5797  ;;  %v2077_v61 = vmul.f32 %v5796_v7, %v5790_v41  ;;  %v5666_v7 = vld [vmem:[#allocation14 + $0x10] sm:$0xff]  }
 0xa44   : > { %v2076_v56 = vmul.f32 %v5798_v60, %v5788_v38  ;;  %v5891_v38 = vld [vmem:[%s6718_s12] sm:$0xff]   ;;  %s6215_s12 = scalar_lea.vmem %s6214_s7, 1024 }
 0xa45   : > { %v2327_v39 = vunpack.c.l.bf16 %v5891_v38  ;;  %v2328_v30 = vunpack.c.h.bf16 %v5891_v38  ;;  %v5668_v60 = vld [vmem:[#allocation14] sm:$0xff]   ;;  %p6217_p2 = scmp.lt.s32.totalorder %s6215_s12, %s6209_s29 }
 0xa46   : > { %v2068_v9 = vpop.xlane.xlu0 %2067  ;;  %v2080_v62 = vpack.c.bf16 %v2077_v61, %v2076_v56 }
 0xa47   : > { %5799 = vrcp.f32 %v2068_v9  ;;  %v5667_v9 = vld [vmem:[#allocation14 + $0x8] sm:$0xff]   ;;  %p6218_p9 = por %p6217_p2, %p6216_p6 }
 0xa49   : > { %p6219_p11 = pnand %p6218_p9, %p6212_p7 }
 0xa4a   : > { %v2071_v50 = vpop.xlane.xlu1 %2070  ;;  %v2083_v55 = vpop.permute.xlu0 %2082 }
 0xa4b   : > { %5801 = vrcp.f32 %v2071_v50  ;;  %5216 = vmatpush3.bf16.msra.mxu0 %v2083_v55 }
 0xa4c   : > { %5227 = vmatprep.subr.bf16.mxu0 %v5653_v5 }
 0xa4e   : > { %v2130_v63 = vpop.permute.xlu1 %2129  ;;  %5218 = vmatmul.mubr.msk.bf16.vlgmr.msra.gmra.mxu0 %vm1303_vm2, %v2080_v62  ;;  %v2187_v28 = vpop.permute.xlu0 %2186 }
 0xa4f   : > { %5222 = vmatpush3.bf16.msra.mxu1 %v2130_v63  ;;  %5228 = vmatpush3.bf16.msra.mxu0 %v5653_v5 }
 0xa50   : > { %5229 = vmatprep.subr.bf16.mxu0 %v5654_v6 }
 0xa52   : > { %v2181_v27 = vpop.permute.xlu1 %2180 }
 0xa53   : > { %5230 = vmatpush3.bf16.msra.mxu0 %v5654_v6  ;;  %v2198_v31 = vsel %vm1208_vm1, %v1438_v43, %v2181_v27 }
 0xa54   : > { %v5800_v0 = vpop.eup %5799  ;;  %5231 = vmatprep.subr.bf16.mxu0 %v5655_v8  ;;  %v2204_v34 = vsel %vm2202_vm3, %v2198_v31, %v2187_v28 }
 0xa55   : > { %v2078_v3 = vmul.f32 %v5800_v0, %v5792_v32 }
 0xa56   : > { %v2183_v36 = vpop.permute.xlu1 %2182 }
 0xa57   : > { %5232 = vmatpush3.bf16.msra.mxu0 %v5655_v8  ;;  %v2201_v25 = vsel %vm1208_vm1, %v1439_v54, %v2183_v36 }
 0xa58   : > { %v5802_v2 = vpop.eup %5801  ;;  %5233 = vmatprep.subr.bf16.mxu0 %v5656_v10 }
 0xa59   : > { %v2079_v1 = vmul.f32 %v5802_v2, %v5794_v52  ;;  %v5662_v52 = vld [vmem:[#allocation14 + $0x30] sm:$0xff]  }
 0xa5a   : > { %v2189_v37 = vpop.permute.xlu1 %2188 }
 0xa5b   : > { %v2081_v4 = vpack.c.bf16 %v2079_v1, %v2078_v3  ;;  %5234 = vmatpush3.bf16.msra.mxu0 %v5656_v10  ;;  %v2206_v40 = vsel %vm2202_vm3, %v2201_v25, %v2189_v37 }
 0xa5c   : > { %5235 = vmatprep.subr.bf16.mxu0 %v5657_v11 }
 0xa5d   : > { %5224 = vmatmul.mubr.msk.bf16.vlgmr.msra.gmra.mxu1 %vm1303_vm2, %v2081_v4 }
 0xa5f   : > { %5236 = vmatpush3.bf16.msra.mxu0 %v5657_v11 }
 0xa60   : > { %5237 = vmatprep.subr.bf16.mxu0 %v5658_v12 }
 0xa63   : > { %5238 = vmatpush3.bf16.msra.mxu0 %v5658_v12  ;;  %v6986_v12 = vld [vmem:[%s6728_s19] sm:$0xff]  }
 0xa64   : > { %5239 = vmatprep.subr.bf16.mxu0 %v5659_v13 }
 0xa67   : > { %5240 = vmatpush3.bf16.msra.mxu0 %v5659_v13  ;;  %v6989_v13 = vld [vmem:[%s6728_s19 + $0x8] sm:$0xff]  }
 0xa68   : > { %5241 = vmatprep.subr.bf16.mxu0 %v5660_v15 }
 0xa6b   : > { %5242 = vmatpush3.bf16.msra.mxu0 %v5660_v15  ;;  %v6994_v15 = vld [vmem:[%s6728_s19 + $0x10] sm:$0xff]  }
 0xa6c   : > { %5267 = vmatprep.subr.bf16.mxu0 %v5661_v49 }
 0xb0e   : > { %v2122_v14 = vpop.f32.mrf.mxu0 }
 0xb10   : > { %v5219_v16 = vpop.f32.mrf.mxu0 }
 0xb11   : > { %v5672_v16 = vld [vmem:[#allocation13 + $0x30] sm:$0xff]  }
 0xb12   : > { %v2125_v17 = vpop.f32.mrf.mxu0 }
 0xb13   : > { %v2176_v19 = vpack.c.bf16 %v2125_v17, %v2122_v14  ;;  %v5670_v14 = vld [vmem:[#allocation13 + $0x38] sm:$0xff]  }
 0xb14   : > { %v5220_v20 = vpop.f32.mrf.mxu0  ;;  %5247 = vmatprep.subr.bf16.mxu1 %v5670_v14  ;;  %v6997_v17 = vld [vmem:[%s6728_s19 + $0x18] sm:$0xff]  }
 0xb15   : > { %2192 = vrot.lane.b32.xlu0 %v2176_v19, %s6321_s30  ;;  %5248 = vmatpush3.bf16.msra.mxu1 %v5670_v14  ;;  %v5674_v19 = vld [vmem:[#allocation13 + $0x28] sm:$0xff]   ;;  %v5676_v20 = vld [vmem:[#allocation13 + $0x20] sm:$0xff]  }
 0xb16   : > { %5249 = vmatprep.subr.bf16.mxu1 %v5672_v16 }
 0xb19   : > { %5250 = vmatpush3.bf16.msra.mxu1 %v5672_v16 }
 0xb1a   : > { %5251 = vmatprep.subr.bf16.mxu1 %v5674_v19 }
 0xb1d   : > { %v2169_v21 = vpop.f32.mrf.mxu1  ;;  %5252 = vmatpush3.bf16.msra.mxu1 %v5674_v19 }
 0xb1e   : > { %5253 = vmatprep.subr.bf16.mxu1 %v5676_v20 }
 0xb1f   : > { %v5225_v22 = vpop.f32.mrf.mxu1 }
 0xb20   : > { %v5678_v22 = vld [vmem:[#allocation13 + $0x10] sm:$0xff]  }
 0xb21   : > { %v2172_v23 = vpop.f32.mrf.mxu1  ;;  %5254 = vmatpush3.bf16.msra.mxu1 %v5676_v20 }
 0xb22   : > { %v2177_v24 = vpack.c.bf16 %v2172_v23, %v2169_v21  ;;  %v5677_v21 = vld [vmem:[#allocation13 + $0x18] sm:$0xff]   ;;  %v5679_v23 = vld [vmem:[#allocation13 + $0x8] sm:$0xff]  }
 0xb23   : > { %v5226_v26 = vpop.f32.mrf.mxu1  ;;  %5255 = vmatprep.subr.bf16.mxu1 %v5677_v21 }
 0xb24   : > { %2194 = vrot.lane.b32.xlu1 %v2177_v24, %s6321_s30  ;;  %v5680_v24 = vld [vmem:[#allocation13] sm:$0xff]   ;;  %v5681_v26 = vld [vmem:[#allocation16 + $0x38] sm:$0xff]  }
 0xb25   : > { %5256 = vmatpush3.bf16.msra.mxu1 %v5677_v21 }
 0xb26   : > { %5257 = vmatprep.subr.bf16.mxu1 %v5678_v22 }
 0xb29   : > { %5258 = vmatpush3.bf16.msra.mxu1 %v5678_v22 }
 0xb2a   : > { %5259 = vmatprep.subr.bf16.mxu1 %v5679_v23 }
 0xb2d   : > { %5260 = vmatpush3.bf16.msra.mxu1 %v5679_v23 }
 0xb2e   : > { %5261 = vmatprep.subr.bf16.mxu1 %v5680_v24 }
 0xb31   : > { %5262 = vmatpush3.bf16.msra.mxu1 %v5680_v24 }
 0xb32   : > { %5291 = vmatprep.subr.bf16.mxu1 %v5681_v26 }
 0xb87   : > { %v2193_v33 = vpop.permute.xlu0 %2192 }
 0xb88   : > { %v2209_v35 = vsel %vm2207_vm4, %v2204_v34, %v2193_v33 }
 0xb89   : > { %5243 = vmatprep.mubr.bf16.mxu0 %v2209_v35 }
 0xb96   : > { %v2195_v42 = vpop.permute.xlu1 %2194 }
 0xb97   : > { %v2212_v43 = vsel %vm2207_vm4, %v2206_v40, %v2195_v42 }
 0xb98   : > { %5244 = vmatmul.mubr.bf16.vlgmr.msra.gmra.mxu0 %v2212_v43 }
 0xb99   : > { %5268 = vmatpush3.bf16.msra.mxu0 %v5661_v49  ;;  %5283 = vmatprep.mubr.bf16.mxu0 %v6986_v12 }
 0xb9a   : > { %5269 = vmatprep.subr.bf16.mxu0 %v5662_v52 }
 0xb9d   : > { %5270 = vmatpush3.bf16.msra.mxu0 %v5662_v52 }
 0xb9e   : > { %5271 = vmatprep.subr.bf16.mxu0 %v5663_v57 }
 0xba1   : > { %5272 = vmatpush3.bf16.msra.mxu0 %v5663_v57 }
 0xba2   : > { %5273 = vmatprep.subr.bf16.mxu0 %v5664_v58 }
 0xba5   : > { %5274 = vmatpush3.bf16.msra.mxu0 %v5664_v58 }
 0xba6   : > { %5275 = vmatprep.subr.bf16.mxu0 %v5665_v59 }
 0xba9   : > { %5276 = vmatpush3.bf16.msra.mxu0 %v5665_v59 }
 0xbaa   : > { %5277 = vmatprep.subr.bf16.mxu0 %v5666_v7 }
 0xbad   : > { %5278 = vmatpush3.bf16.msra.mxu0 %v5666_v7 }
 0xbae   : > { %5279 = vmatprep.subr.bf16.mxu0 %v5667_v9 }
 0xbb1   : > { %5280 = vmatpush3.bf16.msra.mxu0 %v5667_v9  ;;  %v5682_v9 = vld [vmem:[#allocation16 + $0x30] sm:$0xff]  }
 0xbb2   : > { %5281 = vmatprep.subr.bf16.mxu0 %v5668_v60 }
 0xbb5   : > { %5282 = vmatpush3.bf16.msra.mxu0 %v5668_v60  ;;  %v5683_v60 = vld [vmem:[#allocation16 + $0x28] sm:$0xff]  }
 0xbb6   : > { %5315 = vmatprep.subr.bf16.mxu0 %v6319_v18 }
 0xbb8   : > { %5284 = vmatmul.mubr.bf16.vlgmr.msra.gmra.mxu0 %v6989_v13 }
 0xbb9   : > { %5287 = vmatprep.mubr.bf16.mxu0 %v6994_v15 }
 0xbc0   : > { %5288 = vmatmul.mubr.bf16.gmra.mxu0 %v6997_v17 }
 0xbc1   : > { %5319 = vmatprep.mubr.msk.bf16.mxu0 %vm6320_vm0, %v6319_v18 }
 0xc58   : > { %v5245_v41 = vpop.f32.mrf.mxu0 }
 0xc59   : > { %v2333_v51 = vadd.f32 %v5245_v41, %v2329_v46  ;;  %v4776_v41 = vld [vmem:[%s7425_s14] ss:$0 sm:$0xff] }
 0xc5a   : > { %v2312_v44 = vpop.f32.mrf.mxu0 }
 0xc5b   : > { %v2331_v47 = vadd.f32 %v2327_v39, %v2312_v44 }
 0xc5c   : > { %v5246_v48 = vpop.f32.mrf.mxu0 }
 0xc5d   : > { %2337 = vadd.xlane.f32.xlu0 %v2331_v47  ;;  %v2334_v32 = vadd.f32 %v5246_v48, %v2330_v53  ;;  %v4777_v48 = vld [vmem:[%s7426_s15] ss:$0 sm:$0xff] }
 0xc5e   : > { %v2315_v29 = vpop.f32.mrf.mxu0 }
 0xc5f   : > { %v2332_v54 = vadd.f32 %v2328_v30, %v2315_v29 }
 0xc61   : > { %2341 = vadd.xlane.f32.xlu0 %v2333_v51  ;;  %2339 = vadd.xlane.f32.xlu1 %v2332_v54 }
 0xc65   : > { %2343 = vadd.xlane.f32.xlu0 %v2334_v32 }
 0xce6   : > { %v2338_v61 = vpop.xlane.xlu0 %2337 }
 0xce7   : > { %v2346_v50 = vmul.f32 0.0078125, %v2338_v61  ;;  %v5684_v61 = vld [vmem:[#allocation16 + $0x20] sm:$0xff]  }
 0xce9   : > { %v6969_v55 = vsub.f32 %v2331_v47, %v2346_v50  ;;  %v5685_v50 = vld [vmem:[#allocation16 + $0x18] sm:$0xff]  }
 0xcea   : > { %v2342_v56 = vpop.xlane.xlu0 %2341  ;;  %v2340_v62 = vpop.xlane.xlu1 %2339 }
 0xceb   : > { %v2348_v63 = vmul.f32 0.0078125, %v2342_v56  ;;  %v2347_v0 = vmul.f32 0.0078125, %v2340_v62  ;;  %v2354_v2 = vmul.f32 %v6969_v55, %v6969_v55  ;;  %v5687_v56 = vld [vmem:[#allocation16 + $0x8] sm:$0xff]   ;;  %v5688_v62 = vld [vmem:[#allocation16] sm:$0xff]  }
 0xced   : > { %v6973_v3 = vsub.f32 %v2333_v51, %v2348_v63  ;;  %v6975_v1 = vsub.f32 %v2332_v54, %v2347_v0  ;;  %2358 = vadd.xlane.f32.xlu0 %v2354_v2  ;;  %v5285_v63 = vpop.f32.mrf.mxu0 }
 0xcee   : > { %v2344_v4 = vpop.xlane.xlu0 %2343 }
 0xcef   : > { %v2349_v5 = vmul.f32 0.0078125, %v2344_v4  ;;  %v2356_v6 = vmul.f32 %v6973_v3, %v6973_v3  ;;  %v2355_v8 = vmul.f32 %v6975_v1, %v6975_v1  ;;  %v2639_v0 = vpop.f32.mrf.mxu0 }
 0xcf1   : > { %v6981_v10 = vsub.f32 %v2334_v32, %v2349_v5  ;;  %2362 = vadd.xlane.f32.xlu0 %v2356_v6  ;;  %2360 = vadd.xlane.f32.xlu1 %v2355_v8  ;;  %v5286_v2 = vpop.f32.mrf.mxu0 }
 0xcf3   : > { %v2357_v11 = vmul.f32 %v6981_v10, %v6981_v10 }
 0xcf5   : > { %2364 = vadd.xlane.f32.xlu1 %v2357_v11 }
 0xd76   : > { %v2359_v27 = vpop.xlane.xlu0 %2358 }
 0xd77   : > { %v2366_v28 = vmul.f32 0.0078125, %v2359_v27 }
 0xd79   : > { %v2370_v31 = vadd.f32 1e-05, %v2366_v28 }
 0xd7a   : > { %v2363_v33 = vpop.xlane.xlu0 %2362  ;;  %v2361_v34 = vpop.xlane.xlu1 %2360 }
 0xd7b   : > { %5803 = vrsqrt.f32 %v2370_v31  ;;  %v2368_v35 = vmul.f32 0.0078125, %v2363_v33  ;;  %v2367_v36 = vmul.f32 0.0078125, %v2361_v34 }
 0xd7d   : > { %v2372_v37 = vadd.f32 1e-05, %v2368_v35  ;;  %v2371_v25 = vadd.f32 1e-05, %v2367_v36 }
 0xd7e   : > { %v2365_v40 = vpop.xlane.xlu1 %2364 }
 0xd7f   : > { %5805 = vrsqrt.f32 %v2372_v37  ;;  %v2369_v42 = vmul.f32 0.0078125, %v2365_v40 }
 0xd80   : > { %5807 = vrsqrt.f32 %v2371_v25 }
 0xd81   : > { %v2373_v43 = vadd.f32 1e-05, %v2369_v42 }
 0xd83   : > { %5809 = vrsqrt.f32 %v2373_v43 }
 0xd88   : > { %v5804_v38 = vpop.eup %5803 }
 0xd89   : > { %v2378_v39 = vmul.f32 %v5804_v38, %v6969_v55  ;;  %v5686_v55 = vld [vmem:[#allocation16 + $0x10] sm:$0xff]  }
 0xd8b   : > { %v2388_v30 = vmul.f32 %v4776_v41, %v2378_v39 }
 0xd8c   : > { %v5806_v44 = vpop.eup %5805 }
 0xd8d   : > { %v5808_v45 = vpop.eup %5807  ;;  %v2380_v46 = vmul.f32 %v5806_v44, %v6973_v3  ;;  %v7013_v32 = vadd.f32 %v4777_v48, %v2388_v30  ;;  %v7029_v3 = vpack.c.bf16 %v5286_v2, %v5285_v63 }
 0xd8e   : > { %v2379_v47 = vmul.f32 %v5808_v45, %v6975_v1  ;;  %v2642_v1 = vpop.f32.mrf.mxu0 }
 0xd8f   : > { %v2390_v54 = vmul.f32 %v4776_v41, %v2380_v46  ;;  %v2816_v4 = vsel %vm1208_vm1, %v7029_v3, 0  ;;  %v7033_v6 = vpack.c.bf16 %v2642_v1, %v2639_v0 }
 0xd90   : > { %v5810_v29 = vpop.eup %5809  ;;  %v2389_v51 = vmul.f32 %v4776_v41, %v2379_v47  ;;  %v5289_v5 = vpop.f32.mrf.mxu0  ;;  %5316 = vmatpush3.bf16.xpose.msra.mxu0 %v2816_v4 }
 0xd91   : > { %v2381_v53 = vmul.f32 %v5810_v29, %v6981_v10  ;;  %v7019_v58 = vadd.f32 %v4777_v48, %v2390_v54  ;;  %5317 = vmatprep.subr.bf16.mxu0 %v6319_v18 }
 0xd92   : > { %v7015_v49 = vadd.f32 %v4777_v48, %v2389_v51  ;;  %v2655_v8 = vpop.f32.mrf.mxu0 }
 0xd93   : > { %v2391_v52 = vmul.f32 %v4776_v41, %v2381_v53 }
 0xd94   : > { %v2402_v57 = vpack.c.bf16 %v7015_v49, %v7013_v32  ;;  %v5290_v10 = vpop.f32.mrf.mxu0 }
 0xd95   : > { %v7021_v59 = vadd.f32 %v4777_v48, %v2391_v52  ;;  %v7039_v11 = vpack.c.bf16 %v5290_v10, %v5289_v5 }
 0xd96   : > { %5263 = vmatprep.mubr.bf16.mxu1 %v2402_v57 }
 0xd97   : > { %v2403_v7 = vpack.c.bf16 %v7021_v59, %v7019_v58  ;;  %v2866_v14 = vsel %vm1208_vm1, %v7039_v11, 0 }
 0xd99   : > { %5264 = vmatmul.mubr.bf16.vlgmr.msra.gmra.mxu1 %v2403_v7 }
 0xd9a   : > { %5292 = vmatpush3.bf16.msra.mxu1 %v5681_v26  ;;  %5307 = vmatprep.mubr.bf16.mxu1 %v6986_v12  ;;  %v2813_v12 = vsel %vm1208_vm1, %v7033_v6, 0 }
 0xd9b   : > { %5293 = vmatprep.subr.bf16.mxu1 %v5682_v9  ;;  %5318 = vmatpush3.bf16.xpose.msra.mxu0 %v2813_v12 }
 0xd9c   : > { %5331 = vmatprep.subr.bf16.mxu0 %v6319_v18 }
 0xd9e   : > { %5294 = vmatpush3.bf16.msra.mxu1 %v5682_v9 }
 0xd9f   : > { %5295 = vmatprep.subr.bf16.mxu1 %v5683_v60 }
 0xda2   : > { %5296 = vmatpush3.bf16.msra.mxu1 %v5683_v60 }
 0xda3   : > { %5297 = vmatprep.subr.bf16.mxu1 %v5684_v61 }
 0xda6   : > { %5298 = vmatpush3.bf16.msra.mxu1 %v5684_v61 }
 0xda7   : > { %5299 = vmatprep.subr.bf16.mxu1 %v5685_v50 }
 0xdaa   : > { %5300 = vmatpush3.bf16.msra.mxu1 %v5685_v50 }
 0xdab   : > { %5301 = vmatprep.subr.bf16.mxu1 %v5686_v55 }
 0xdae   : > { %5302 = vmatpush3.bf16.msra.mxu1 %v5686_v55 }
 0xdaf   : > { %5303 = vmatprep.subr.bf16.mxu1 %v5687_v56 }
 0xdb2   : > { %5304 = vmatpush3.bf16.msra.mxu1 %v5687_v56 }
 0xdb3   : > { %5305 = vmatprep.subr.bf16.mxu1 %v5688_v62 }
 0xdb6   : > { %5306 = vmatpush3.bf16.msra.mxu1 %v5688_v62 }
 0xdb7   : > { %5323 = vmatprep.subr.bf16.mxu1 %v6319_v18 }
 0xdb9   : > { %5308 = vmatmul.mubr.bf16.vlgmr.msra.gmra.mxu1 %v6989_v13  ;;  %v2658_v13 = vpop.f32.mrf.mxu0 }
 0xdba   : > { %5311 = vmatprep.mubr.bf16.mxu1 %v6994_v15  ;;  %5324 = vmatpush3.bf16.xpose.msra.mxu1 %v2866_v14  ;;  %v7045_v15 = vpack.c.bf16 %v2658_v13, %v2655_v8 }
 0xdbb   : > { %5325 = vmatprep.subr.bf16.mxu1 %v6319_v18 }
 0xdbc   : > { %v2863_v16 = vsel %vm1208_vm1, %v7045_v15, 0 }
 0xdc1   : > { %5312 = vmatmul.mubr.bf16.gmra.mxu1 %v6997_v17 }
 0xdc2   : > { %5327 = vmatprep.mubr.msk.bf16.mxu1 %vm6320_vm0, %v6319_v18  ;;  %5326 = vmatpush3.bf16.xpose.msra.mxu1 %v2863_v16 }
 0xdc3   : > { %5339 = vmatprep.subr.bf16.mxu1 %v6319_v18 }
 0xe59   : > { %v5265_v17 = vpop.f32.mrf.mxu1 }
 0xe5b   : > { %v2502_v19 = vpop.f32.mrf.mxu1 }
 0xe5d   : > { %v5266_v20 = vpop.f32.mrf.mxu1 }
 0xe5e   : > { %v7052_v21 = vpack.c.bf16 %v5266_v20, %v5265_v17 }
 0xe5f   : > { %v2505_v22 = vpop.f32.mrf.mxu1 }
 0xe60   : > { %v7054_v23 = vpack.c.bf16 %v2505_v22, %v2502_v19  ;;  %5328 = vmatmul.mubr.msk.bf16.vlgmr.msra.gmra.mxu1 %vm1208_vm1, %v7052_v21 }
 0xe61   : > { %5343 = vmatprep.mubr.msk.bf16.mxu1 %vm6320_vm0, %v6319_v18 }
 0xe62   : > { %5320 = vmatmul.mubr.msk.bf16.vlgmr.msra.gmra.mxu0 %vm1208_vm1, %v7054_v23 }
 0xe63   : > { %5335 = vmatprep.mubr.msk.bf16.mxu0 %vm6320_vm0, %v6319_v18 }
 0xe79   : > { %v5309_v24 = vpop.f32.mrf.mxu1 }
 0xe7b   : > { %v2768_v26 = vpop.f32.mrf.mxu1 }
 0xe7d   : > { %v5310_v27 = vpop.f32.mrf.mxu1 }
 0xe7e   : > { %v7064_v28 = vpack.c.bf16 %v5310_v27, %v5309_v24 }
 0xe7f   : > { %v2771_v31 = vpop.f32.mrf.mxu1 }
 0xe80   : > { %v7066_v33 = vpack.c.bf16 %v2771_v31, %v2768_v26  ;;  %5332 = vmatpush3.bf16.msra.mxu0 %v7064_v28 }
 0xe81   : > { %v5313_v34 = vpop.f32.mrf.mxu1  ;;  %5333 = vmatprep.subr.bf16.mxu0 %v6319_v18 }
 0xe83   : > { %v2784_v35 = vpop.f32.mrf.mxu1 }
 0xe84   : > { %5334 = vmatpush3.bf16.msra.mxu0 %v7066_v33 }
 0xe85   : > { %v5314_v36 = vpop.f32.mrf.mxu1  ;;  %5363 = vmatprep.subr.bf16.mxu0 %v6319_v18 }
 0xe86   : > { %v7072_v37 = vpack.c.bf16 %v5314_v36, %v5313_v34 }
 0xe87   : > { %v2787_v25 = vpop.f32.mrf.mxu1 }
 0xe88   : > { %5340 = vmatpush3.bf16.msra.mxu1 %v7072_v37  ;;  %v7075_v40 = vpack.c.bf16 %v2787_v25, %v2784_v35 }
 0xe89   : > { %5341 = vmatprep.subr.bf16.mxu1 %v6319_v18 }
 0xe8c   : > { %5342 = vmatpush3.bf16.msra.mxu1 %v7075_v40 }
 0xe8d   : > { %5347 = vmatprep.subr.bf16.mxu1 %v6319_v18 }
 0xf20   : > { %v2902_v42 = vpop.f32.mrf.mxu1 }
 0xf21   : > { %v2915_v43 = vsel %vm1208_vm1, %v2902_v42, -inf }
 0xf22   : > { %v7081_v38 = vpop.f32.mrf.mxu0  ;;  %2916 = vmax.xlane.f32.xlu0 %v2915_v43  ;;  %v5329_v39 = vpop.f32.mrf.mxu1 }
 0xf23   : > { %v2909_v61 = vsel %vm1208_vm1, %v7081_v38, -inf }
 0xf24   : > { %v5321_v41 = vpop.f32.mrf.mxu0  ;;  %v2905_v44 = vpop.f32.mrf.mxu1 }
 0xf25   : > { %v2918_v45 = vsel %vm1208_vm1, %v2905_v44, -inf }
 0xf26   : > { %v7084_v46 = vpop.f32.mrf.mxu0  ;;  %2919 = vmax.xlane.f32.xlu1 %v2918_v45  ;;  %v5330_v47 = vpop.f32.mrf.mxu1 }
 0xf27   : > { %v2912_v50 = vsel %vm1208_vm1, %v7084_v46, -inf }
 0xf28   : > { %v5322_v30 = vpop.f32.mrf.mxu0 }
 0xfab   : > { %v2917_v48 = vpop.xlane.xlu0 %2916 }
 0xfac   : > { %v2923_v29 = vsub.f32 %v2902_v42, %v2917_v48 }
 0xfae   : > { %v2929_v51 = vmul.f32 1.442695, %v2923_v29 }
 0xfaf   : > { %v2920_v53 = vpop.xlane.xlu1 %2919 }
 0xfb0   : > { %5811 = vpow2.f32 %v2929_v51  ;;  %v2924_v54 = vsub.f32 %v2905_v44, %v2920_v53 }
 0xfb2   : > { %v2931_v52 = vmul.f32 1.442695, %v2924_v54 }
 0xfb4   : > { %5813 = vpow2.f32 %v2931_v52 }
 0xfbd   : > { %v5812_v57 = vpop.eup %5811 }
 0xfbe   : > { %v2939_v7 = vsel %vm1208_vm1, %v5812_v57, 0.0 }
 0xfbf   : > { %2940 = vadd.xlane.f32.xlu0 %v2939_v7 }
 0xfc1   : > { %v5814_v9 = vpop.eup %5813 }
 0xfc2   : > { %v2942_v60 = vsel %vm1208_vm1, %v5814_v9, 0.0 }
 0xfc3   : > { %2943 = vadd.xlane.f32.xlu1 %v2942_v60 }
 0xfd4   : > { %3050 = vrot.lane.b32.xlu1 %v7033_v6, %s6321_s30 }
 0xfd5   : > { %3052 = vrot.lane.b32.xlu0 %v7029_v3, %s6321_s30 }
 0xfd8   : > { %3111 = vrot.lane.b32.xlu1 %v7039_v11, %s6321_s30 }
 0xfd9   : > { %3109 = vrot.lane.b32.xlu0 %v7045_v15, %s6321_s30 }
 0xfdc   : > { %3046 = vrot.lane.b32.xlu1 %v7054_v23, %s6321_s30 }
 0xfe0   : > { %3105 = vrot.lane.b32.xlu1 %v7052_v21, %s6321_s30 }
 0xff8   : > { %2910 = vmax.xlane.f32.xlu0 %v2909_v61 }
0x1004   : > { %2913 = vmax.xlane.f32.xlu1 %v2912_v50 }
0x1048   : > { %v2941_v55 = vpop.xlane.xlu0 %2940 }
0x1049   : > { %5815 = vrcp.f32 %v2941_v55 }
0x104c   : > { %v2944_v56 = vpop.xlane.xlu1 %2943  ;;  %v3053_v1 = vpop.permute.xlu0 %3052 }
0x104d   : > { %5817 = vrcp.f32 %v2944_v56  ;;  %v3061_v5 = vsel %vm1208_vm1, %v3053_v1, 0 }
0x1050   : > { %v3051_v8 = vpop.permute.xlu1 %3050  ;;  %v3110_v16 = vpop.permute.xlu0 %3109 }
0x1051   : > { %v3058_v10 = vsel %vm1208_vm1, %v3051_v8, 0  ;;  %v3117_v17 = vsel %vm1208_vm1, %v3110_v16, 0 }
0x1054   : > { %v3112_v12 = vpop.permute.xlu1 %3111 }
0x1055   : > { %v3120_v14 = vsel %vm1208_vm1, %v3112_v12, 0 }
0x1056   : > { %v5816_v62 = vpop.eup %5815 }
0x1057   : > { %v2951_v0 = vmul.f32 %v5816_v62, %v5812_v57 }
0x1058   : > { %v3047_v13 = vpop.permute.xlu1 %3046 }
0x105a   : > { %v5818_v63 = vpop.eup %5817 }
0x105b   : > { %v2952_v2 = vmul.f32 %v5818_v63, %v5814_v9 }
0x105c   : > { %v3106_v19 = vpop.permute.xlu1 %3105 }
0x105d   : > { %v2954_v4 = vpack.c.bf16 %v2952_v2, %v2951_v0 }
0x105f   : > { %5344 = vmatmul.mubr.msk.bf16.vlgmr.msra.gmra.mxu1 %vm1208_vm1, %v2954_v4 }
0x1060   : > { %5348 = vmatpush3.bf16.xpose.msra.mxu1 %v3061_v5  ;;  %5351 = vmatprep.mubr.msk.bf16.mxu1 %vm6320_vm0, %v6319_v18 }
0x1061   : > { %5349 = vmatprep.subr.bf16.mxu1 %v6319_v18 }
0x1068   : > { %5350 = vmatpush3.bf16.xpose.msra.mxu1 %v3058_v10 }
0x1069   : > { %5355 = vmatprep.subr.bf16.mxu1 %v6319_v18 }
0x106f   : > { %5352 = vmatmul.mubr.msk.bf16.vlgmr.msra.gmra.mxu1 %vm1208_vm1, %v3047_v13 }
0x1070   : > { %5356 = vmatpush3.bf16.xpose.msra.mxu1 %v3120_v14  ;;  %5359 = vmatprep.mubr.msk.bf16.mxu1 %vm6320_vm0, %v6319_v18 }
0x1071   : > { %5357 = vmatprep.subr.bf16.mxu1 %v6319_v18 }
0x1078   : > { %5358 = vmatpush3.bf16.xpose.msra.mxu1 %v3117_v17 }
0x1079   : > { %5371 = vmatprep.subr.bf16.mxu1 %v6319_v18 }
0x107f   : > { %5360 = vmatmul.mubr.msk.bf16.vlgmr.msra.gmra.mxu1 %vm1208_vm1, %v3106_v19 }
0x1080   : > { %5375 = vmatprep.mubr.msk.bf16.mxu1 %vm6320_vm0, %v6319_v18 }
0x1081   : > { %v2911_v31 = vpop.xlane.xlu0 %2910 }
0x1082   : > { %v2921_v34 = vsub.f32 %v7081_v38, %v2911_v31 }
0x1084   : > { %v2925_v25 = vmul.f32 1.442695, %v2921_v34 }
0x1086   : > { %5819 = vpow2.f32 %v2925_v25 }
0x108d   : > { %v2914_v35 = vpop.xlane.xlu1 %2913 }
0x108e   : > { %v2922_v42 = vsub.f32 %v7084_v46, %v2914_v35 }
0x1090   : > { %v2927_v44 = vmul.f32 1.442695, %v2922_v42 }
0x1092   : > { %5821 = vpow2.f32 %v2927_v44 }
0x1093   : > { %v5820_v48 = vpop.eup %5819 }
0x1094   : > { %v2933_v46 = vsel %vm1208_vm1, %v5820_v48, 0.0 }
0x109f   : > { %v5822_v54 = vpop.eup %5821 }
0x10a0   : > { %v2936_v57 = vsel %vm1208_vm1, %v5822_v54, 0.0 }
0x111f   : > { %v7121_v20 = vpop.f32.mrf.mxu1 }
0x1121   : > { %v5345_v22 = vpop.f32.mrf.mxu1 }
0x1123   : > { %v7123_v24 = vpop.f32.mrf.mxu1 }
0x1124   : > { %v3044_v26 = vpack.c.bf16 %v7123_v24, %v7121_v20  ;;  %v5697_v24 = vld [vmem:[#allocation19 + $0x70] ss:$8 sps:$4 sm:$0xff]  }
0x1125   : > { %v5346_v27 = vpop.f32.mrf.mxu1 }
0x112f   : > { %v3097_v36 = vpop.f32.mrf.mxu1 }
0x1130   : > { %v3163_v43 = vsel %vm1208_vm1, %v3097_v36, -inf }
0x1131   : > { %3164 = vmax.xlane.f32.xlu0 %v3163_v43  ;;  %v5353_v39 = vpop.f32.mrf.mxu1 }
0x1133   : > { %v3100_v41 = vpop.f32.mrf.mxu1 }
0x1134   : > { %v3166_v45 = vsel %vm1208_vm1, %v3100_v41, -inf }
0x1135   : > { %3167 = vmax.xlane.f32.xlu0 %v3166_v45  ;;  %v5354_v47 = vpop.f32.mrf.mxu1 }
0x113f   : > { %v3156_v30 = vpop.f32.mrf.mxu1 }
0x1140   : > { %v3169_v38 = vsel %vm1208_vm1, %v3156_v30, -inf }
0x1141   : > { %3170 = vmax.xlane.f32.xlu0 %v3169_v38  ;;  %v5361_v29 = vpop.f32.mrf.mxu1 }
0x1143   : > { %v3159_v51 = vpop.f32.mrf.mxu1 }
0x1144   : > { %v3172_v53 = vsel %vm1208_vm1, %v3159_v51, -inf }
0x1145   : > { %2934 = vadd.xlane.f32.xlu0 %v2933_v46  ;;  %3173 = vmax.xlane.f32.xlu1 %v3172_v53  ;;  %v5362_v52 = vpop.f32.mrf.mxu1 }
0x1149   : > { %2937 = vadd.xlane.f32.xlu1 %v2936_v57 }
0x115a   : > { %3265 = vrot.lane.b32.xlu1 %v7072_v37, %s6321_s30 }
0x115b   : > { %3213 = vrot.lane.b32.xlu0 %v7064_v28, %s6321_s30 }
0x115e   : > { %3211 = vrot.lane.b32.xlu1 %v7066_v33, %s6321_s30 }
0x1162   : > { %3263 = vrot.lane.b32.xlu1 %v7075_v40, %s6321_s30 }
0x11ba   : > { %v3165_v7 = vpop.xlane.xlu0 %3164 }
0x11bb   : > { %v3175_v9 = vsub.f32 %v3097_v36, %v3165_v7 }
0x11bd   : > { %v3179_v60 = vmul.f32 1.442695, %v3175_v9 }
0x11be   : > { %v3168_v61 = vpop.xlane.xlu0 %3167 }
0x11bf   : > { %5823 = vpow2.f32 %v3179_v60  ;;  %v3176_v50 = vsub.f32 %v3100_v41, %v3168_v61 }
0x11c1   : > { %v3181_v55 = vmul.f32 1.442695, %v3176_v50 }
0x11c3   : > { %5825 = vpow2.f32 %v3181_v55 }
0x11ca   : > { %v3171_v56 = vpop.xlane.xlu0 %3170 }
0x11cb   : > { %v3177_v62 = vsub.f32 %v3156_v30, %v3171_v56 }
0x11cc   : > { %v5824_v63 = vpop.eup %5823 }
0x11cd   : > { %v3183_v0 = vmul.f32 1.442695, %v3177_v62  ;;  %v3187_v2 = vsel %vm1208_vm1, %v5824_v63, 0.0 }
0x11ce   : > { %3188 = vadd.xlane.f32.xlu0 %v3187_v2  ;;  %v3174_v1 = vpop.xlane.xlu1 %3173  ;;  %v2935_v4 = vpop.xlane.xlu0 %2934 }
0x11cf   : > { %5827 = vpow2.f32 %v3183_v0  ;;  %v3178_v5 = vsub.f32 %v3159_v51, %v3174_v1 }
0x11d0   : > { %v5826_v8 = vpop.eup %5825  ;;  %5829 = vrcp.f32 %v2935_v4 }
0x11d1   : > { %v3185_v10 = vmul.f32 1.442695, %v3178_v5  ;;  %v3190_v12 = vsel %vm1208_vm1, %v5826_v8, 0.0 }
0x11d2   : > { %3191 = vadd.xlane.f32.xlu1 %v3190_v12  ;;  %v2938_v13 = vpop.xlane.xlu1 %2937  ;;  %v3214_v43 = vpop.permute.xlu0 %3213 }
0x11d3   : > { %5831 = vpow2.f32 %v3185_v10 }
0x11d4   : > { %5833 = vrcp.f32 %v2938_v13 }
0x11d6   : > { %v3266_v14 = vpop.permute.xlu1 %3265 }
0x11d7   : > { %5372 = vmatpush3.bf16.msra.mxu1 %v3266_v14 }
0x11d8   : > { %5373 = vmatprep.subr.bf16.mxu1 %v6319_v18 }
0x11da   : > { %v3212_v16 = vpop.permute.xlu1 %3211 }
0x11dc   : > { %v5828_v17 = vpop.eup %5827 }
0x11dd   : > { %v3193_v19 = vsel %vm1208_vm1, %v5828_v17, 0.0  ;;  %v5830_v27 = vpop.eup %5829 }
0x11de   : > { %3194 = vadd.xlane.f32.xlu0 %v3193_v19  ;;  %v3264_v22 = vpop.permute.xlu1 %3263  ;;  %v2949_v36 = vmul.f32 %v5830_v27, %v5820_v48 }
0x11df   : > { %5374 = vmatpush3.bf16.msra.mxu1 %v3264_v22 }
0x11e0   : > { %v5832_v31 = vpop.eup %5831  ;;  %5387 = vmatprep.subr.bf16.mxu1 %v6319_v18 }
0x11e1   : > { %v5834_v34 = vpop.eup %5833  ;;  %v3196_v35 = vsel %vm1208_vm1, %v5832_v31, 0.0 }
0x11e2   : > { %3197 = vadd.xlane.f32.xlu1 %v3196_v35  ;;  %v2950_v25 = vmul.f32 %v5834_v34, %v5822_v54 }
0x11e4   : > { %v2953_v42 = vpack.c.bf16 %v2950_v25, %v2949_v36 }
0x11e6   : > { %5336 = vmatmul.mubr.msk.bf16.vlgmr.msra.gmra.mxu0 %vm1208_vm1, %v2953_v42 }
0x11e7   : > { %5364 = vmatpush3.bf16.msra.mxu0 %v3214_v43  ;;  %5367 = vmatprep.mubr.msk.bf16.mxu0 %vm6320_vm0, %v6319_v18 }
0x11e8   : > { %5365 = vmatprep.subr.bf16.mxu0 %v6319_v18 }
0x11eb   : > { %5366 = vmatpush3.bf16.msra.mxu0 %v3212_v16 }
0x11ec   : > { %5379 = vmatprep.subr.bf16.mxu0 %v6319_v18 }
0x11f3   : > { %3375 = vrot.lane.b32.xlu1 %v7039_v11, %s6322_s2 }
0x11f4   : > { %3319 = vrot.lane.b32.xlu0 %v7029_v3, %s6322_s2 }
0x11f7   : > { %3373 = vrot.lane.b32.xlu1 %v7045_v15, %s6322_s2 }
0x11f8   : > { %3317 = vrot.lane.b32.xlu0 %v7033_v6, %s6322_s2 }
0x11fb   : > { %3371 = vrot.lane.b32.xlu1 %v7052_v21, %s6322_s2 }
0x11fc   : > { %3315 = vrot.lane.b32.xlu0 %v7054_v23, %s6322_s2 }
0x1257   : > { %v3189_v39 = vpop.xlane.xlu0 %3188 }
0x1258   : > { %5835 = vrcp.f32 %v3189_v39 }
0x125b   : > { %v3192_v41 = vpop.xlane.xlu1 %3191 }
0x125c   : > { %5837 = vrcp.f32 %v3192_v41 }
0x1265   : > { %v5836_v44 = vpop.eup %5835 }
0x1266   : > { %v3203_v30 = vmul.f32 %v5836_v44, %v5824_v63 }
0x1267   : > { %v3195_v45 = vpop.xlane.xlu0 %3194 }
0x1268   : > { %5839 = vrcp.f32 %v3195_v45 }
0x1269   : > { %v5838_v47 = vpop.eup %5837 }
0x126a   : > { %v3204_v38 = vmul.f32 %v5838_v47, %v5826_v8 }
0x126b   : > { %v3320_v48 = vpop.permute.xlu0 %3319  ;;  %v3198_v29 = vpop.xlane.xlu1 %3197 }
0x126c   : > { %v3328_v51 = vsel %vm1208_vm1, %v3320_v48, 0  ;;  %5841 = vrcp.f32 %v3198_v29  ;;  %v3207_v46 = vpack.c.bf16 %v3204_v38, %v3203_v30 }
0x126e   : > { %5368 = vmatmul.mubr.msk.bf16.vlgmr.msra.gmra.mxu0 %vm1208_vm1, %v3207_v46 }
0x126f   : > { %5380 = vmatpush3.bf16.xpose.msra.mxu0 %v3328_v51  ;;  %5383 = vmatprep.mubr.msk.bf16.mxu0 %vm6320_vm0, %v6319_v18  ;;  %v3318_v53 = vpop.permute.xlu0 %3317  ;;  %v3376_v60 = vpop.permute.xlu1 %3375 }
0x1270   : > { %5381 = vmatprep.subr.bf16.mxu0 %v6319_v18  ;;  %v3325_v54 = vsel %vm1208_vm1, %v3318_v53, 0  ;;  %v3384_v55 = vsel %vm1208_vm1, %v3376_v60, 0 }
0x1273   : > { %v3316_v50 = vpop.permute.xlu0 %3315  ;;  %v3374_v56 = vpop.permute.xlu1 %3373 }
0x1274   : > { %v3381_v62 = vsel %vm1208_vm1, %v3374_v56, 0 }
0x1275   : > { %v5840_v52 = vpop.eup %5839 }
0x1276   : > { %v3205_v7 = vmul.f32 %v5840_v52, %v5828_v17 }
0x1277   : > { %5382 = vmatpush3.bf16.xpose.msra.mxu0 %v3325_v54  ;;  %v3372_v63 = vpop.permute.xlu1 %3371 }
0x1278   : > { %5395 = vmatprep.subr.bf16.mxu0 %v6319_v18 }
0x1279   : > { %v5842_v57 = vpop.eup %5841 }
0x127a   : > { %v3206_v9 = vmul.f32 %v5842_v57, %v5832_v31 }
0x127c   : > { %v3208_v61 = vpack.c.bf16 %v3206_v9, %v3205_v7 }
0x127e   : > { %5384 = vmatmul.mubr.msk.bf16.vlgmr.msra.gmra.mxu0 %vm1208_vm1, %v3316_v50  ;;  %5376 = vmatmul.mubr.msk.bf16.vlgmr.msra.gmra.mxu1 %vm1208_vm1, %v3208_v61 }
0x127f   : > { %5388 = vmatpush3.bf16.xpose.msra.mxu1 %v3384_v55  ;;  %5391 = vmatprep.mubr.msk.bf16.mxu1 %vm6320_vm0, %v6319_v18 }
0x1280   : > { %5389 = vmatprep.subr.bf16.mxu1 %v6319_v18  ;;  %5399 = vmatprep.mubr.msk.bf16.mxu0 %vm6320_vm0, %v6319_v18 }
0x1287   : > { %5390 = vmatpush3.bf16.xpose.msra.mxu1 %v3381_v62 }
0x1288   : > { %5403 = vmatprep.subr.bf16.mxu1 %v6319_v18 }
0x128e   : > { %5392 = vmatmul.mubr.msk.bf16.vlgmr.msra.gmra.mxu1 %vm1208_vm1, %v3372_v63 }
0x128f   : > { %5407 = vmatprep.mubr.msk.bf16.mxu1 %vm6320_vm0, %v6319_v18 }
0x12a6   : > { %v7186_v0 = vpop.f32.mrf.mxu0 }
0x12a8   : > { %v5337_v2 = vpop.f32.mrf.mxu0 }
0x12aa   : > { %v7188_v1 = vpop.f32.mrf.mxu0 }
0x12ab   : > { %v3043_v4 = vpack.c.bf16 %v7188_v1, %v7186_v0 }
0x12ac   : > { %v5338_v5 = vpop.f32.mrf.mxu0 }
0x132e   : > { %v7192_v8 = vpop.f32.mrf.mxu0 }
0x1330   : > { %v5369_v10 = vpop.f32.mrf.mxu0 }
0x1332   : > { %v7194_v12 = vpop.f32.mrf.mxu0 }
0x1333   : > { %v3313_v13 = vpack.c.bf16 %v7194_v12, %v7192_v8 }
0x1334   : > { %v5370_v14 = vpop.f32.mrf.mxu0 }
0x133e   : > { %v3364_v16 = vpop.f32.mrf.mxu0  ;;  %v7198_v17 = vpop.f32.mrf.mxu1 }
0x133f   : > { %v3427_v19 = vsel %vm1208_vm1, %v3364_v16, -inf }
0x1340   : > { %3428 = vmax.xlane.f32.xlu0 %v3427_v19  ;;  %v5385_v22 = vpop.f32.mrf.mxu0  ;;  %v5377_v27 = vpop.f32.mrf.mxu1 }
0x1342   : > { %v3367_v31 = vpop.f32.mrf.mxu0  ;;  %v7201_v34 = vpop.f32.mrf.mxu1 }
0x1343   : > { %v3314_v35 = vpack.c.bf16 %v7201_v34, %v7198_v17  ;;  %v3430_v36 = vsel %vm1208_vm1, %v3367_v31, -inf }
0x1344   : > { %3431 = vmax.xlane.f32.xlu1 %v3430_v36  ;;  %v5386_v25 = vpop.f32.mrf.mxu0  ;;  %v5378_v42 = vpop.f32.mrf.mxu1 }
0x134e   : > { %v3420_v43 = vpop.f32.mrf.mxu1 }
0x134f   : > { %v3433_v39 = vsel %vm1208_vm1, %v3420_v43, -inf }
0x1350   : > { %3434 = vmax.xlane.f32.xlu0 %v3433_v39  ;;  %v5393_v41 = vpop.f32.mrf.mxu1 }
0x1352   : > { %v3423_v44 = vpop.f32.mrf.mxu1 }
0x1353   : > { %v3436_v45 = vsel %vm1208_vm1, %v3423_v44, -inf }
0x1354   : > { %3437 = vmax.xlane.f32.xlu0 %v3436_v45  ;;  %v5394_v47 = vpop.f32.mrf.mxu1 }
0x1355   : > { %3525 = vrot.lane.b32.xlu1 %v7072_v37, %s6322_s2 }
0x1359   : > { %3473 = vrot.lane.b32.xlu1 %v7066_v33, %s6322_s2 }
0x135d   : > { %3523 = vrot.lane.b32.xlu1 %v7075_v40, %s6322_s2 }
0x136a   : > { %3475 = vrot.lane.b32.xlu0 %v7064_v28, %s6322_s2 }
0x13c9   : > { %v3429_v30 = vpop.xlane.xlu0 %3428 }
0x13ca   : > { %v3439_v38 = vsub.f32 %v3364_v16, %v3429_v30 }
0x13cc   : > { %v3443_v48 = vmul.f32 1.442695, %v3439_v38 }
0x13cd   : > { %v3432_v29 = vpop.xlane.xlu1 %3431 }
0x13ce   : > { %5843 = vpow2.f32 %v3443_v48  ;;  %v3440_v51 = vsub.f32 %v3367_v31, %v3432_v29 }
0x13d0   : > { %v3445_v46 = vmul.f32 1.442695, %v3440_v51 }
0x13d1   : > { %v3526_v53 = vpop.permute.xlu1 %3525 }
0x13d2   : > { %5845 = vpow2.f32 %v3445_v46  ;;  %5404 = vmatpush3.bf16.msra.mxu1 %v3526_v53 }
0x13d3   : > { %5405 = vmatprep.subr.bf16.mxu1 %v6319_v18 }
0x13d5   : > { %v3474_v54 = vpop.permute.xlu1 %3473 }
0x13d9   : > { %v3524_v52 = vpop.permute.xlu1 %3523  ;;  %v3435_v57 = vpop.xlane.xlu0 %3434 }
0x13da   : > { %v3441_v7 = vsub.f32 %v3420_v43, %v3435_v57  ;;  %5406 = vmatpush3.bf16.msra.mxu1 %v3524_v52 }
0x13db   : > { %v5844_v9 = vpop.eup %5843  ;;  %5419 = vmatprep.subr.bf16.mxu1 %v6319_v18 }
0x13dc   : > { %v3447_v60 = vmul.f32 1.442695, %v3441_v7  ;;  %v3451_v61 = vsel %vm1208_vm1, %v5844_v9, 0.0 }
0x13dd   : > { %3452 = vadd.xlane.f32.xlu0 %v3451_v61  ;;  %v3438_v50 = vpop.xlane.xlu0 %3437 }
0x13de   : > { %5847 = vpow2.f32 %v3447_v60  ;;  %v3442_v55 = vsub.f32 %v3423_v44, %v3438_v50 }
0x13df   : > { %v5846_v56 = vpop.eup %5845 }
0x13e0   : > { %v3449_v62 = vmul.f32 1.442695, %v3442_v55  ;;  %v3454_v63 = vsel %vm1208_vm1, %v5846_v56, 0.0 }
0x13e1   : > { %3455 = vadd.xlane.f32.xlu1 %v3454_v63  ;;  %v3476_v2 = vpop.permute.xlu0 %3475 }
0x13e2   : > { %5849 = vpow2.f32 %v3449_v62  ;;  %5396 = vmatpush3.bf16.msra.mxu0 %v3476_v2 }
0x13e3   : > { %5397 = vmatprep.subr.bf16.mxu0 %v6319_v18 }
0x13e6   : > { %5398 = vmatpush3.bf16.msra.mxu0 %v3474_v54 }
0x13e7   : > { %5411 = vmatprep.subr.bf16.mxu0 %v6319_v18 }
0x13eb   : > { %v5848_v5 = vpop.eup %5847 }
0x13ec   : > { %v3457_v10 = vsel %vm1208_vm1, %v5848_v5, 0.0 }
0x13ed   : > { %3458 = vadd.xlane.f32.xlu0 %v3457_v10 }
0x13ef   : > { %v5850_v14 = vpop.eup %5849 }
0x13f0   : > { %v3460_v16 = vsel %vm1208_vm1, %v5850_v14, 0.0 }
0x13f1   : > { %3461 = vadd.xlane.f32.xlu1 %v3460_v16 }
0x1402   : > { %3635 = vrot.lane.b32.xlu1 %v7039_v11, %s6323_s28 }
0x1403   : > { %3579 = vrot.lane.b32.xlu0 %v7029_v3, %s6323_s28 }
0x1406   : > { %3633 = vrot.lane.b32.xlu1 %v7045_v15, %s6323_s28 }
0x1407   : > { %3577 = vrot.lane.b32.xlu0 %v7033_v6, %s6323_s28 }
0x140a   : > { %3631 = vrot.lane.b32.xlu1 %v7052_v21, %s6323_s28 }
0x140b   : > { %3575 = vrot.lane.b32.xlu0 %v7054_v23, %s6323_s28 }
0x1466   : > { %v3453_v19 = vpop.xlane.xlu0 %3452 }
0x1467   : > { %5851 = vrcp.f32 %v3453_v19 }
0x146a   : > { %v3456_v22 = vpop.xlane.xlu1 %3455 }
0x146b   : > { %5853 = vrcp.f32 %v3456_v22 }
0x1474   : > { %v5852_v11 = vpop.eup %5851 }
0x1475   : > { %v3467_v3 = vmul.f32 %v5852_v11, %v5844_v9 }
0x1476   : > { %v3459_v27 = vpop.xlane.xlu0 %3458 }
0x1477   : > { %5855 = vrcp.f32 %v3459_v27 }
0x1478   : > { %v5854_v31 = vpop.eup %5853 }
0x1479   : > { %v3468_v36 = vmul.f32 %v5854_v31, %v5846_v56 }
0x147a   : > { %v3462_v15 = vpop.xlane.xlu1 %3461  ;;  %v3580_v25 = vpop.permute.xlu0 %3579 }
0x147b   : > { %5857 = vrcp.f32 %v3462_v15  ;;  %v3588_v6 = vsel %vm1208_vm1, %v3580_v25, 0  ;;  %v3471_v42 = vpack.c.bf16 %v3468_v36, %v3467_v3 }
0x147d   : > { %5400 = vmatmul.mubr.msk.bf16.vlgmr.msra.gmra.mxu0 %vm1208_vm1, %v3471_v42 }
0x147e   : > { %5412 = vmatpush3.bf16.xpose.msra.mxu0 %v3588_v6  ;;  %5415 = vmatprep.mubr.msk.bf16.mxu0 %vm6320_vm0, %v6319_v18  ;;  %v3578_v21 = vpop.permute.xlu0 %3577  ;;  %v3636_v45 = vpop.permute.xlu1 %3635 }
0x147f   : > { %5413 = vmatprep.subr.bf16.mxu0 %v6319_v18  ;;  %v3585_v23 = vsel %vm1208_vm1, %v3578_v21, 0  ;;  %v3644_v38 = vsel %vm1208_vm1, %v3636_v45, 0 }
0x1482   : > { %v3576_v30 = vpop.permute.xlu0 %3575  ;;  %v3634_v48 = vpop.permute.xlu1 %3633 }
0x1483   : > { %v3641_v29 = vsel %vm1208_vm1, %v3634_v48, 0 }
0x1484   : > { %v5856_v43 = vpop.eup %5855 }
0x1485   : > { %v3469_v41 = vmul.f32 %v5856_v43, %v5848_v5 }
0x1486   : > { %5414 = vmatpush3.bf16.xpose.msra.mxu0 %v3585_v23  ;;  %v3632_v51 = vpop.permute.xlu1 %3631 }
0x1487   : > { %5427 = vmatprep.subr.bf16.mxu0 %v6319_v18 }
0x1488   : > { %v5858_v39 = vpop.eup %5857 }
0x1489   : > { %v3470_v44 = vmul.f32 %v5858_v39, %v5850_v14 }
0x148b   : > { %v3472_v47 = vpack.c.bf16 %v3470_v44, %v3469_v41 }
0x148d   : > { %5416 = vmatmul.mubr.msk.bf16.vlgmr.msra.gmra.mxu0 %vm1208_vm1, %v3576_v30  ;;  %5408 = vmatmul.mubr.msk.bf16.vlgmr.msra.gmra.mxu1 %vm1208_vm1, %v3472_v47 }
0x148e   : > { %5420 = vmatpush3.bf16.xpose.msra.mxu1 %v3644_v38  ;;  %5423 = vmatprep.mubr.msk.bf16.mxu1 %vm6320_vm0, %v6319_v18 }
0x148f   : > { %5421 = vmatprep.subr.bf16.mxu1 %v6319_v18  ;;  %5431 = vmatprep.mubr.msk.bf16.mxu0 %vm6320_vm0, %v6319_v18 }
0x1496   : > { %5422 = vmatpush3.bf16.xpose.msra.mxu1 %v3641_v29 }
0x1497   : > { %5435 = vmatprep.subr.bf16.mxu1 %v6319_v18 }
0x149d   : > { %5424 = vmatmul.mubr.msk.bf16.vlgmr.msra.gmra.mxu1 %vm1208_vm1, %v3632_v51 }
0x149e   : > { %5439 = vmatprep.mubr.msk.bf16.mxu1 %vm6320_vm0, %v6319_v18 }
0x153d   : > { %v3516_v46 = vpop.f32.mrf.mxu0 }
0x153f   : > { %v5401_v53 = vpop.f32.mrf.mxu0 }
0x1541   : > { %v3519_v54 = vpop.f32.mrf.mxu0 }
0x1542   : > { %v3573_v52 = vpack.c.bf16 %v3519_v54, %v3516_v46 }
0x1543   : > { %v5402_v57 = vpop.f32.mrf.mxu0 }
0x154d   : > { %v3624_v7 = vpop.f32.mrf.mxu0  ;;  %v3566_v9 = vpop.f32.mrf.mxu1 }
0x154e   : > { %v3687_v60 = vsel %vm1208_vm1, %v3624_v7, -inf }
0x154f   : > { %3688 = vmax.xlane.f32.xlu0 %v3687_v60  ;;  %v5417_v61 = vpop.f32.mrf.mxu0  ;;  %v5409_v50 = vpop.f32.mrf.mxu1  ;;  %v5690_v60 = vld [vmem:[#allocation17 + $0x30] sm:$0xff]  }
0x1550   : > { %v5691_v61 = vld [vmem:[#allocation17 + $0x28] sm:$0xff]  }
0x1551   : > { %v3627_v55 = vpop.f32.mrf.mxu0  ;;  %v3569_v56 = vpop.f32.mrf.mxu1 }
0x1552   : > { %v3574_v62 = vpack.c.bf16 %v3569_v56, %v3566_v9  ;;  %v3690_v63 = vsel %vm1208_vm1, %v3627_v55, -inf  ;;  %v5692_v56 = vld [vmem:[#allocation17 + $0x20] sm:$0xff]  }
0x1553   : > { %3691 = vmax.xlane.f32.xlu1 %v3690_v63  ;;  %v5418_v2 = vpop.f32.mrf.mxu0  ;;  %v5410_v5 = vpop.f32.mrf.mxu1 }
0x1554   : > { %v5693_v5 = vld [vmem:[#allocation17 + $0x18] sm:$0xff]  }
0x155d   : > { %v3680_v10 = vpop.f32.mrf.mxu1 }
0x155e   : > { %v3693_v14 = vsel %vm1208_vm1, %v3680_v10, -inf }
0x155f   : > { %3694 = vmax.xlane.f32.xlu0 %v3693_v14  ;;  %v5425_v16 = vpop.f32.mrf.mxu1  ;;  %v5695_v14 = vld [vmem:[#allocation17 + $0x8] sm:$0xff]  }
0x1560   : > { %v5696_v16 = vld [vmem:[#allocation17] sm:$0xff]  }
0x1561   : > { %v3683_v19 = vpop.f32.mrf.mxu1 }
0x1562   : > { %v3696_v22 = vsel %vm1208_vm1, %v3683_v19, -inf }
0x1563   : > { %3697 = vmax.xlane.f32.xlu0 %v3696_v22  ;;  %v5426_v11 = vpop.f32.mrf.mxu1 }
0x15d8   : > { %v3689_v27 = vpop.xlane.xlu0 %3688 }
0x15d9   : > { %v3699_v31 = vsub.f32 %v3624_v7, %v3689_v27 }
0x15db   : > { %v3703_v3 = vmul.f32 1.442695, %v3699_v31 }
0x15dc   : > { %v3692_v36 = vpop.xlane.xlu1 %3691 }
0x15dd   : > { %5859 = vpow2.f32 %v3703_v3  ;;  %v3700_v15 = vsub.f32 %v3627_v55, %v3692_v36 }
0x15df   : > { %v3705_v25 = vmul.f32 1.442695, %v3700_v15 }
0x15e1   : > { %5861 = vpow2.f32 %v3705_v25 }
0x15e8   : > { %v3695_v6 = vpop.xlane.xlu0 %3694 }
0x15e9   : > { %v3701_v42 = vsub.f32 %v3680_v10, %v3695_v6  ;;  %v5694_v10 = vld [vmem:[#allocation17 + $0x10] sm:$0xff]  }
0x15ea   : > { %v5860_v21 = vpop.eup %5859 }
0x15eb   : > { %v3707_v23 = vmul.f32 1.442695, %v3701_v42  ;;  %v3711_v43 = vsel %vm1208_vm1, %v5860_v21, 0.0 }
0x15ec   : > { %3712 = vadd.xlane.f32.xlu0 %v3711_v43  ;;  %v3698_v47 = vpop.xlane.xlu0 %3697 }
0x15ed   : > { %5863 = vpow2.f32 %v3707_v23  ;;  %v3702_v30 = vsub.f32 %v3683_v19, %v3698_v47 }
0x15ee   : > { %v5862_v39 = vpop.eup %5861 }
0x15ef   : > { %v3714_v41 = vsel %vm1208_vm1, %v5862_v39, 0.0  ;;  %v3709_v38 = vmul.f32 1.442695, %v3702_v30 }
0x15f0   : > { %3715 = vadd.xlane.f32.xlu1 %v3714_v41 }
0x15f1   : > { %5865 = vpow2.f32 %v3709_v38 }
0x15fa   : > { %v5864_v44 = vpop.eup %5863 }
0x15fb   : > { %v3717_v45 = vsel %vm1208_vm1, %v5864_v44, 0.0 }
0x15fc   : > { %3718 = vadd.xlane.f32.xlu0 %v3717_v45 }
0x15fe   : > { %v5866_v48 = vpop.eup %5865 }
0x1601   : > { %3785 = vrot.lane.b32.xlu1 %v7072_v37, %s6323_s28  ;;  %v3720_v37 = vsel %vm1208_vm1, %v5866_v48, 0.0 }
0x1605   : > { %3733 = vrot.lane.b32.xlu1 %v7066_v33, %s6323_s28 }
0x1612   : > { %3735 = vrot.lane.b32.xlu0 %v7064_v28, %s6323_s28 }
0x1616   : > { %3837 = vrot.lane.b32.xlu0 %v3313_v13, %s6323_s28 }
0x161a   : > { %3843 = vrot.lane.b32.xlu0 %v3573_v52, %s6322_s2 }
0x1629   : > { %3721 = vadd.xlane.f32.xlu1 %v3720_v37 }
0x163a   : > { %3783 = vrot.lane.b32.xlu1 %v7075_v40, %s6323_s28 }
0x163e   : > { %3839 = vrot.lane.b32.xlu1 %v3314_v35, %s6323_s28 }
0x1642   : > { %3845 = vrot.lane.b32.xlu1 %v3574_v62, %s6322_s2 }
0x1675   : > { %v3713_v33 = vpop.xlane.xlu0 %3712 }
0x1679   : > { %v3716_v28 = vpop.xlane.xlu1 %3715 }
0x167a   : > { %5867 = vrcp.f32 %v3716_v28 }
0x167b   : > { %5869 = vrcp.f32 %v3713_v33 }
0x167d   : > { %v3786_v8 = vpop.permute.xlu1 %3785 }
0x167e   : > { %5436 = vmatpush3.bf16.msra.mxu1 %v3786_v8 }
0x167f   : > { %5437 = vmatprep.subr.bf16.mxu1 %v6319_v18 }
0x1681   : > { %v3734_v17 = vpop.permute.xlu1 %3733 }
0x1685   : > { %v3719_v12 = vpop.xlane.xlu0 %3718 }
0x1686   : > { %5871 = vrcp.f32 %v3719_v12 }
0x1687   : > { %v5868_v13 = vpop.eup %5867 }
0x1688   : > { %v5870_v51 = vpop.eup %5869  ;;  %v3728_v40 = vmul.f32 %v5868_v13, %v5862_v39 }
0x1689   : > { %v3736_v29 = vpop.permute.xlu0 %3735  ;;  %v3727_v34 = vmul.f32 %v5870_v51, %v5860_v21 }
0x168a   : > { %5428 = vmatpush3.bf16.msra.mxu0 %v3736_v29 }
0x168b   : > { %5429 = vmatprep.subr.bf16.mxu0 %v6319_v18  ;;  %v3731_v35 = vpack.c.bf16 %v3728_v40, %v3727_v34  ;;  %v5689_v18 = vld [vmem:[#allocation17 + $0x38] sm:$0xff]  }
0x168d   : > { %v3838_v3 = vpop.permute.xlu0 %3837 }
0x168e   : > { %5430 = vmatpush3.bf16.msra.mxu0 %v3734_v17  ;;  %v3855_v15 = vsel %vm1208_vm1, %v3043_v4, %v3838_v3 }
0x168f   : > { %5443 = vmatprep.subr.bf16.mxu0 %v5689_v18 }
0x1691   : > { %5432 = vmatmul.mubr.msk.bf16.vlgmr.msra.gmra.mxu0 %vm1208_vm1, %v3731_v35  ;;  %v3844_v36 = vpop.permute.xlu0 %3843  ;;  %v5702_v35 = vld [vmem:[#allocation19 + $0x64] ss:$8 sps:$4 sm:$0xff]  }
0x1692   : > { %5444 = vmatpush3.bf16.msra.mxu0 %v5689_v18  ;;  %v3860_v25 = vsel %vm2202_vm3, %v3855_v15, %v3844_v36  ;;  %v5714_v18 = vld [vmem:[#allocation19 + $0x24] ss:$8 sps:$4 sm:$0xff]  }
0x1693   : > { %v5872_v54 = vpop.eup %5871  ;;  %5445 = vmatprep.subr.bf16.mxu0 %v5690_v60 }
0x1694   : > { %v3729_v57 = vmul.f32 %v5872_v54, %v5864_v44  ;;  %v5703_v54 = vld [vmem:[#allocation19 + $0x50] ss:$8 sps:$4 sm:$0xff]  }
0x1696   : > { %5446 = vmatpush3.bf16.msra.mxu0 %v5690_v60  ;;  %v6324_v60 = vmov 0  }
0x1697   : > { %5447 = vmatprep.subr.bf16.mxu0 %v5691_v61 }
0x169a   : > { %5448 = vmatpush3.bf16.msra.mxu0 %v5691_v61  ;;  %v5712_v61 = vld [vmem:[#allocation19 + $0x20] ss:$8 sps:$4 sm:$0xff]  }
0x169b   : > { %5449 = vmatprep.subr.bf16.mxu0 %v5692_v56 }
0x169e   : > { %5450 = vmatpush3.bf16.msra.mxu0 %v5692_v56  ;;  %v5720_v56 = vld [vmem:[#allocation19 + $0x4] ss:$8 sps:$4 sm:$0xff]  }
0x169f   : > { %5451 = vmatprep.subr.bf16.mxu0 %v5693_v5 }
0x16a2   : > { %5452 = vmatpush3.bf16.msra.mxu0 %v5693_v5  ;;  %v5723_v5 = vld [vmem:[#allocation20 + $0x70] sm:$0xff]  }
0x16a3   : > { %5453 = vmatprep.subr.bf16.mxu0 %v5694_v10 }
0x16a6   : > { %5454 = vmatpush3.bf16.msra.mxu0 %v5694_v10  ;;  %v5724_v10 = vld [vmem:[#allocation20 + $0x30] sm:$0xff]  }
0x16a7   : > { %5455 = vmatprep.subr.bf16.mxu0 %v5695_v14 }
0x16aa   : > { %5456 = vmatpush3.bf16.msra.mxu0 %v5695_v14  ;;  %v5725_v14 = vld [vmem:[#allocation20 + $0x68] sm:$0xff]  }
0x16ab   : > { %5457 = vmatprep.subr.bf16.mxu0 %v5696_v16 }
0x16ae   : > { %5458 = vmatpush3.bf16.msra.mxu0 %v5696_v16  ;;  %v5726_v16 = vld [vmem:[#allocation20 + $0x28] sm:$0xff]  }
0x16b2   : > { %v3722_v46 = vpop.xlane.xlu1 %3721 }
0x16b3   : > { %5873 = vrcp.f32 %v3722_v46  ;;  %v5700_v46 = vld [vmem:[#allocation19 + $0x60] ss:$8 sps:$4 sm:$0xff]  }
0x16b6   : > { %v3784_v53 = vpop.permute.xlu1 %3783 }
0x16b7   : > { %5438 = vmatpush3.bf16.msra.mxu1 %v3784_v53  ;;  %v5705_v53 = vld [vmem:[#allocation19 + $0x54] ss:$8 sps:$4 sm:$0xff]  }
0x16ba   : > { %v3840_v21 = vpop.permute.xlu1 %3839 }
0x16bb   : > { %v3858_v43 = vsel %vm1208_vm1, %v3044_v26, %v3840_v21  ;;  %v5699_v26 = vld [vmem:[#allocation19 + $0x74] ss:$8 sps:$4 sm:$0xff]  }
0x16bc   : > { %4162 = vmatprep.subr.bf16.mxu1 %v5699_v26 }
0x16be   : > { %v3846_v23 = vpop.permute.xlu1 %3845 }
0x16bf   : > { %v3862_v39 = vsel %vm2202_vm3, %v3858_v43, %v3846_v23 }
0x16c0   : > { %v5874_v52 = vpop.eup %5873 }
0x16c1   : > { %v3730_v7 = vmul.f32 %v5874_v52, %v5866_v48  ;;  %v5708_v52 = vld [vmem:[#allocation19 + $0x44] ss:$8 sps:$4 sm:$0xff]  }
0x16c3   : > { %v3732_v9 = vpack.c.bf16 %v3730_v7, %v3729_v57  ;;  %v5706_v57 = vld [vmem:[#allocation19 + $0x40] ss:$8 sps:$4 sm:$0xff]   ;;  %v5709_v7 = vld [vmem:[#allocation19 + $0x30] ss:$8 sps:$4 sm:$0xff]  }
0x16c5   : > { %5440 = vmatmul.mubr.msk.bf16.vlgmr.msra.gmra.mxu1 %vm1208_vm1, %v3732_v9  ;;  %v5711_v9 = vld [vmem:[#allocation19 + $0x34] ss:$8 sps:$4 sm:$0xff]  }
0x16c6   : > { %4163 = vmatpush1.bf16.msra.mxu1 %v5697_v24  ;;  %4194 = vmatprep.mubr.bf16.mxu1 %v6324_v60 }
0x16c7   : > { %4164 = vmatprep.subr.bf16.mxu1 %v5702_v35 }
0x16ca   : > { %4165 = vmatpush1.bf16.msra.mxu1 %v5700_v46 }
0x16cb   : > { %4166 = vmatprep.subr.bf16.mxu1 %v5705_v53 }
0x16ce   : > { %4167 = vmatpush1.bf16.msra.mxu1 %v5703_v54  ;;  %v4070_v54 = vld [vmem:[%s7422_s11] sm:$0x3] }
0x16cf   : > { %4168 = vmatprep.subr.bf16.mxu1 %v5708_v52 }
0x16d2   : > { %4169 = vmatpush1.bf16.msra.mxu1 %v5706_v57 }
0x16d3   : > { %4170 = vmatprep.subr.bf16.mxu1 %v5711_v9 }
0x16d6   : > { %4171 = vmatpush1.bf16.msra.mxu1 %v5709_v7 }
0x16d7   : > { %4172 = vmatprep.subr.bf16.mxu1 %v5714_v18 }
0x16da   : > { %4173 = vmatpush1.bf16.msra.mxu1 %v5712_v61 }
0x1751   : > { %v3776_v50 = vpop.f32.mrf.mxu0 }
0x1753   : > { %v5433_v55 = vpop.f32.mrf.mxu0 }
0x1754   : > { %v5715_v55 = vld [vmem:[#allocation19 + $0x10] ss:$8 sps:$4 sm:$0xff]  }
0x1755   : > { %v3779_v62 = vpop.f32.mrf.mxu0 }
0x1756   : > { %v3833_v63 = vpack.c.bf16 %v3779_v62, %v3776_v50  ;;  %v5717_v50 = vld [vmem:[#allocation19 + $0x14] ss:$8 sps:$4 sm:$0xff]   ;;  %v5718_v62 = vld [vmem:[#allocation19] ss:$8 sps:$4 sm:$0xff]  }
0x1757   : > { %v5434_v2 = vpop.f32.mrf.mxu0  ;;  %4174 = vmatprep.subr.bf16.mxu1 %v5717_v50 }
0x1758   : > { %3849 = vrot.lane.b32.xlu0 %v3833_v63, %s6321_s30  ;;  %4175 = vmatpush1.bf16.msra.mxu1 %v5715_v55  ;;  %v5721_v63 = vld [vmem:[#allocation20 + $0x78] sm:$0xff]  }
0x1759   : > { %4176 = vmatprep.subr.bf16.mxu1 %v5720_v56  ;;  %v5722_v2 = vld [vmem:[#allocation20 + $0x38] sm:$0xff]   ;;  %5043 = vmatprep.subr.bf16.mxu0 %v5721_v63 }
0x175c   : > { %4177 = vmatpush1.bf16.msra.mxu1 %v5718_v62 }
0x1785   : > { %v3826_v19 = vpop.f32.mrf.mxu1 }
0x1787   : > { %v5441_v22 = vpop.f32.mrf.mxu1 }
0x1788   : > { %v5728_v22 = vld [vmem:[#allocation20 + $0x20] sm:$0xff]  }
0x1789   : > { %v3829_v11 = vpop.f32.mrf.mxu1 }
0x178a   : > { %v3834_v27 = vpack.c.bf16 %v3829_v11, %v3826_v19  ;;  %v5727_v19 = vld [vmem:[#allocation20 + $0x60] sm:$0xff]   ;;  %v5729_v11 = vld [vmem:[#allocation20 + $0x58] sm:$0xff]  }
0x178b   : > { %v5442_v31 = vpop.f32.mrf.mxu1 }
0x178c   : > { %3851 = vrot.lane.b32.xlu1 %v3834_v27, %s6321_s30  ;;  %v5730_v27 = vld [vmem:[#allocation20 + $0x18] sm:$0xff]   ;;  %s7503_s30 = sld [smem:[#allocation48_spill]] }
0x17ca   : > { %v3850_v6 = vpop.permute.xlu0 %3849 }
0x17cb   : > { %v3864_v42 = vsel %vm2207_vm4, %v3860_v25, %v3850_v6 }
0x17cc   : > { %5459 = vmatprep.mubr.bf16.mxu0 %v3864_v42 }
0x17fe   : > { %v3852_v41 = vpop.permute.xlu1 %3851 }
0x17ff   : > { %v3867_v0 = vsel %vm2207_vm4, %v3862_v39, %v3852_v41 }
0x1800   : > { %5460 = vmatmul.mubr.bf16.vlgmr.msra.gmra.mxu0 %v3867_v0 }
0x1801   : > { %5044 = vmatpush3.bf16.msra.mxu0 %v5722_v2 }
0x1802   : > { %5045 = vmatprep.subr.bf16.mxu0 %v5723_v5 }
0x1805   : > { %5046 = vmatpush3.bf16.msra.mxu0 %v5724_v10 }
0x1806   : > { %5047 = vmatprep.subr.bf16.mxu0 %v5725_v14 }
0x1809   : > { %5048 = vmatpush3.bf16.msra.mxu0 %v5726_v16 }
0x180a   : > { %5049 = vmatprep.subr.bf16.mxu0 %v5727_v19 }
0x180d   : > { %5050 = vmatpush3.bf16.msra.mxu0 %v5728_v22 }
0x180e   : > { %5051 = vmatprep.subr.bf16.mxu0 %v5729_v11 }
0x1811   : > { %5052 = vmatpush3.bf16.msra.mxu0 %v5730_v27 }
0x18c0   : > { %v5461_v1 = vpop.f32.mrf.mxu0 }
0x18c1   : > { %v3984_v30 = vadd.f32 %v5461_v1, %v7019_v58 }
0x18c2   : > { %v3967_v4 = vpop.f32.mrf.mxu0 }
0x18c3   : > { %v3982_v44 = vadd.f32 %v3967_v4, %v7013_v32  ;;  %v4830_v4 = vld [vmem:[%s7427_s16] ss:$0 sm:$0xff] }
0x18c4   : > { %v5462_v45 = vpop.f32.mrf.mxu0 }
0x18c5   : > { %3988 = vadd.xlane.f32.xlu0 %v3982_v44  ;;  %v3985_v20 = vadd.f32 %v5462_v45, %v7021_v59 }
0x18c6   : > { %v3970_v47 = vpop.f32.mrf.mxu0 }
0x18c7   : > { %v3983_v38 = vadd.f32 %v3970_v47, %v7015_v49 }
0x18c9   : > { %3992 = vadd.xlane.f32.xlu0 %v3984_v30  ;;  %3990 = vadd.xlane.f32.xlu1 %v3983_v38 }
0x18cd   : > { %3994 = vadd.xlane.f32.xlu0 %v3985_v20 }
0x194e   : > { %v3989_v48 = vpop.xlane.xlu0 %3988 }
0x194f   : > { %v3996_v37 = vmul.f32 0.0078125, %v3989_v48 }
0x1951   : > { %v7304_v28 = vsub.f32 %v3982_v44, %v3996_v37 }
0x1952   : > { %v3993_v32 = vpop.xlane.xlu0 %3992  ;;  %v3991_v33 = vpop.xlane.xlu1 %3990 }
0x1953   : > { %v3998_v8 = vmul.f32 0.0078125, %v3993_v32  ;;  %v3997_v12 = vmul.f32 0.0078125, %v3991_v33  ;;  %v4004_v49 = vmul.f32 %v7304_v28, %v7304_v28 }
0x1955   : > { %v7308_v58 = vsub.f32 %v3984_v30, %v3998_v8  ;;  %v7310_v13 = vsub.f32 %v3983_v38, %v3997_v12  ;;  %4008 = vadd.xlane.f32.xlu0 %v4004_v49  ;;  %v4831_v38 = vld [vmem:[%s7428_s17] ss:$0 sm:$0xff] }
0x1956   : > { %v3995_v59 = vpop.xlane.xlu0 %3994 }
0x1957   : > { %v3999_v29 = vmul.f32 0.0078125, %v3995_v59  ;;  %v4006_v51 = vmul.f32 %v7308_v58, %v7308_v58  ;;  %v4005_v40 = vmul.f32 %v7310_v13, %v7310_v13  ;;  %v5731_v59 = vld [vmem:[#allocation20 + $0x50] sm:$0xff]  }
0x1958   : > { %5053 = vmatprep.subr.bf16.mxu0 %v5731_v59 }
0x1959   : > { %v7316_v17 = vsub.f32 %v3985_v20, %v3999_v29  ;;  %4012 = vadd.xlane.f32.xlu0 %v4006_v51  ;;  %4010 = vadd.xlane.f32.xlu1 %v4005_v40  ;;  %v5732_v29 = vld [vmem:[#allocation20 + $0x10] sm:$0xff]   ;;  %v5734_v51 = vld [vmem:[#allocation20 + $0x8] sm:$0xff]   ;;  %v5735_v40 = vld [vmem:[#allocation20 + $0x40] sm:$0xff]  }
0x195a   : > { %5054 = vmatpush3.bf16.msra.mxu0 %v5732_v29 }
0x195b   : > { %v4007_v34 = vmul.f32 %v7316_v17, %v7316_v17 }
0x195d   : > { %4014 = vadd.xlane.f32.xlu1 %v4007_v34  ;;  %v4072_v34 = vlaneseq }
0x195f   : > { %v4073_v35 = vshrl.u32 %v4072_v34, 7 }
0x1961   : > { %v4078_v46 = vsub.s32 1, %v4073_v35  ;;  %v4074_v53 = vsub.s32 0, %v4073_v35 }
0x1963   : > { %v4079_v57 = vrot.slane %v4070_v54, %v4078_v46  ;;  %v4075_v7 = vrot.slane %v4070_v54, %v4074_v53 }
0x19de   : > { %v4009_v31 = vpop.xlane.xlu0 %4008 }
0x19df   : > { %v4016_v3 = vmul.f32 0.0078125, %v4009_v31 }
0x19e1   : > { %v4020_v36 = vadd.f32 1e-05, %v4016_v3 }
0x19e2   : > { %v4013_v15 = vpop.xlane.xlu0 %4012  ;;  %v4011_v25 = vpop.xlane.xlu1 %4010 }
0x19e3   : > { %5875 = vrsqrt.f32 %v4020_v36  ;;  %v4018_v6 = vmul.f32 0.0078125, %v4013_v15  ;;  %v4017_v42 = vmul.f32 0.0078125, %v4011_v25 }
0x19e5   : > { %v4021_v21 = vadd.f32 1e-05, %v4017_v42  ;;  %v4022_v23 = vadd.f32 1e-05, %v4018_v6 }
0x19e6   : > { %v4015_v43 = vpop.xlane.xlu1 %4014 }
0x19e7   : > { %v4019_v39 = vmul.f32 0.0078125, %v4015_v43  ;;  %5877 = vrsqrt.f32 %v4021_v21 }
0x19e8   : > { %5879 = vrsqrt.f32 %v4022_v23 }
0x19e9   : > { %v4023_v41 = vadd.f32 1e-05, %v4019_v39  ;;  %v4848_v39 = vld [vmem:[%s7424_s13] ss:$0 sm:$0xff] }
0x19eb   : > { %5881 = vrsqrt.f32 %v4023_v41 }
0x19f0   : > { %v5876_v0 = vpop.eup %5875 }
0x19f1   : > { %v4028_v1 = vmul.f32 %v5876_v0, %v7304_v28 }
0x19f3   : > { %v4038_v47 = vmul.f32 %v4830_v4, %v4028_v1 }
0x19f4   : > { %v5878_v44 = vpop.eup %5877 }
0x19f5   : > { %v4029_v45 = vmul.f32 %v5878_v44, %v7310_v13  ;;  %v5880_v30 = vpop.eup %5879  ;;  %v7330_v48 = vadd.f32 %v4831_v38, %v4038_v47 }
0x19f6   : > { %v4030_v28 = vmul.f32 %v5880_v30, %v7308_v58  ;;  %v5733_v58 = vld [vmem:[#allocation20 + $0x48] sm:$0xff]  }
0x19f7   : > { %v4039_v24 = vmul.f32 %v4830_v4, %v4029_v45  ;;  %5055 = vmatprep.subr.bf16.mxu0 %v5733_v58 }
0x19f8   : > { %v5882_v20 = vpop.eup %5881  ;;  %v4040_v8 = vmul.f32 %v4830_v4, %v4030_v28  ;;  %5056 = vmatpush3.bf16.msra.mxu0 %v5734_v51 }
0x19f9   : > { %v4031_v26 = vmul.f32 %v5882_v20, %v7316_v17  ;;  %v7332_v37 = vadd.f32 %v4831_v38, %v4039_v24  ;;  %v5736_v17 = vld [vmem:[#allocation20] sm:$0xff]   ;;  %5057 = vmatprep.subr.bf16.mxu0 %v5735_v40 }
0x19fa   : > { %v7340_v49 = vadd.f32 %v4831_v38, %v4040_v8 }
0x19fb   : > { %v4052_v32 = vpack.c.bf16 %v7332_v37, %v7330_v48  ;;  %v4041_v33 = vmul.f32 %v4830_v4, %v4031_v26 }
0x19fc   : > { %5058 = vmatpush3.bf16.msra.mxu0 %v5736_v17 }
0x19fd   : > { %4195 = vmatmul.mubr.bf16.vlgmr.msra.gmra.mxu1 %v4052_v32  ;;  %v7338_v12 = vadd.f32 %v4831_v38, %v4041_v33 }
0x19fe   : > { %4204 = vmatprep.mubr.bf16.mxu1 %v6324_v60 }
0x19ff   : > { %v4053_v13 = vpack.c.bf16 %v7338_v12, %v7340_v49 }
0x1a05   : > { %4205 = vmatmul.mubr.bf16.gmra.mxu1 %v4053_v13 }
0x1abd   : > { %v4196_v52 = vpop.f32.mrf.mxu1 }
0x1abe   : > { %v4197_v50 = vadd.f32 %v4196_v52, %v4075_v7 }
0x1abf   : > { %v4198_v9 = vpop.f32.mrf.mxu1 }
0x1ac0   : > { %v4199_v60 = vadd.f32 %v4198_v9, %v4079_v57  ;;  %v4215_v10 = vmax.f32 %v4197_v50, 0.0 }
0x1ac1   : > { %v4200_v18 = vpop.f32.mrf.mxu1 }
0x1ac2   : > { %v4201_v61 = vadd.f32 %v4200_v18, %v4075_v7  ;;  %v4216_v2 = vmax.f32 %v4199_v60, 0.0 }
0x1ac3   : > { %v4202_v55 = vpop.f32.mrf.mxu1 }
0x1ac4   : > { %v4203_v56 = vadd.f32 %v4202_v55, %v4079_v57  ;;  %v4217_v62 = vmax.f32 %v4201_v61, 0.0 }
0x1ac5   : > { %v4206_v63 = vpop.f32.mrf.mxu1 }
0x1ac6   : > { %v4218_v5 = vmax.f32 %v4203_v56, 0.0  ;;  %v4223_v19 = vpack.c.bf16 %v4217_v62, %v4215_v10  ;;  %v4207_v31 = vadd.f32 %v4206_v63, %v4075_v7 }
0x1ac7   : > { %v4208_v14 = vpop.f32.mrf.mxu1 }
0x1ac8   : > { %v4224_v16 = vpack.c.bf16 %v4218_v5, %v4216_v2  ;;  %v4209_v11 = vadd.f32 %v4208_v14, %v4079_v57  ;;  %v4219_v42 = vmax.f32 %v4207_v31, 0.0 }
0x1ac9   : > { %v4210_v22 = vpop.f32.mrf.mxu1 }
0x1aca   : > { %v4211_v27 = vadd.f32 %v4210_v22, %v4075_v7  ;;  %4394 = vmatprep.mubr.bf16.mxu0 %v4224_v16  ;;  %v4220_v25 = vmax.f32 %v4209_v11, 0.0  ;;  %v4865_v16 = vld [vmem:[%s7503_s30] ss:$0 sm:$0xff] }
0x1acb   : > { %v4212_v3 = vpop.f32.mrf.mxu1  ;;  %4395 = vmatmul.mubr.bf16.vlgmr.msra.gmra.mxu0 %v4223_v19  ;;  %v4866_v22 = vld [vmem:[%s7504_s6] ss:$0 sm:$0xff] }
0x1acc   : > { %v4213_v36 = vadd.f32 %v4212_v3, %v4079_v57  ;;  %v4221_v15 = vmax.f32 %v4211_v27, 0.0 }
0x1ace   : > { %v4222_v6 = vmax.f32 %v4213_v36, 0.0  ;;  %v4225_v23 = vpack.c.bf16 %v4221_v15, %v4219_v42 }
0x1ad0   : > { %v4226_v21 = vpack.c.bf16 %v4222_v6, %v4220_v25 }
0x1ad2   : > { %4402 = vmatprep.mubr.bf16.mxu0 %v4226_v21 }
0x1ad3   : > { %4403 = vmatmul.mubr.bf16.gmra.mxu0 %v4225_v23 }
0x1b8b   : > { %v5059_v43 = vpop.f32.mrf.mxu0 }
0x1b8d   : > { %v5060_v41 = vpop.f32.mrf.mxu0 }
0x1b8e   : > { %v5061_v0 = vadd.f32 %v5060_v41, %v5059_v43 }
0x1b8f   : > { %v5062_v1 = vpop.f32.mrf.mxu0 }
0x1b90   : > { %v4397_v4 = vadd.f32 %v5061_v0, %v4848_v39 }
0x1b91   : > { %v5063_v44 = vpop.f32.mrf.mxu0 }
0x1b92   : > { %v5064_v45 = vadd.f32 %v5063_v44, %v5062_v1  ;;  %v4411_v47 = vadd.f32 %v4397_v4, %v7330_v48 }
0x1b93   : > { %v5065_v30 = vpop.f32.mrf.mxu0 }
0x1b94   : > { %v4400_v38 = vadd.f32 %v5064_v45, %v4848_v39  ;;  %4417 = vadd.xlane.f32.xlu0 %v4411_v47 }
0x1b95   : > { %v5066_v20 = vpop.f32.mrf.mxu0 }
0x1b96   : > { %v5067_v24 = vadd.f32 %v5066_v20, %v5065_v30  ;;  %v4412_v26 = vadd.f32 %v4400_v38, %v7332_v37 }
0x1b97   : > { %v5068_v28 = vpop.f32.mrf.mxu0 }
0x1b98   : > { %v4405_v32 = vadd.f32 %v5067_v24, %v4848_v39  ;;  %4419 = vadd.xlane.f32.xlu1 %v4412_v26 }
0x1b99   : > { %v5069_v33 = vpop.f32.mrf.mxu0 }
0x1b9a   : > { %v5070_v8 = vadd.f32 %v5069_v33, %v5068_v28  ;;  %v4413_v13 = vadd.f32 %v4405_v32, %v7340_v49 }
0x1b9c   : > { %v4408_v59 = vadd.f32 %v5070_v8, %v4848_v39  ;;  %4421 = vadd.xlane.f32.xlu0 %v4413_v13 }
0x1b9e   : > { %v4414_v29 = vadd.f32 %v4408_v59, %v7338_v12 }
0x1ba0   : > { %4423 = vadd.xlane.f32.xlu1 %v4414_v29 }
0x1c1d   : > { %v4418_v48 = vpop.xlane.xlu0 %4417 }
0x1c1e   : > { %v4425_v58 = vmul.f32 0.0078125, %v4418_v48 }
0x1c20   : > { %v4429_v51 = vsub.f32 %v4411_v47, %v4425_v58 }
0x1c21   : > { %v4420_v40 = vpop.xlane.xlu1 %4419 }
0x1c22   : > { %v4426_v17 = vmul.f32 0.0078125, %v4420_v40  ;;  %v4433_v34 = vmul.f32 %v4429_v51, %v4429_v51 }
0x1c24   : > { %v4430_v35 = vsub.f32 %v4412_v26, %v4426_v17  ;;  %4437 = vadd.xlane.f32.xlu0 %v4433_v34 }
0x1c25   : > { %v4422_v37 = vpop.xlane.xlu0 %4421 }
0x1c26   : > { %v4427_v46 = vmul.f32 0.0078125, %v4422_v37  ;;  %v4434_v53 = vmul.f32 %v4430_v35, %v4430_v35 }
0x1c28   : > { %v4431_v54 = vsub.f32 %v4413_v13, %v4427_v46  ;;  %4439 = vadd.xlane.f32.xlu1 %v4434_v53 }
0x1c29   : > { %v4424_v52 = vpop.xlane.xlu1 %4423 }
0x1c2a   : > { %v4428_v49 = vmul.f32 0.0078125, %v4424_v52  ;;  %v4435_v57 = vmul.f32 %v4431_v54, %v4431_v54 }
0x1c2c   : > { %v4432_v7 = vsub.f32 %v4414_v29, %v4428_v49  ;;  %4441 = vadd.xlane.f32.xlu0 %v4435_v57 }
0x1c2e   : > { %v4436_v12 = vmul.f32 %v4432_v7, %v4432_v7 }
0x1c30   : > { %4443 = vadd.xlane.f32.xlu1 %v4436_v12 }
0x1cad   : > { %v4438_v9 = vpop.xlane.xlu0 %4437 }
0x1cae   : > { %v4445_v18 = vmul.f32 0.0078125, %v4438_v9 }
0x1cb0   : > { %v4449_v60 = vadd.f32 1e-05, %v4445_v18 }
0x1cb1   : > { %v4440_v61 = vpop.xlane.xlu1 %4439 }
0x1cb2   : > { %5883 = vrsqrt.f32 %v4449_v60  ;;  %v4446_v50 = vmul.f32 0.0078125, %v4440_v61 }
0x1cb4   : > { %v4450_v55 = vadd.f32 1e-05, %v4446_v50 }
0x1cb5   : > { %v4442_v56 = vpop.xlane.xlu0 %4441 }
0x1cb6   : > { %5885 = vrsqrt.f32 %v4450_v55  ;;  %v4447_v62 = vmul.f32 0.0078125, %v4442_v56 }
0x1cb8   : > { %v4451_v63 = vadd.f32 1e-05, %v4447_v62 }
0x1cb9   : > { %v4444_v2 = vpop.xlane.xlu1 %4443 }
0x1cba   : > { %5887 = vrsqrt.f32 %v4451_v63  ;;  %v4448_v5 = vmul.f32 0.0078125, %v4444_v2 }
0x1cbc   : > { %v4452_v10 = vadd.f32 1e-05, %v4448_v5 }
0x1cbe   : > { %5889 = vrsqrt.f32 %v4452_v10 }
0x1cbf   : > { %v5884_v14 = vpop.eup %5883 }
0x1cc0   : > { %v4457_v19 = vmul.f32 %v5884_v14, %v4429_v51 }
0x1cc2   : > { %v4467_v11 = vmul.f32 %v4865_v16, %v4457_v19 }
0x1cc3   : > { %v5886_v27 = vpop.eup %5885 }
0x1cc4   : > { %v4477_v31 = vadd.f32 %v4866_v22, %v4467_v11  ;;  %v4458_v3 = vmul.f32 %v5886_v27, %v4430_v35 }
0x1cc6   : > { %4481 = vst [vmem:[%s834_s4] sm:$0xff] %v4477_v31  ;;  %v4468_v36 = vmul.f32 %v4865_v16, %v4458_v3 }
0x1cc7   : > { %v5888_v15 = vpop.eup %5887 }
0x1cc8   : > { %v4478_v25 = vadd.f32 %v4866_v22, %v4468_v36  ;;  %v4459_v6 = vmul.f32 %v5888_v15, %v4431_v54 }
0x1cca   : > { %4482 = vst [vmem:[%s834_s4 + $0x8] sm:$0xff] %v4478_v25  ;;  %v4469_v42 = vmul.f32 %v4865_v16, %v4459_v6 }
0x1ccb   : > { %v5890_v21 = vpop.eup %5889 }
0x1ccc   : > { %v4479_v23 = vadd.f32 %v4866_v22, %v4469_v42  ;;  %v4460_v43 = vmul.f32 %v5890_v21, %v4432_v7 }
0x1cce   : > { %4483 = vst [vmem:[%s834_s4 + $0x10] sm:$0xff] %v4479_v23  ;;  %v4470_v39 = vmul.f32 %v4865_v16, %v4460_v43 }
0x1cd0   : > { %v4480_v41 = vadd.f32 %v4866_v22, %v4470_v39 }
0x1cd2   : > { %4484 = vst [vmem:[%s834_s4 + $0x18] sm:$0xff] %v4480_v41 }
0x1cd3   : > { %6222 = shalt.err (!%p6219_p11)
}
0x1cd4   : > { %s6223_s8 = scalar_lea.hbm %s7366_s26, 512  ;;  %s6227_s30 = scalar_lea.hbm %s7505_s25, 1024 }
0x1cd5   : > { %p6224_p12 = scmp.ne.s32.totalorder %s7366_s26, %s6223_s8  ;;  %p6228_p10 = scmp.lt.s32.totalorder %s7366_s26, %s7505_s25 }
0x1cd6   : > { %p6229_p1 = scmp.lt.s32.totalorder %s6227_s30, %s6223_s8 }
0x1cd7   : > { %p6225_p13 = pnand %p6224_p12, %p7506_p5 }
0x1cd8   : > { %p6230_p4 = por %p6229_p1, %p6228_p10 }
0x1cd9   : > { %p6226_p8 = pneg %p6225_p13 }
0x1cdb   : > { %p6231_p0 = pnand %p6230_p4, %p6226_p8 }
0x1cdd   : > { %6234 = shalt.err (!%p6231_p0)
}
0x1cde   : > { %s6326_s6 = smov 128   ;;  %s6327_s4 = smov 8  }
0x1cdf   : > { %5507 = dma.vmem_to_hbm [thread:$0]  (%p7506_p5), %s7368_s21, 512, %s7366_s26, %s4486_s9, %s6326_s6, %s6326_s6, %s6327_s4  }
0x1ce0 PF: > { %s7507_s18 = sld [smem:[#allocation35_spill]]  ;;  %s4515_s23 = sand.u32 1, %s6289_s1  }
0x1ce1   : > { %p7509_p7 = scmp.ge.s32.totalorder %s6301_s24, 2  ;;  %s4516_s27 = scalar_lea.sflag [#allocation4], %s4515_s23 }
0x1ce6   : > { %p7508_p3 = scmp.ne.s32.totalorder %s7507_s18, 0 }
0x1ce8   : > { %p5548_p6 = pnand %p7509_p7, %p7508_p3 }
0x1cea   : > { %p5549_p2 = pneg %p5548_p6 }
0x1cec   : > { %6284 = dma.done.wait (%p5549_p2), %s4516_s27, 512  }
0x1ced   : > { %6286 = vsyncadd (%p5549_p2), %s4516_s27, 4294966784  ;;  %s7510_s24 = sld [smem:[#allocation33_spill]]  ;;  %s7513_s1 = smov %s6293_s22 }
0x1cee   : > { %s7511_s29 = sld [smem:[#allocation32_spill]] }
0x1cef   : > { %s7512_s23 = sld [smem:[#allocation34_spill]] }
0x1cf3   : > { %p41_p9 = scmp.ge.s32.totalorder %s7510_s24, 4  }
0x1cf4   : > { %s7514_s22 = smov %s7511_s29 }
0x1cf5   :  { %43 = sbr.rel (!%p41_p9) target bundleno = 28 (0x1c), region = 198 }
0x1cfa   :  { %4521 = vsyncpa [#allocation3], 1 }
0x1cfb   :  { %4523 = vsyncpa [#allocation3 + $0x1], 1 }
0x1cfc   :  { %4524 = vsyncpa [#allocation6], 1 }
0x1cfd   :  { %4526 = vsyncpa [#allocation6 + $0x1], 1 }
0x1cfe   :  { %4527 = vsyncpa [#allocation9], 1 }
0x1cff   :  { %4528 = vsyncpa [#allocation12], 1 }
0x1d00   :  { %4529 = vsyncpa [#allocation15], 1 }
0x1d01   :  { %4530 = vsyncpa [#allocation18], 1 }
0x1d02   :  { %4531 = vsyncpa [#allocation21], 1 }
0x1d03   :  { %4532 = vsyncpa [#allocation4], 1 }
0x1d04   :  { %4534 = vsyncpa [#allocation4 + $0x1], 1 }

</bundles_post_ra>
